<compile_context>
chip_gen: v5e
topology: v5e:2x2
jax: 0.10.0
libtpu: 0.0.40
codegen_flags: <defaults>
</compile_context>

<pallas_src>
import math
from functools import partial

import numpy as np
import jax
import jax.numpy as jnp
from jax import lax
from jax.experimental import pallas as pl
from jax.experimental.pallas import tpu as pltpu

# ----- model hyperparameters (MixerModel(d_model, n_layer) with default Mamba cfg) -----
D_MODEL = 32
N_LAYER = 2
EXPAND = 2
D_INNER = EXPAND * D_MODEL          # 64  (E)
D_STATE = 16                        # N
D_CONV = 4                          # K
DT_RANK = math.ceil(D_MODEL / 16)   # 2  (R)
EPS = 1e-5
NVEC = 5 + D_CONV                   # rows in the packed per-layer vector slab

B = 2
L = 8
BL = B * L                          # merged token axis (sublanes)
BE = B * D_INNER                    # batch folded onto the lane axis for the scan (=128)


def _exp_dtype():
    """bf16 EUP exp on v6e/v7x; f32 elsewhere (v5e and older have no bf16 VPU/EUP)."""
    try:
        kind = jax.devices()[0].device_kind.lower()
    except Exception:
        return jnp.float32
    return jnp.bfloat16 if ("v6" in kind or "v7" in kind) else jnp.float32


# ----------------------------- small shared math -----------------------------
def _silu(x):
    return x * (1.0 / (1.0 + jnp.exp(-x)))


def _softplus(x):
    return jnp.maximum(x, 0.0) + jnp.log(1.0 + jnp.exp(-jnp.abs(x)))


def _layernorm(x, w, b, eps=EPS):
    xf = x.astype(jnp.float32)
    mu = jnp.mean(xf, axis=-1, keepdims=True)
    var = jnp.mean(jnp.square(xf - mu), axis=-1, keepdims=True)
    return (xf - mu) * lax.rsqrt(var + eps) * w + b


# ----------------------------- lane-folding helpers (inside kernel) -----------------------------
def _fold(a):
    """(B*L, F) -> (L, B*F): batch folded onto lanes (8-row aligned sublane slices)."""
    return jnp.concatenate([a[b * L:(b + 1) * L] for b in range(B)], axis=1)


def _unfold(a):
    """(L, B*E) -> (B*L, E)."""
    return jnp.concatenate([a[:, b * D_INNER:(b + 1) * D_INNER] for b in range(B)], axis=0)


def _tile_lanes(row):
    """(1, E) -> (1, B*E)."""
    return jnp.concatenate([row] * B, axis=1)


def _fold_state(cols, lane_ge):
    """cols: (B*L, N) -> (L, N, B*E) with out[l, n, b*E + e] = cols[b*L + l, n]."""
    parts = [jnp.broadcast_to(cols[b * L:(b + 1) * L][:, :, None], (L, D_STATE, BE))
             for b in range(B)]
    out = parts[0]
    for b in range(1, B):
        out = jnp.where(lane_ge[b - 1], parts[b], out)
    return out


# ----------------------------- one Mamba block (kernel body) -----------------------------
def _mamba_layer(hidden, residual, w_in, w_xf, w_out, a_lanes, vec,
                 conv_masks, lane_ge, y_scr, exp_dtype):
    """Block: residual = hidden + residual; hidden = Mamba(LayerNorm(residual)).

    vec rows: 0 ln_w(:D) | 1 ln_b(:D) | 2 conv_b | 3 dt_b | 4 D_skip | 5.. conv taps k=0..K-1.
    Activations are (B*L, feature); the selective scan runs in the (L, N, B*E) lane-folded layout.
    """
    ln_w = vec[0:1, :D_MODEL]
    ln_b = vec[1:2, :D_MODEL]
    conv_b = vec[2:3]
    dt_b = _tile_lanes(vec[3:4])                                        # (1, BE)
    d_skip = _tile_lanes(vec[4:5])                                      # (1, BE)

    # Add -> LayerNorm (pre-norm Block wiring)
    residual = hidden + residual
    xn = _layernorm(residual, ln_w, ln_b)                               # (BL, D) f32

    # fused in_proj (no bias): one (D, 2E) matmul, bf16 operands, f32 accumulation
    xz = jnp.dot(xn.astype(jnp.bfloat16), w_in,
                 preferred_element_type=jnp.float32)                    # (BL, 2E)
    x = xz[:, :D_INNER]
    z = xz[:, D_INNER:]

    # causal depthwise conv along L on the merged BL axis: masked sublane rolls + bias, SiLU
    acc = conv_b + vec[5 + D_CONV - 1:5 + D_CONV] * x                   # tap with zero shift
    for s in range(1, D_CONV):
        tap = vec[5 + D_CONV - 1 - s:5 + D_CONV - s]
        acc = acc + tap * jnp.where(conv_masks[s - 1],
                                    pltpu.roll(x, shift=s, axis=0), 0.0)
    x = _silu(acc)                                                      # (BL, E)

    # fused x_proj with dt_proj folded in (host-precomputed): cols [dt(E) | B(N) | C(N)]
    dbc = jnp.dot(x.astype(jnp.bfloat16), w_xf,
                  preferred_element_type=jnp.float32)                   # (BL, E+2N)

    # ---- selective scan, batch folded onto lanes (B*E = 128) ----
    xT = _fold(x)                                                       # (L, BE)
    dtT = _softplus(_fold(dbc[:, :D_INNER]) + dt_b)                     # (L, BE)
    Bt = _fold_state(dbc[:, D_INNER:D_INNER + D_STATE], lane_ge)        # (L, N, BE)
    Ct = _fold_state(dbc[:, D_INNER + D_STATE:], lane_ge)               # (L, N, BE)

    da_arg = dtT[:, None, :] * a_lanes[None]                            # (L, N, BE)
    if exp_dtype == jnp.float32:
        dA = jnp.exp(da_arg)
    else:                                                               # v6e/v7x: bf16 EUP exp
        dA = jnp.exp(da_arg.astype(exp_dtype)).astype(jnp.float32)
    dBx = (dtT * xT)[:, None, :] * Bt                                   # (L, N, BE)

    h = jnp.zeros((D_STATE, BE), jnp.float32)
    for t in range(L):                      # statically unrolled; serial path is h = a*h + b
        h = dA[t] * h + dBx[t]
        y_scr[t:t + 1, :] = jnp.sum(h * Ct[t], axis=0, keepdims=True)   # sublane reduce
    yT = y_scr[...]                                                     # (L, BE)

    # skip + gate in the lane-folded layout, then unfold once for the out projection
    yT = (yT + d_skip * xT) * _silu(_fold(z))
    out = jnp.dot(_unfold(yT).astype(jnp.bfloat16), w_out,
                  preferred_element_type=jnp.float32)                   # (BL, D)
    return out, residual


# ----------------------------- fused kernel (whole forward) -----------------------------
def _fused_kernel(x_ref, pos_ref, w_in_ref, w_xf_ref, w_out_ref,
                  a_ref, vec_ref, normf_ref, out_ref, y_scr, *, exp_dtype):
    hidden = x_ref[...]                     # (BL, D)
    residual = pos_ref[...]                 # (BL, D)

    # hoisted causal-conv masks (per-sequence position >= s), shared by all layers / taps
    pos_in_seq = jnp.bitwise_and(
        lax.broadcasted_iota(jnp.int32, (BL, D_INNER), 0), L - 1)
    conv_masks = [pos_in_seq >= s for s in range(1, D_CONV)]

    # hoisted lane-block masks for the batch-folded scan layout
    lane_idx = lax.broadcasted_iota(jnp.int32, (L, D_STATE, BE), 2)
    lane_ge = [lane_idx >= b * D_INNER for b in range(1, B)]

    for li in range(N_LAYER):               # static layer loop; all state stays in VMEM/vregs
        hidden, residual = _mamba_layer(
            hidden, residual,
            w_in_ref[li], w_xf_ref[li], w_out_ref[li],
            a_ref[li], vec_ref[li],
            conv_masks, lane_ge, y_scr, exp_dtype)
        # TODO(synk): drop_out_in_block / DropPath are identities at inference (p=0 / eval).

    # final Add -> LayerNorm (norm_f)
    residual = hidden + residual
    nf = normf_ref[...]
    out_ref[...] = _layernorm(residual, nf[0:1], nf[1:2]).astype(out_ref.dtype)


def mixer_model_forward(input_ids, pos, kparams):
    # Block #1 computes residual = hidden + residual, so passing hidden=input_ids and
    # residual=pos reproduces `hidden_states = input_ids + pos` exactly.
    x2 = input_ids.reshape(BL, D_MODEL)
    p2 = pos.reshape(BL, D_MODEL)
    args = (x2, p2, kparams['w_in'], kparams['w_xf'], kparams['w_out'],
            kparams['a_lanes'], kparams['vec'], kparams['normf'])
    vmem = pl.BlockSpec(memory_space=pltpu.MemorySpace.VMEM)
    out2 = pl.pallas_call(
        partial(_fused_kernel, exp_dtype=_exp_dtype()),
        out_shape=jax.ShapeDtypeStruct((BL, D_MODEL), jnp.float32),
        in_specs=[vmem] * len(args),
        out_specs=vmem,
        scratch_shapes=[pltpu.VMEM((L, BE), jnp.float32)],
    )(*args)
    # TODO(synk): on v7x (2 TensorCores), a parallel batch grid (grid=(B,),
    #   dimension_semantics=("parallel",)) would engage the second core; omitted because
    #   batch is folded onto the lane axis, so one program already fills 128 lanes at B=2.
    # TODO(synk): at non-toy B/L, tile the L axis with a grid ("arbitrary", scan state in
    #   VMEM scratch) and compute dA/dBx per tile to respect the v7x 64 MiB VMEM ceiling.
    return out2.reshape(B, L, D_MODEL)


# ----------------------------- independent pure-JAX f32 reference -----------------------------
def _mamba_ref(xn, p):
    """Plain f32 reference of Mamba.forward (inference path, PyTorch-layout weights)."""
    Bb, Ll, _ = xn.shape
    E, N, K, R = D_INNER, D_STATE, D_CONV, DT_RANK
    xz = jnp.einsum('bld,ed->ble', xn, p['in_w'])                    # in_proj (no bias)
    x, z = xz[..., :E], xz[..., E:]
    xp = jnp.pad(x, ((0, 0), (K - 1, 0), (0, 0)))                    # causal depthwise conv1d
    xc = p['conv_b'] + sum(p['conv_w'][:, k] * xp[:, k:k + Ll, :] for k in range(K))
    x = xc * jax.nn.sigmoid(xc)                                      # SiLU
    dbc = jnp.einsum('ble,re->blr', x, p['x_w'])                     # x_proj (no bias)
    dt = jax.nn.softplus(
        jnp.einsum('blr,er->ble', dbc[..., :R], p['dt_w']) + p['dt_b'])
    Bm, Cm = dbc[..., R:R + N], dbc[..., R + N:]
    A = -jnp.exp(p['A_log'])                                         # (E, N)
    dA = jnp.exp(jnp.einsum('ble,en->blen', dt, A))
    dBx = jnp.einsum('ble,bln,ble->blen', dt, Bm, x)
    h = jnp.zeros((Bb, E, N), jnp.float32)
    ys = []
    for t in range(Ll):
        h = dA[:, t] * h + dBx[:, t]
        ys.append(jnp.einsum('ben,bn->be', h, Cm[:, t]))
    y = jnp.stack(ys, axis=1)
    y = (y + x * p['D']) * (z * jax.nn.sigmoid(z))
    return jnp.einsum('ble,de->bld', y, p['out_w'])                  # out_proj (no bias)


def mixer_model_ref(input_ids, pos, ref_params):
    hidden = input_ids + pos
    residual = None
    for p in ref_params['layers']:
        residual = hidden + residual if residual is not None else hidden
        hidden = _mamba_ref(_layernorm(residual, p['ln_w'], p['ln_b']), p)
    residual = hidden + residual
    return _layernorm(residual, ref_params['nf_w'], ref_params['nf_b'])


# ----------------------------- parameter init + kernel packing -----------------------------
def init_params(key, std=0.02):
    """Returns (PyTorch-layout f32 reference params, packed/folded kernel params)."""
    layers = []
    for _ in range(N_LAYER):
        key, *ks = jax.random.split(key, 8)
        layers.append(dict(
            in_w=jax.random.normal(ks[0], (2 * D_INNER, D_MODEL), jnp.float32) * std,
            conv_w=jax.random.normal(ks[1], (D_INNER, D_CONV), jnp.float32) * std,
            conv_b=jax.random.normal(ks[2], (D_INNER,), jnp.float32) * std,
            x_w=jax.random.normal(ks[3], (DT_RANK + 2 * D_STATE, D_INNER), jnp.float32) * std,
            dt_w=jax.random.normal(ks[4], (D_INNER, DT_RANK), jnp.float32) * std,
            dt_b=jax.random.normal(ks[5], (D_INNER,), jnp.float32) * std,
            # out_proj.weight rescaled by 1/sqrt(n_layer) (prenorm-residual rescale)
            out_w=jax.random.normal(ks[6], (D_MODEL, D_INNER), jnp.float32)
                  * std / math.sqrt(N_LAYER),
            A_log=jnp.log(jnp.broadcast_to(
                jnp.arange(1, D_STATE + 1, dtype=jnp.float32), (D_INNER, D_STATE))),
            D=jnp.ones((D_INNER,), jnp.float32),
            ln_w=jnp.ones((D_MODEL,), jnp.float32),
            ln_b=jnp.zeros((D_MODEL,), jnp.float32),
        ))
    ref = dict(layers=layers,
               nf_w=jnp.ones((D_MODEL,), jnp.float32),
               nf_b=jnp.zeros((D_MODEL,), jnp.float32))

    # ---- pack / fold for the kernel ----
    pad = D_INNER - D_MODEL
    w_in, w_xf, w_out, a_lanes, vec = [], [], [], [], []
    for p in layers:
        x_wT = p['x_w'].T                                            # (E, R+2N): [dt_r | B | C]
        dt_fold = x_wT[:, :DT_RANK] @ p['dt_w'].T                    # fold dt_proj -> (E, E)
        w_xf.append(jnp.concatenate(
            [dt_fold, x_wT[:, DT_RANK:DT_RANK + D_STATE], x_wT[:, DT_RANK + D_STATE:]],
            axis=1))                                                 # (E, E+2N): [dt | B | C]
        w_in.append(p['in_w'].T)                                     # (D, 2E): [x | z]
        w_out.append(p['out_w'].T)                                   # (E, D)
        A = -jnp.exp(p['A_log'])                                     # host-precomputed A
        a_lanes.append(jnp.tile(A.T, (1, B)))                        # (N, B*E)
        vec.append(jnp.stack(
            [jnp.pad(p['ln_w'], (0, pad)), jnp.pad(p['ln_b'], (0, pad)),
             p['conv_b'], p['dt_b'], p['D']]
            + [p['conv_w'][:, k] for k in range(D_CONV)], axis=0))   # (5+K, E)

    kparams = dict(
        w_in=jnp.stack(w_in).astype(jnp.bfloat16),                   # MXU operands in bf16
        w_xf=jnp.stack(w_xf).astype(jnp.bfloat16),
        w_out=jnp.stack(w_out).astype(jnp.bfloat16),
        a_lanes=jnp.stack(a_lanes),                                  # (n_layer, N, B*E) f32
        vec=jnp.stack(vec),                                          # (n_layer, 5+K, E) f32
        normf=jnp.stack([ref['nf_w'], ref['nf_b']], axis=0),         # (2, D)
    )
    return ref, kparams


# ----------------------------- main -----------------------------
if __name__ == "__main__":
    key = jax.random.PRNGKey(0)
    kx, kp, kw = jax.random.split(key, 3)
    input_ids = jax.random.normal(kx, (B, L, D_MODEL), jnp.float32)   # token features
    pos = jax.random.normal(kp, (B, L, D_MODEL), jnp.float32)         # positional embedding
    ref_params, kparams = init_params(kw)

    out = jax.block_until_ready(jax.jit(mixer_model_forward)(input_ids, pos, kparams))

    ref = mixer_model_ref(input_ids, pos, ref_params)
    assert out.shape == (B, L, D_MODEL)
    assert bool(jnp.all(jnp.isfinite(out)))
    np.testing.assert_allclose(np.asarray(out), np.asarray(ref), rtol=2e-2, atol=2e-2)

    print("KERNEL_OK")
</pallas_src>

<mosaic_0001>
module attributes {stable_mosaic.version = 11 : i64} {
  func.func @_fused_kernel(%arg0: memref<16x32xf32, #tpu.memory_space<vmem>>, %arg1: memref<16x32xf32, #tpu.memory_space<vmem>>, %arg2: memref<2x32x128xbf16, #tpu.memory_space<vmem>>, %arg3: memref<2x64x96xbf16, #tpu.memory_space<vmem>>, %arg4: memref<2x64x32xbf16, #tpu.memory_space<vmem>>, %arg5: memref<2x16x128xf32, #tpu.memory_space<vmem>>, %arg6: memref<2x9x64xf32, #tpu.memory_space<vmem>>, %arg7: memref<2x32xf32, #tpu.memory_space<vmem>>, %arg8: memref<16x32xf32, #tpu.memory_space<vmem>>, %arg9: memref<8x128xf32, #tpu.memory_space<vmem>>) attributes {dimension_semantics = [], scalar_prefetch = 0 : i64, scratch_operands = 1 : i64, tpu.core_type = #tpu.core_type<tc>} {
    %c0 = arith.constant 0 : index
    %c0_0 = arith.constant 0 : index
    %0 = vector.load %arg0[%c0, %c0_0] : memref<16x32xf32, #tpu.memory_space<vmem>>, vector<16x32xf32>
    %c0_1 = arith.constant 0 : index
    %c0_2 = arith.constant 0 : index
    %1 = vector.load %arg1[%c0_1, %c0_2] : memref<16x32xf32, #tpu.memory_space<vmem>>, vector<16x32xf32>
    %2 = tpu.iota {dimensions = array<i32: 0>} : vector<16x64xi32>
    %c7_i32 = arith.constant 7 : i32
    %3 = vector.broadcast %c7_i32 : i32 to vector<16x64xi32>
    %4 = arith.andi %2, %3 : vector<16x64xi32>
    %c1_i32 = arith.constant 1 : i32
    %5 = vector.broadcast %c1_i32 : i32 to vector<16x64xi32>
    %6 = arith.cmpi sge, %4, %5 : vector<16x64xi32>
    %c2_i32 = arith.constant 2 : i32
    %7 = vector.broadcast %c2_i32 : i32 to vector<16x64xi32>
    %8 = arith.cmpi sge, %4, %7 : vector<16x64xi32>
    %c3_i32 = arith.constant 3 : i32
    %9 = vector.broadcast %c3_i32 : i32 to vector<16x64xi32>
    %10 = arith.cmpi sge, %4, %9 : vector<16x64xi32>
    %11 = tpu.iota {dimensions = array<i32: 2>} : vector<8x16x128xi32>
    %c64_i32 = arith.constant 64 : i32
    %12 = vector.broadcast %c64_i32 : i32 to vector<8x16x128xi32>
    %13 = arith.cmpi sge, %11, %12 : vector<8x16x128xi32>
    %c0_3 = arith.constant 0 : index
    %c0_4 = arith.constant 0 : index
    %c0_5 = arith.constant 0 : index
    %14 = vector.load %arg2[%c0_3, %c0_4, %c0_5] : memref<2x32x128xbf16, #tpu.memory_space<vmem>>, vector<1x32x128xbf16>
    %15 = vector.shape_cast %14 : vector<1x32x128xbf16> to vector<32x128xbf16>
    %c0_6 = arith.constant 0 : index
    %c0_7 = arith.constant 0 : index
    %c0_8 = arith.constant 0 : index
    %16 = vector.load %arg3[%c0_6, %c0_7, %c0_8] : memref<2x64x96xbf16, #tpu.memory_space<vmem>>, vector<1x64x96xbf16>
    %17 = vector.shape_cast %16 : vector<1x64x96xbf16> to vector<64x96xbf16>
    %c0_9 = arith.constant 0 : index
    %c0_10 = arith.constant 0 : index
    %c0_11 = arith.constant 0 : index
    %18 = vector.load %arg4[%c0_9, %c0_10, %c0_11] : memref<2x64x32xbf16, #tpu.memory_space<vmem>>, vector<1x64x32xbf16>
    %19 = vector.shape_cast %18 : vector<1x64x32xbf16> to vector<64x32xbf16>
    %c0_12 = arith.constant 0 : index
    %c0_13 = arith.constant 0 : index
    %c0_14 = arith.constant 0 : index
    %20 = vector.load %arg5[%c0_12, %c0_13, %c0_14] : memref<2x16x128xf32, #tpu.memory_space<vmem>>, vector<1x16x128xf32>
    %21 = vector.shape_cast %20 : vector<1x16x128xf32> to vector<16x128xf32>
    %c0_15 = arith.constant 0 : index
    %c0_16 = arith.constant 0 : index
    %c0_17 = arith.constant 0 : index
    %22 = vector.load %arg6[%c0_15, %c0_16, %c0_17] : memref<2x9x64xf32, #tpu.memory_space<vmem>>, vector<1x9x64xf32>
    %23 = vector.shape_cast %22 : vector<1x9x64xf32> to vector<9x64xf32>
    %24 = vector.extract_strided_slice %23 {offsets = [0, 0], sizes = [1, 32], strides = [1, 1]} : vector<9x64xf32> to vector<1x32xf32>
    %25 = vector.extract_strided_slice %23 {offsets = [1, 0], sizes = [1, 32], strides = [1, 1]} : vector<9x64xf32> to vector<1x32xf32>
    %26 = vector.extract_strided_slice %23 {offsets = [2, 0], sizes = [1, 64], strides = [1, 1]} : vector<9x64xf32> to vector<1x64xf32>
    %27 = vector.extract_strided_slice %23 {offsets = [3, 0], sizes = [1, 64], strides = [1, 1]} : vector<9x64xf32> to vector<1x64xf32>
    %28 = tpu.concatenate %27, %27 in 1 : vector<1x64xf32>, vector<1x64xf32> -> vector<1x128xf32>
    %29 = vector.extract_strided_slice %23 {offsets = [4, 0], sizes = [1, 64], strides = [1, 1]} : vector<9x64xf32> to vector<1x64xf32>
    %30 = tpu.concatenate %29, %29 in 1 : vector<1x64xf32>, vector<1x64xf32> -> vector<1x128xf32>
    %31 = arith.addf %0, %1 : vector<16x32xf32>
    %cst = arith.constant dense<0.000000e+00> : vector<16xf32>
    %32 = vector.multi_reduction <add>, %31, %cst [1] : vector<16x32xf32> to vector<16xf32>
    %33 = vector.shape_cast %32 : vector<16xf32> to vector<16x1xf32>
    %cst_18 = arith.constant 3.200000e+01 : f32
    %34 = vector.broadcast %cst_18 : f32 to vector<16x1xf32>
    %35 = arith.divf %33, %34 : vector<16x1xf32>
    %36 = vector.broadcast %35 : vector<16x1xf32> to vector<16x32xf32>
    %37 = arith.subf %31, %36 : vector<16x32xf32>
    %38 = arith.mulf %37, %37 : vector<16x32xf32>
    %cst_19 = arith.constant dense<0.000000e+00> : vector<16xf32>
    %39 = vector.multi_reduction <add>, %38, %cst_19 [1] : vector<16x32xf32> to vector<16xf32>
    %40 = vector.shape_cast %39 : vector<16xf32> to vector<16x1xf32>
    %cst_20 = arith.constant 3.200000e+01 : f32
    %41 = vector.broadcast %cst_20 : f32 to vector<16x1xf32>
    %42 = arith.divf %40, %41 : vector<16x1xf32>
    %43 = vector.broadcast %35 : vector<16x1xf32> to vector<16x32xf32>
    %44 = arith.subf %31, %43 : vector<16x32xf32>
    %cst_21 = arith.constant 9.99999974E-6 : f32
    %45 = vector.broadcast %cst_21 : f32 to vector<16x1xf32>
    %46 = arith.addf %42, %45 : vector<16x1xf32>
    %47 = math.rsqrt %46 : vector<16x1xf32>
    %48 = vector.broadcast %47 : vector<16x1xf32> to vector<16x32xf32>
    %49 = arith.mulf %44, %48 : vector<16x32xf32>
    %50 = vector.broadcast %24 : vector<1x32xf32> to vector<16x32xf32>
    %51 = arith.mulf %49, %50 : vector<16x32xf32>
    %52 = vector.broadcast %25 : vector<1x32xf32> to vector<16x32xf32>
    %53 = arith.addf %51, %52 : vector<16x32xf32>
    %54 = arith.truncf %53 : vector<16x32xf32> to vector<16x32xbf16>
    %cst_22 = arith.constant dense<0.000000e+00> : vector<16x128xf32>
    %55 = tpu.matmul %54, %15, %cst_22 {dimension_numbers = #tpu.dot_dimension_numbers<[1], [0], [0], [1], [0, 0, 1, 1], [], []>} : vector<16x32xbf16>, vector<32x128xbf16>, vector<16x128xf32> -> vector<16x128xf32>
    %56 = vector.extract_strided_slice %55 {offsets = [0, 0], sizes = [16, 64], strides = [1, 1]} : vector<16x128xf32> to vector<16x64xf32>
    %57 = vector.extract_strided_slice %55 {offsets = [0, 64], sizes = [16, 64], strides = [1, 1]} : vector<16x128xf32> to vector<16x64xf32>
    %58 = vector.extract_strided_slice %23 {offsets = [8, 0], sizes = [1, 64], strides = [1, 1]} : vector<9x64xf32> to vector<1x64xf32>
    %59 = vector.broadcast %58 : vector<1x64xf32> to vector<16x64xf32>
    %60 = arith.mulf %59, %56 : vector<16x64xf32>
    %61 = vector.broadcast %26 : vector<1x64xf32> to vector<16x64xf32>
    %62 = arith.addf %61, %60 : vector<16x64xf32>
    %63 = vector.extract_strided_slice %23 {offsets = [7, 0], sizes = [1, 64], strides = [1, 1]} : vector<9x64xf32> to vector<1x64xf32>
    %c1_i32_23 = arith.constant 1 : i32
    %64 = tpu.dynamic_rotate %56 by %c1_i32_23 dim 0 : vector<16x64xf32>, i32 -> vector<16x64xf32>
    %cst_24 = arith.constant 0.000000e+00 : f32
    %65 = vector.broadcast %cst_24 : f32 to vector<16x64xf32>
    %66 = arith.select %6, %64, %65 : vector<16x64xi1>, vector<16x64xf32>
    %67 = vector.broadcast %63 : vector<1x64xf32> to vector<16x64xf32>
    %68 = arith.mulf %67, %66 : vector<16x64xf32>
    %69 = arith.addf %62, %68 : vector<16x64xf32>
    %70 = vector.extract_strided_slice %23 {offsets = [6, 0], sizes = [1, 64], strides = [1, 1]} : vector<9x64xf32> to vector<1x64xf32>
    %c2_i32_25 = arith.constant 2 : i32
    %71 = tpu.dynamic_rotate %56 by %c2_i32_25 dim 0 : vector<16x64xf32>, i32 -> vector<16x64xf32>
    %cst_26 = arith.constant 0.000000e+00 : f32
    %72 = vector.broadcast %cst_26 : f32 to vector<16x64xf32>
    %73 = arith.select %8, %71, %72 : vector<16x64xi1>, vector<16x64xf32>
    %74 = vector.broadcast %70 : vector<1x64xf32> to vector<16x64xf32>
    %75 = arith.mulf %74, %73 : vector<16x64xf32>
    %76 = arith.addf %69, %75 : vector<16x64xf32>
    %77 = vector.extract_strided_slice %23 {offsets = [5, 0], sizes = [1, 64], strides = [1, 1]} : vector<9x64xf32> to vector<1x64xf32>
    %c3_i32_27 = arith.constant 3 : i32
    %78 = tpu.dynamic_rotate %56 by %c3_i32_27 dim 0 : vector<16x64xf32>, i32 -> vector<16x64xf32>
    %cst_28 = arith.constant 0.000000e+00 : f32
    %79 = vector.broadcast %cst_28 : f32 to vector<16x64xf32>
    %80 = arith.select %10, %78, %79 : vector<16x64xi1>, vector<16x64xf32>
    %81 = vector.broadcast %77 : vector<1x64xf32> to vector<16x64xf32>
    %82 = arith.mulf %81, %80 : vector<16x64xf32>
    %83 = arith.addf %76, %82 : vector<16x64xf32>
    %cst_29 = arith.constant 0.000000e+00 : f32
    %84 = vector.broadcast %cst_29 : f32 to vector<16x64xf32>
    %85 = arith.subf %84, %83 : vector<16x64xf32>
    %86 = math.exp %85 : vector<16x64xf32>
    %cst_30 = arith.constant 1.000000e+00 : f32
    %87 = vector.broadcast %cst_30 : f32 to vector<16x64xf32>
    %88 = arith.addf %87, %86 : vector<16x64xf32>
    %cst_31 = arith.constant 1.000000e+00 : f32
    %89 = vector.broadcast %cst_31 : f32 to vector<16x64xf32>
    %90 = arith.divf %89, %88 : vector<16x64xf32>
    %91 = arith.mulf %83, %90 : vector<16x64xf32>
    %92 = arith.truncf %91 : vector<16x64xf32> to vector<16x64xbf16>
    %cst_32 = arith.constant dense<0.000000e+00> : vector<16x96xf32>
    %93 = tpu.matmul %92, %17, %cst_32 {dimension_numbers = #tpu.dot_dimension_numbers<[1], [0], [0], [1], [0, 0, 1, 1], [], []>} : vector<16x64xbf16>, vector<64x96xbf16>, vector<16x96xf32> -> vector<16x96xf32>
    %94 = vector.extract_strided_slice %91 {offsets = [0, 0], sizes = [8, 64], strides = [1, 1]} : vector<16x64xf32> to vector<8x64xf32>
    %95 = vector.extract_strided_slice %91 {offsets = [8, 0], sizes = [8, 64], strides = [1, 1]} : vector<16x64xf32> to vector<8x64xf32>
    %96 = tpu.concatenate %94, %95 in 1 : vector<8x64xf32>, vector<8x64xf32> -> vector<8x128xf32>
    %97 = vector.extract_strided_slice %93 {offsets = [0, 0], sizes = [16, 64], strides = [1, 1]} : vector<16x96xf32> to vector<16x64xf32>
    %98 = vector.extract_strided_slice %97 {offsets = [0, 0], sizes = [8, 64], strides = [1, 1]} : vector<16x64xf32> to vector<8x64xf32>
    %99 = vector.extract_strided_slice %97 {offsets = [8, 0], sizes = [8, 64], strides = [1, 1]} : vector<16x64xf32> to vector<8x64xf32>
    %100 = tpu.concatenate %98, %99 in 1 : vector<8x64xf32>, vector<8x64xf32> -> vector<8x128xf32>
    %101 = vector.broadcast %28 : vector<1x128xf32> to vector<8x128xf32>
    %102 = arith.addf %100, %101 : vector<8x128xf32>
    %cst_33 = arith.constant 0.000000e+00 : f32
    %103 = vector.broadcast %cst_33 : f32 to vector<8x128xf32>
    %104 = arith.maximumf %102, %103 : vector<8x128xf32>
    %105 = math.absf %102 : vector<8x128xf32>
    %cst_34 = arith.constant 0.000000e+00 : f32
    %106 = vector.broadcast %cst_34 : f32 to vector<8x128xf32>
    %107 = arith.subf %106, %105 : vector<8x128xf32>
    %108 = math.exp %107 : vector<8x128xf32>
    %cst_35 = arith.constant 1.000000e+00 : f32
    %109 = vector.broadcast %cst_35 : f32 to vector<8x128xf32>
    %110 = arith.addf %109, %108 : vector<8x128xf32>
    %111 = math.log %110 : vector<8x128xf32>
    %112 = arith.addf %104, %111 : vector<8x128xf32>
    %113 = vector.extract_strided_slice %93 {offsets = [0, 64], sizes = [16, 16], strides = [1, 1]} : vector<16x96xf32> to vector<16x16xf32>
    %114 = vector.extract_strided_slice %113 {offsets = [0, 0], sizes = [8, 16], strides = [1, 1]} : vector<16x16xf32> to vector<8x16xf32>
    %115 = vector.shape_cast %114 : vector<8x16xf32> to vector<8x16x1xf32>
    %116 = vector.shape_cast %115 : vector<8x16x1xf32> to vector<8x16x1xf32>
    %117 = vector.broadcast %116 : vector<8x16x1xf32> to vector<8x16x128xf32>
    %118 = vector.extract_strided_slice %113 {offsets = [8, 0], sizes = [8, 16], strides = [1, 1]} : vector<16x16xf32> to vector<8x16xf32>
    %119 = vector.shape_cast %118 : vector<8x16xf32> to vector<8x16x1xf32>
    %120 = vector.shape_cast %119 : vector<8x16x1xf32> to vector<8x16x1xf32>
    %121 = vector.broadcast %120 : vector<8x16x1xf32> to vector<8x16x128xf32>
    %122 = arith.select %13, %121, %117 : vector<8x16x128xi1>, vector<8x16x128xf32>
    %123 = vector.extract_strided_slice %93 {offsets = [0, 80], sizes = [16, 16], strides = [1, 1]} : vector<16x96xf32> to vector<16x16xf32>
    %124 = vector.extract_strided_slice %123 {offsets = [0, 0], sizes = [8, 16], strides = [1, 1]} : vector<16x16xf32> to vector<8x16xf32>
    %125 = vector.shape_cast %124 : vector<8x16xf32> to vector<8x16x1xf32>
    %126 = vector.shape_cast %125 : vector<8x16x1xf32> to vector<8x16x1xf32>
    %127 = vector.broadcast %126 : vector<8x16x1xf32> to vector<8x16x128xf32>
    %128 = vector.extract_strided_slice %123 {offsets = [8, 0], sizes = [8, 16], strides = [1, 1]} : vector<16x16xf32> to vector<8x16xf32>
    %129 = vector.shape_cast %128 : vector<8x16xf32> to vector<8x16x1xf32>
    %130 = vector.shape_cast %129 : vector<8x16x1xf32> to vector<8x16x1xf32>
    %131 = vector.broadcast %130 : vector<8x16x1xf32> to vector<8x16x128xf32>
    %132 = arith.select %13, %131, %127 : vector<8x16x128xi1>, vector<8x16x128xf32>
    %133 = vector.shape_cast %112 : vector<8x128xf32> to vector<8x1x128xf32>
    %134 = vector.shape_cast %21 : vector<16x128xf32> to vector<1x16x128xf32>
    %135 = vector.broadcast %133 : vector<8x1x128xf32> to vector<8x16x128xf32>
    %136 = vector.broadcast %134 : vector<1x16x128xf32> to vector<8x16x128xf32>
    %137 = arith.mulf %135, %136 : vector<8x16x128xf32>
    %138 = math.exp %137 : vector<8x16x128xf32>
    %139 = arith.mulf %112, %96 : vector<8x128xf32>
    %140 = vector.shape_cast %139 : vector<8x128xf32> to vector<8x1x128xf32>
    %141 = vector.broadcast %140 : vector<8x1x128xf32> to vector<8x16x128xf32>
    %142 = arith.mulf %141, %122 : vector<8x16x128xf32>
    %cst_36 = arith.constant 0.000000e+00 : f32
    %143 = vector.broadcast %cst_36 : f32 to vector<16x128xf32>
    %144 = vector.extract_strided_slice %138 {offsets = [0, 0, 0], sizes = [1, 16, 128], strides = [1, 1, 1]} : vector<8x16x128xf32> to vector<1x16x128xf32>
    %145 = vector.shape_cast %144 : vector<1x16x128xf32> to vector<16x128xf32>
    %146 = arith.mulf %145, %143 : vector<16x128xf32>
    %147 = vector.extract_strided_slice %142 {offsets = [0, 0, 0], sizes = [1, 16, 128], strides = [1, 1, 1]} : vector<8x16x128xf32> to vector<1x16x128xf32>
    %148 = vector.shape_cast %147 : vector<1x16x128xf32> to vector<16x128xf32>
    %149 = arith.addf %146, %148 : vector<16x128xf32>
    %150 = vector.extract_strided_slice %132 {offsets = [0, 0, 0], sizes = [1, 16, 128], strides = [1, 1, 1]} : vector<8x16x128xf32> to vector<1x16x128xf32>
    %151 = vector.shape_cast %150 : vector<1x16x128xf32> to vector<16x128xf32>
    %152 = arith.mulf %149, %151 : vector<16x128xf32>
    %cst_37 = arith.constant dense<0.000000e+00> : vector<128xf32>
    %153 = vector.multi_reduction <add>, %152, %cst_37 [0] : vector<16x128xf32> to vector<128xf32>
    %154 = vector.shape_cast %153 : vector<128xf32> to vector<1x128xf32>
    %c0_38 = arith.constant 0 : index
    %c0_39 = arith.constant 0 : index
    %155 = vector.load %arg9[%c0_38, %c0_39] : memref<8x128xf32, #tpu.memory_space<vmem>>, vector<1x128xf32>
    tpu.vector_store %arg9[%c0_38, %c0_39], %154 {strides = array<i32>} : memref<8x128xf32, #tpu.memory_space<vmem>>, vector<1x128xf32>,
    %156 = vector.extract_strided_slice %138 {offsets = [1, 0, 0], sizes = [1, 16, 128], strides = [1, 1, 1]} : vector<8x16x128xf32> to vector<1x16x128xf32>
    %157 = vector.shape_cast %156 : vector<1x16x128xf32> to vector<16x128xf32>
    %158 = arith.mulf %157, %149 : vector<16x128xf32>
    %159 = vector.extract_strided_slice %142 {offsets = [1, 0, 0], sizes = [1, 16, 128], strides = [1, 1, 1]} : vector<8x16x128xf32> to vector<1x16x128xf32>
    %160 = vector.shape_cast %159 : vector<1x16x128xf32> to vector<16x128xf32>
    %161 = arith.addf %158, %160 : vector<16x128xf32>
    %162 = vector.extract_strided_slice %132 {offsets = [1, 0, 0], sizes = [1, 16, 128], strides = [1, 1, 1]} : vector<8x16x128xf32> to vector<1x16x128xf32>
    %163 = vector.shape_cast %162 : vector<1x16x128xf32> to vector<16x128xf32>
    %164 = arith.mulf %161, %163 : vector<16x128xf32>
    %cst_40 = arith.constant dense<0.000000e+00> : vector<128xf32>
    %165 = vector.multi_reduction <add>, %164, %cst_40 [0] : vector<16x128xf32> to vector<128xf32>
    %166 = vector.shape_cast %165 : vector<128xf32> to vector<1x128xf32>
    %c1 = arith.constant 1 : index
    %c0_41 = arith.constant 0 : index
    %167 = vector.load %arg9[%c1, %c0_41] : memref<8x128xf32, #tpu.memory_space<vmem>>, vector<1x128xf32>
    tpu.vector_store %arg9[%c1, %c0_41], %166 {strides = array<i32>} : memref<8x128xf32, #tpu.memory_space<vmem>>, vector<1x128xf32>,
    %168 = vector.extract_strided_slice %138 {offsets = [2, 0, 0], sizes = [1, 16, 128], strides = [1, 1, 1]} : vector<8x16x128xf32> to vector<1x16x128xf32>
    %169 = vector.shape_cast %168 : vector<1x16x128xf32> to vector<16x128xf32>
    %170 = arith.mulf %169, %161 : vector<16x128xf32>
    %171 = vector.extract_strided_slice %142 {offsets = [2, 0, 0], sizes = [1, 16, 128], strides = [1, 1, 1]} : vector<8x16x128xf32> to vector<1x16x128xf32>
    %172 = vector.shape_cast %171 : vector<1x16x128xf32> to vector<16x128xf32>
    %173 = arith.addf %170, %172 : vector<16x128xf32>
    %174 = vector.extract_strided_slice %132 {offsets = [2, 0, 0], sizes = [1, 16, 128], strides = [1, 1, 1]} : vector<8x16x128xf32> to vector<1x16x128xf32>
    %175 = vector.shape_cast %174 : vector<1x16x128xf32> to vector<16x128xf32>
    %176 = arith.mulf %173, %175 : vector<16x128xf32>
    %cst_42 = arith.constant dense<0.000000e+00> : vector<128xf32>
    %177 = vector.multi_reduction <add>, %176, %cst_42 [0] : vector<16x128xf32> to vector<128xf32>
    %178 = vector.shape_cast %177 : vector<128xf32> to vector<1x128xf32>
    %c2 = arith.constant 2 : index
    %c0_43 = arith.constant 0 : index
    %179 = vector.load %arg9[%c2, %c0_43] : memref<8x128xf32, #tpu.memory_space<vmem>>, vector<1x128xf32>
    tpu.vector_store %arg9[%c2, %c0_43], %178 {strides = array<i32>} : memref<8x128xf32, #tpu.memory_space<vmem>>, vector<1x128xf32>,
    %180 = vector.extract_strided_slice %138 {offsets = [3, 0, 0], sizes = [1, 16, 128], strides = [1, 1, 1]} : vector<8x16x128xf32> to vector<1x16x128xf32>
    %181 = vector.shape_cast %180 : vector<1x16x128xf32> to vector<16x128xf32>
    %182 = arith.mulf %181, %173 : vector<16x128xf32>
    %183 = vector.extract_strided_slice %142 {offsets = [3, 0, 0], sizes = [1, 16, 128], strides = [1, 1, 1]} : vector<8x16x128xf32> to vector<1x16x128xf32>
    %184 = vector.shape_cast %183 : vector<1x16x128xf32> to vector<16x128xf32>
    %185 = arith.addf %182, %184 : vector<16x128xf32>
    %186 = vector.extract_strided_slice %132 {offsets = [3, 0, 0], sizes = [1, 16, 128], strides = [1, 1, 1]} : vector<8x16x128xf32> to vector<1x16x128xf32>
    %187 = vector.shape_cast %186 : vector<1x16x128xf32> to vector<16x128xf32>
    %188 = arith.mulf %185, %187 : vector<16x128xf32>
    %cst_44 = arith.constant dense<0.000000e+00> : vector<128xf32>
    %189 = vector.multi_reduction <add>, %188, %cst_44 [0] : vector<16x128xf32> to vector<128xf32>
    %190 = vector.shape_cast %189 : vector<128xf32> to vector<1x128xf32>
    %c3 = arith.constant 3 : index
    %c0_45 = arith.constant 0 : index
    %191 = vector.load %arg9[%c3, %c0_45] : memref<8x128xf32, #tpu.memory_space<vmem>>, vector<1x128xf32>
    tpu.vector_store %arg9[%c3, %c0_45], %190 {strides = array<i32>} : memref<8x128xf32, #tpu.memory_space<vmem>>, vector<1x128xf32>,
    %192 = vector.extract_strided_slice %138 {offsets = [4, 0, 0], sizes = [1, 16, 128], strides = [1, 1, 1]} : vector<8x16x128xf32> to vector<1x16x128xf32>
    %193 = vector.shape_cast %192 : vector<1x16x128xf32> to vector<16x128xf32>
    %194 = arith.mulf %193, %185 : vector<16x128xf32>
    %195 = vector.extract_strided_slice %142 {offsets = [4, 0, 0], sizes = [1, 16, 128], strides = [1, 1, 1]} : vector<8x16x128xf32> to vector<1x16x128xf32>
    %196 = vector.shape_cast %195 : vector<1x16x128xf32> to vector<16x128xf32>
    %197 = arith.addf %194, %196 : vector<16x128xf32>
    %198 = vector.extract_strided_slice %132 {offsets = [4, 0, 0], sizes = [1, 16, 128], strides = [1, 1, 1]} : vector<8x16x128xf32> to vector<1x16x128xf32>
    %199 = vector.shape_cast %198 : vector<1x16x128xf32> to vector<16x128xf32>
    %200 = arith.mulf %197, %199 : vector<16x128xf32>
    %cst_46 = arith.constant dense<0.000000e+00> : vector<128xf32>
    %201 = vector.multi_reduction <add>, %200, %cst_46 [0] : vector<16x128xf32> to vector<128xf32>
    %202 = vector.shape_cast %201 : vector<128xf32> to vector<1x128xf32>
    %c4 = arith.constant 4 : index
    %c0_47 = arith.constant 0 : index
    %203 = vector.load %arg9[%c4, %c0_47] : memref<8x128xf32, #tpu.memory_space<vmem>>, vector<1x128xf32>
    tpu.vector_store %arg9[%c4, %c0_47], %202 {strides = array<i32>} : memref<8x128xf32, #tpu.memory_space<vmem>>, vector<1x128xf32>,
    %204 = vector.extract_strided_slice %138 {offsets = [5, 0, 0], sizes = [1, 16, 128], strides = [1, 1, 1]} : vector<8x16x128xf32> to vector<1x16x128xf32>
    %205 = vector.shape_cast %204 : vector<1x16x128xf32> to vector<16x128xf32>
    %206 = arith.mulf %205, %197 : vector<16x128xf32>
    %207 = vector.extract_strided_slice %142 {offsets = [5, 0, 0], sizes = [1, 16, 128], strides = [1, 1, 1]} : vector<8x16x128xf32> to vector<1x16x128xf32>
    %208 = vector.shape_cast %207 : vector<1x16x128xf32> to vector<16x128xf32>
    %209 = arith.addf %206, %208 : vector<16x128xf32>
    %210 = vector.extract_strided_slice %132 {offsets = [5, 0, 0], sizes = [1, 16, 128], strides = [1, 1, 1]} : vector<8x16x128xf32> to vector<1x16x128xf32>
    %211 = vector.shape_cast %210 : vector<1x16x128xf32> to vector<16x128xf32>
    %212 = arith.mulf %209, %211 : vector<16x128xf32>
    %cst_48 = arith.constant dense<0.000000e+00> : vector<128xf32>
    %213 = vector.multi_reduction <add>, %212, %cst_48 [0] : vector<16x128xf32> to vector<128xf32>
    %214 = vector.shape_cast %213 : vector<128xf32> to vector<1x128xf32>
    %c5 = arith.constant 5 : index
    %c0_49 = arith.constant 0 : index
    %215 = vector.load %arg9[%c5, %c0_49] : memref<8x128xf32, #tpu.memory_space<vmem>>, vector<1x128xf32>
    tpu.vector_store %arg9[%c5, %c0_49], %214 {strides = array<i32>} : memref<8x128xf32, #tpu.memory_space<vmem>>, vector<1x128xf32>,
    %216 = vector.extract_strided_slice %138 {offsets = [6, 0, 0], sizes = [1, 16, 128], strides = [1, 1, 1]} : vector<8x16x128xf32> to vector<1x16x128xf32>
    %217 = vector.shape_cast %216 : vector<1x16x128xf32> to vector<16x128xf32>
    %218 = arith.mulf %217, %209 : vector<16x128xf32>
    %219 = vector.extract_strided_slice %142 {offsets = [6, 0, 0], sizes = [1, 16, 128], strides = [1, 1, 1]} : vector<8x16x128xf32> to vector<1x16x128xf32>
    %220 = vector.shape_cast %219 : vector<1x16x128xf32> to vector<16x128xf32>
    %221 = arith.addf %218, %220 : vector<16x128xf32>
    %222 = vector.extract_strided_slice %132 {offsets = [6, 0, 0], sizes = [1, 16, 128], strides = [1, 1, 1]} : vector<8x16x128xf32> to vector<1x16x128xf32>
    %223 = vector.shape_cast %222 : vector<1x16x128xf32> to vector<16x128xf32>
    %224 = arith.mulf %221, %223 : vector<16x128xf32>
    %cst_50 = arith.constant dense<0.000000e+00> : vector<128xf32>
    %225 = vector.multi_reduction <add>, %224, %cst_50 [0] : vector<16x128xf32> to vector<128xf32>
    %226 = vector.shape_cast %225 : vector<128xf32> to vector<1x128xf32>
    %c6 = arith.constant 6 : index
    %c0_51 = arith.constant 0 : index
    %227 = vector.load %arg9[%c6, %c0_51] : memref<8x128xf32, #tpu.memory_space<vmem>>, vector<1x128xf32>
    tpu.vector_store %arg9[%c6, %c0_51], %226 {strides = array<i32>} : memref<8x128xf32, #tpu.memory_space<vmem>>, vector<1x128xf32>,
    %228 = vector.extract_strided_slice %138 {offsets = [7, 0, 0], sizes = [1, 16, 128], strides = [1, 1, 1]} : vector<8x16x128xf32> to vector<1x16x128xf32>
    %229 = vector.shape_cast %228 : vector<1x16x128xf32> to vector<16x128xf32>
    %230 = arith.mulf %229, %221 : vector<16x128xf32>
    %231 = vector.extract_strided_slice %142 {offsets = [7, 0, 0], sizes = [1, 16, 128], strides = [1, 1, 1]} : vector<8x16x128xf32> to vector<1x16x128xf32>
    %232 = vector.shape_cast %231 : vector<1x16x128xf32> to vector<16x128xf32>
    %233 = arith.addf %230, %232 : vector<16x128xf32>
    %234 = vector.extract_strided_slice %132 {offsets = [7, 0, 0], sizes = [1, 16, 128], strides = [1, 1, 1]} : vector<8x16x128xf32> to vector<1x16x128xf32>
    %235 = vector.shape_cast %234 : vector<1x16x128xf32> to vector<16x128xf32>
    %236 = arith.mulf %233, %235 : vector<16x128xf32>
    %cst_52 = arith.constant dense<0.000000e+00> : vector<128xf32>
    %237 = vector.multi_reduction <add>, %236, %cst_52 [0] : vector<16x128xf32> to vector<128xf32>
    %238 = vector.shape_cast %237 : vector<128xf32> to vector<1x128xf32>
    %c7 = arith.constant 7 : index
    %c0_53 = arith.constant 0 : index
    %239 = vector.load %arg9[%c7, %c0_53] : memref<8x128xf32, #tpu.memory_space<vmem>>, vector<1x128xf32>
    tpu.vector_store %arg9[%c7, %c0_53], %238 {strides = array<i32>} : memref<8x128xf32, #tpu.memory_space<vmem>>, vector<1x128xf32>,
    %c0_54 = arith.constant 0 : index
    %c0_55 = arith.constant 0 : index
    %240 = vector.load %arg9[%c0_54, %c0_55] : memref<8x128xf32, #tpu.memory_space<vmem>>, vector<8x128xf32>
    %241 = vector.broadcast %30 : vector<1x128xf32> to vector<8x128xf32>
    %242 = arith.mulf %241, %96 : vector<8x128xf32>
    %243 = arith.addf %240, %242 : vector<8x128xf32>
    %244 = vector.extract_strided_slice %57 {offsets = [0, 0], sizes = [8, 64], strides = [1, 1]} : vector<16x64xf32> to vector<8x64xf32>
    %245 = vector.extract_strided_slice %57 {offsets = [8, 0], sizes = [8, 64], strides = [1, 1]} : vector<16x64xf32> to vector<8x64xf32>
    %246 = tpu.concatenate %244, %245 in 1 : vector<8x64xf32>, vector<8x64xf32> -> vector<8x128xf32>
    %cst_56 = arith.constant 0.000000e+00 : f32
    %247 = vector.broadcast %cst_56 : f32 to vector<8x128xf32>
    %248 = arith.subf %247, %246 : vector<8x128xf32>
    %249 = math.exp %248 : vector<8x128xf32>
    %cst_57 = arith.constant 1.000000e+00 : f32
    %250 = vector.broadcast %cst_57 : f32 to vector<8x128xf32>
    %251 = arith.addf %250, %249 : vector<8x128xf32>
    %cst_58 = arith.constant 1.000000e+00 : f32
    %252 = vector.broadcast %cst_58 : f32 to vector<8x128xf32>
    %253 = arith.divf %252, %251 : vector<8x128xf32>
    %254 = arith.mulf %246, %253 : vector<8x128xf32>
    %255 = arith.mulf %243, %254 : vector<8x128xf32>
    %256 = vector.extract_strided_slice %255 {offsets = [0, 0], sizes = [8, 64], strides = [1, 1]} : vector<8x128xf32> to vector<8x64xf32>
    %257 = vector.extract_strided_slice %255 {offsets = [0, 64], sizes = [8, 64], strides = [1, 1]} : vector<8x128xf32> to vector<8x64xf32>
    %258 = tpu.concatenate %256, %257 in 0 : vector<8x64xf32>, vector<8x64xf32> -> vector<16x64xf32>
    %259 = arith.truncf %258 : vector<16x64xf32> to vector<16x64xbf16>
    %cst_59 = arith.constant dense<0.000000e+00> : vector<16x32xf32>
    %260 = tpu.matmul %259, %19, %cst_59 {dimension_numbers = #tpu.dot_dimension_numbers<[1], [0], [0], [1], [0, 0, 1, 1], [], []>} : vector<16x64xbf16>, vector<64x32xbf16>, vector<16x32xf32> -> vector<16x32xf32>
    %c1_60 = arith.constant 1 : index
    %c0_61 = arith.constant 0 : index
    %c0_62 = arith.constant 0 : index
    %261 = vector.load %arg2[%c1_60, %c0_61, %c0_62] : memref<2x32x128xbf16, #tpu.memory_space<vmem>>, vector<1x32x128xbf16>
    %262 = vector.shape_cast %261 : vector<1x32x128xbf16> to vector<32x128xbf16>
    %c1_63 = arith.constant 1 : index
    %c0_64 = arith.constant 0 : index
    %c0_65 = arith.constant 0 : index
    %263 = vector.load %arg3[%c1_63, %c0_64, %c0_65] : memref<2x64x96xbf16, #tpu.memory_space<vmem>>, vector<1x64x96xbf16>
    %264 = vector.shape_cast %263 : vector<1x64x96xbf16> to vector<64x96xbf16>
    %c1_66 = arith.constant 1 : index
    %c0_67 = arith.constant 0 : index
    %c0_68 = arith.constant 0 : index
    %265 = vector.load %arg4[%c1_66, %c0_67, %c0_68] : memref<2x64x32xbf16, #tpu.memory_space<vmem>>, vector<1x64x32xbf16>
    %266 = vector.shape_cast %265 : vector<1x64x32xbf16> to vector<64x32xbf16>
    %c1_69 = arith.constant 1 : index
    %c0_70 = arith.constant 0 : index
    %c0_71 = arith.constant 0 : index
    %267 = vector.load %arg5[%c1_69, %c0_70, %c0_71] : memref<2x16x128xf32, #tpu.memory_space<vmem>>, vector<1x16x128xf32>
    %268 = vector.shape_cast %267 : vector<1x16x128xf32> to vector<16x128xf32>
    %c1_72 = arith.constant 1 : index
    %c0_73 = arith.constant 0 : index
    %c0_74 = arith.constant 0 : index
    %269 = vector.load %arg6[%c1_72, %c0_73, %c0_74] : memref<2x9x64xf32, #tpu.memory_space<vmem>>, vector<1x9x64xf32>
    %270 = vector.shape_cast %269 : vector<1x9x64xf32> to vector<9x64xf32>
    %271 = vector.extract_strided_slice %270 {offsets = [0, 0], sizes = [1, 32], strides = [1, 1]} : vector<9x64xf32> to vector<1x32xf32>
    %272 = vector.extract_strided_slice %270 {offsets = [1, 0], sizes = [1, 32], strides = [1, 1]} : vector<9x64xf32> to vector<1x32xf32>
    %273 = vector.extract_strided_slice %270 {offsets = [2, 0], sizes = [1, 64], strides = [1, 1]} : vector<9x64xf32> to vector<1x64xf32>
    %274 = vector.extract_strided_slice %270 {offsets = [3, 0], sizes = [1, 64], strides = [1, 1]} : vector<9x64xf32> to vector<1x64xf32>
    %275 = tpu.concatenate %274, %274 in 1 : vector<1x64xf32>, vector<1x64xf32> -> vector<1x128xf32>
    %276 = vector.extract_strided_slice %270 {offsets = [4, 0], sizes = [1, 64], strides = [1, 1]} : vector<9x64xf32> to vector<1x64xf32>
    %277 = tpu.concatenate %276, %276 in 1 : vector<1x64xf32>, vector<1x64xf32> -> vector<1x128xf32>
    %278 = arith.addf %260, %31 : vector<16x32xf32>
    %cst_75 = arith.constant dense<0.000000e+00> : vector<16xf32>
    %279 = vector.multi_reduction <add>, %278, %cst_75 [1] : vector<16x32xf32> to vector<16xf32>
    %280 = vector.shape_cast %279 : vector<16xf32> to vector<16x1xf32>
    %cst_76 = arith.constant 3.200000e+01 : f32
    %281 = vector.broadcast %cst_76 : f32 to vector<16x1xf32>
    %282 = arith.divf %280, %281 : vector<16x1xf32>
    %283 = vector.broadcast %282 : vector<16x1xf32> to vector<16x32xf32>
    %284 = arith.subf %278, %283 : vector<16x32xf32>
    %285 = arith.mulf %284, %284 : vector<16x32xf32>
    %cst_77 = arith.constant dense<0.000000e+00> : vector<16xf32>
    %286 = vector.multi_reduction <add>, %285, %cst_77 [1] : vector<16x32xf32> to vector<16xf32>
    %287 = vector.shape_cast %286 : vector<16xf32> to vector<16x1xf32>
    %cst_78 = arith.constant 3.200000e+01 : f32
    %288 = vector.broadcast %cst_78 : f32 to vector<16x1xf32>
    %289 = arith.divf %287, %288 : vector<16x1xf32>
    %290 = vector.broadcast %282 : vector<16x1xf32> to vector<16x32xf32>
    %291 = arith.subf %278, %290 : vector<16x32xf32>
    %cst_79 = arith.constant 9.99999974E-6 : f32
    %292 = vector.broadcast %cst_79 : f32 to vector<16x1xf32>
    %293 = arith.addf %289, %292 : vector<16x1xf32>
    %294 = math.rsqrt %293 : vector<16x1xf32>
    %295 = vector.broadcast %294 : vector<16x1xf32> to vector<16x32xf32>
    %296 = arith.mulf %291, %295 : vector<16x32xf32>
    %297 = vector.broadcast %271 : vector<1x32xf32> to vector<16x32xf32>
    %298 = arith.mulf %296, %297 : vector<16x32xf32>
    %299 = vector.broadcast %272 : vector<1x32xf32> to vector<16x32xf32>
    %300 = arith.addf %298, %299 : vector<16x32xf32>
    %301 = arith.truncf %300 : vector<16x32xf32> to vector<16x32xbf16>
    %cst_80 = arith.constant dense<0.000000e+00> : vector<16x128xf32>
    %302 = tpu.matmul %301, %262, %cst_80 {dimension_numbers = #tpu.dot_dimension_numbers<[1], [0], [0], [1], [0, 0, 1, 1], [], []>} : vector<16x32xbf16>, vector<32x128xbf16>, vector<16x128xf32> -> vector<16x128xf32>
    %303 = vector.extract_strided_slice %302 {offsets = [0, 0], sizes = [16, 64], strides = [1, 1]} : vector<16x128xf32> to vector<16x64xf32>
    %304 = vector.extract_strided_slice %302 {offsets = [0, 64], sizes = [16, 64], strides = [1, 1]} : vector<16x128xf32> to vector<16x64xf32>
    %305 = vector.extract_strided_slice %270 {offsets = [8, 0], sizes = [1, 64], strides = [1, 1]} : vector<9x64xf32> to vector<1x64xf32>
    %306 = vector.broadcast %305 : vector<1x64xf32> to vector<16x64xf32>
    %307 = arith.mulf %306, %303 : vector<16x64xf32>
    %308 = vector.broadcast %273 : vector<1x64xf32> to vector<16x64xf32>
    %309 = arith.addf %308, %307 : vector<16x64xf32>
    %310 = vector.extract_strided_slice %270 {offsets = [7, 0], sizes = [1, 64], strides = [1, 1]} : vector<9x64xf32> to vector<1x64xf32>
    %c1_i32_81 = arith.constant 1 : i32
    %311 = tpu.dynamic_rotate %303 by %c1_i32_81 dim 0 : vector<16x64xf32>, i32 -> vector<16x64xf32>
    %cst_82 = arith.constant 0.000000e+00 : f32
    %312 = vector.broadcast %cst_82 : f32 to vector<16x64xf32>
    %313 = arith.select %6, %311, %312 : vector<16x64xi1>, vector<16x64xf32>
    %314 = vector.broadcast %310 : vector<1x64xf32> to vector<16x64xf32>
    %315 = arith.mulf %314, %313 : vector<16x64xf32>
    %316 = arith.addf %309, %315 : vector<16x64xf32>
    %317 = vector.extract_strided_slice %270 {offsets = [6, 0], sizes = [1, 64], strides = [1, 1]} : vector<9x64xf32> to vector<1x64xf32>
    %c2_i32_83 = arith.constant 2 : i32
    %318 = tpu.dynamic_rotate %303 by %c2_i32_83 dim 0 : vector<16x64xf32>, i32 -> vector<16x64xf32>
    %cst_84 = arith.constant 0.000000e+00 : f32
    %319 = vector.broadcast %cst_84 : f32 to vector<16x64xf32>
    %320 = arith.select %8, %318, %319 : vector<16x64xi1>, vector<16x64xf32>
    %321 = vector.broadcast %317 : vector<1x64xf32> to vector<16x64xf32>
    %322 = arith.mulf %321, %320 : vector<16x64xf32>
    %323 = arith.addf %316, %322 : vector<16x64xf32>
    %324 = vector.extract_strided_slice %270 {offsets = [5, 0], sizes = [1, 64], strides = [1, 1]} : vector<9x64xf32> to vector<1x64xf32>
    %c3_i32_85 = arith.constant 3 : i32
    %325 = tpu.dynamic_rotate %303 by %c3_i32_85 dim 0 : vector<16x64xf32>, i32 -> vector<16x64xf32>
    %cst_86 = arith.constant 0.000000e+00 : f32
    %326 = vector.broadcast %cst_86 : f32 to vector<16x64xf32>
    %327 = arith.select %10, %325, %326 : vector<16x64xi1>, vector<16x64xf32>
    %328 = vector.broadcast %324 : vector<1x64xf32> to vector<16x64xf32>
    %329 = arith.mulf %328, %327 : vector<16x64xf32>
    %330 = arith.addf %323, %329 : vector<16x64xf32>
    %cst_87 = arith.constant 0.000000e+00 : f32
    %331 = vector.broadcast %cst_87 : f32 to vector<16x64xf32>
    %332 = arith.subf %331, %330 : vector<16x64xf32>
    %333 = math.exp %332 : vector<16x64xf32>
    %cst_88 = arith.constant 1.000000e+00 : f32
    %334 = vector.broadcast %cst_88 : f32 to vector<16x64xf32>
    %335 = arith.addf %334, %333 : vector<16x64xf32>
    %cst_89 = arith.constant 1.000000e+00 : f32
    %336 = vector.broadcast %cst_89 : f32 to vector<16x64xf32>
    %337 = arith.divf %336, %335 : vector<16x64xf32>
    %338 = arith.mulf %330, %337 : vector<16x64xf32>
    %339 = arith.truncf %338 : vector<16x64xf32> to vector<16x64xbf16>
    %cst_90 = arith.constant dense<0.000000e+00> : vector<16x96xf32>
    %340 = tpu.matmul %339, %264, %cst_90 {dimension_numbers = #tpu.dot_dimension_numbers<[1], [0], [0], [1], [0, 0, 1, 1], [], []>} : vector<16x64xbf16>, vector<64x96xbf16>, vector<16x96xf32> -> vector<16x96xf32>
    %341 = vector.extract_strided_slice %338 {offsets = [0, 0], sizes = [8, 64], strides = [1, 1]} : vector<16x64xf32> to vector<8x64xf32>
    %342 = vector.extract_strided_slice %338 {offsets = [8, 0], sizes = [8, 64], strides = [1, 1]} : vector<16x64xf32> to vector<8x64xf32>
    %343 = tpu.concatenate %341, %342 in 1 : vector<8x64xf32>, vector<8x64xf32> -> vector<8x128xf32>
    %344 = vector.extract_strided_slice %340 {offsets = [0, 0], sizes = [16, 64], strides = [1, 1]} : vector<16x96xf32> to vector<16x64xf32>
    %345 = vector.extract_strided_slice %344 {offsets = [0, 0], sizes = [8, 64], strides = [1, 1]} : vector<16x64xf32> to vector<8x64xf32>
    %346 = vector.extract_strided_slice %344 {offsets = [8, 0], sizes = [8, 64], strides = [1, 1]} : vector<16x64xf32> to vector<8x64xf32>
    %347 = tpu.concatenate %345, %346 in 1 : vector<8x64xf32>, vector<8x64xf32> -> vector<8x128xf32>
    %348 = vector.broadcast %275 : vector<1x128xf32> to vector<8x128xf32>
    %349 = arith.addf %347, %348 : vector<8x128xf32>
    %cst_91 = arith.constant 0.000000e+00 : f32
    %350 = vector.broadcast %cst_91 : f32 to vector<8x128xf32>
    %351 = arith.maximumf %349, %350 : vector<8x128xf32>
    %352 = math.absf %349 : vector<8x128xf32>
    %cst_92 = arith.constant 0.000000e+00 : f32
    %353 = vector.broadcast %cst_92 : f32 to vector<8x128xf32>
    %354 = arith.subf %353, %352 : vector<8x128xf32>
    %355 = math.exp %354 : vector<8x128xf32>
    %cst_93 = arith.constant 1.000000e+00 : f32
    %356 = vector.broadcast %cst_93 : f32 to vector<8x128xf32>
    %357 = arith.addf %356, %355 : vector<8x128xf32>
    %358 = math.log %357 : vector<8x128xf32>
    %359 = arith.addf %351, %358 : vector<8x128xf32>
    %360 = vector.extract_strided_slice %340 {offsets = [0, 64], sizes = [16, 16], strides = [1, 1]} : vector<16x96xf32> to vector<16x16xf32>
    %361 = vector.extract_strided_slice %360 {offsets = [0, 0], sizes = [8, 16], strides = [1, 1]} : vector<16x16xf32> to vector<8x16xf32>
    %362 = vector.shape_cast %361 : vector<8x16xf32> to vector<8x16x1xf32>
    %363 = vector.shape_cast %362 : vector<8x16x1xf32> to vector<8x16x1xf32>
    %364 = vector.broadcast %363 : vector<8x16x1xf32> to vector<8x16x128xf32>
    %365 = vector.extract_strided_slice %360 {offsets = [8, 0], sizes = [8, 16], strides = [1, 1]} : vector<16x16xf32> to vector<8x16xf32>
    %366 = vector.shape_cast %365 : vector<8x16xf32> to vector<8x16x1xf32>
    %367 = vector.shape_cast %366 : vector<8x16x1xf32> to vector<8x16x1xf32>
    %368 = vector.broadcast %367 : vector<8x16x1xf32> to vector<8x16x128xf32>
    %369 = arith.select %13, %368, %364 : vector<8x16x128xi1>, vector<8x16x128xf32>
    %370 = vector.extract_strided_slice %340 {offsets = [0, 80], sizes = [16, 16], strides = [1, 1]} : vector<16x96xf32> to vector<16x16xf32>
    %371 = vector.extract_strided_slice %370 {offsets = [0, 0], sizes = [8, 16], strides = [1, 1]} : vector<16x16xf32> to vector<8x16xf32>
    %372 = vector.shape_cast %371 : vector<8x16xf32> to vector<8x16x1xf32>
    %373 = vector.shape_cast %372 : vector<8x16x1xf32> to vector<8x16x1xf32>
    %374 = vector.broadcast %373 : vector<8x16x1xf32> to vector<8x16x128xf32>
    %375 = vector.extract_strided_slice %370 {offsets = [8, 0], sizes = [8, 16], strides = [1, 1]} : vector<16x16xf32> to vector<8x16xf32>
    %376 = vector.shape_cast %375 : vector<8x16xf32> to vector<8x16x1xf32>
    %377 = vector.shape_cast %376 : vector<8x16x1xf32> to vector<8x16x1xf32>
    %378 = vector.broadcast %377 : vector<8x16x1xf32> to vector<8x16x128xf32>
    %379 = arith.select %13, %378, %374 : vector<8x16x128xi1>, vector<8x16x128xf32>
    %380 = vector.shape_cast %359 : vector<8x128xf32> to vector<8x1x128xf32>
    %381 = vector.shape_cast %268 : vector<16x128xf32> to vector<1x16x128xf32>
    %382 = vector.broadcast %380 : vector<8x1x128xf32> to vector<8x16x128xf32>
    %383 = vector.broadcast %381 : vector<1x16x128xf32> to vector<8x16x128xf32>
    %384 = arith.mulf %382, %383 : vector<8x16x128xf32>
    %385 = math.exp %384 : vector<8x16x128xf32>
    %386 = arith.mulf %359, %343 : vector<8x128xf32>
    %387 = vector.shape_cast %386 : vector<8x128xf32> to vector<8x1x128xf32>
    %388 = vector.broadcast %387 : vector<8x1x128xf32> to vector<8x16x128xf32>
    %389 = arith.mulf %388, %369 : vector<8x16x128xf32>
    %cst_94 = arith.constant 0.000000e+00 : f32
    %390 = vector.broadcast %cst_94 : f32 to vector<16x128xf32>
    %391 = vector.extract_strided_slice %385 {offsets = [0, 0, 0], sizes = [1, 16, 128], strides = [1, 1, 1]} : vector<8x16x128xf32> to vector<1x16x128xf32>
    %392 = vector.shape_cast %391 : vector<1x16x128xf32> to vector<16x128xf32>
    %393 = arith.mulf %392, %390 : vector<16x128xf32>
    %394 = vector.extract_strided_slice %389 {offsets = [0, 0, 0], sizes = [1, 16, 128], strides = [1, 1, 1]} : vector<8x16x128xf32> to vector<1x16x128xf32>
    %395 = vector.shape_cast %394 : vector<1x16x128xf32> to vector<16x128xf32>
    %396 = arith.addf %393, %395 : vector<16x128xf32>
    %397 = vector.extract_strided_slice %379 {offsets = [0, 0, 0], sizes = [1, 16, 128], strides = [1, 1, 1]} : vector<8x16x128xf32> to vector<1x16x128xf32>
    %398 = vector.shape_cast %397 : vector<1x16x128xf32> to vector<16x128xf32>
    %399 = arith.mulf %396, %398 : vector<16x128xf32>
    %cst_95 = arith.constant dense<0.000000e+00> : vector<128xf32>
    %400 = vector.multi_reduction <add>, %399, %cst_95 [0] : vector<16x128xf32> to vector<128xf32>
    %401 = vector.shape_cast %400 : vector<128xf32> to vector<1x128xf32>
    %c0_96 = arith.constant 0 : index
    %c0_97 = arith.constant 0 : index
    %402 = vector.load %arg9[%c0_96, %c0_97] : memref<8x128xf32, #tpu.memory_space<vmem>>, vector<1x128xf32>
    tpu.vector_store %arg9[%c0_96, %c0_97], %401 {strides = array<i32>} : memref<8x128xf32, #tpu.memory_space<vmem>>, vector<1x128xf32>,
    %403 = vector.extract_strided_slice %385 {offsets = [1, 0, 0], sizes = [1, 16, 128], strides = [1, 1, 1]} : vector<8x16x128xf32> to vector<1x16x128xf32>
    %404 = vector.shape_cast %403 : vector<1x16x128xf32> to vector<16x128xf32>
    %405 = arith.mulf %404, %396 : vector<16x128xf32>
    %406 = vector.extract_strided_slice %389 {offsets = [1, 0, 0], sizes = [1, 16, 128], strides = [1, 1, 1]} : vector<8x16x128xf32> to vector<1x16x128xf32>
    %407 = vector.shape_cast %406 : vector<1x16x128xf32> to vector<16x128xf32>
    %408 = arith.addf %405, %407 : vector<16x128xf32>
    %409 = vector.extract_strided_slice %379 {offsets = [1, 0, 0], sizes = [1, 16, 128], strides = [1, 1, 1]} : vector<8x16x128xf32> to vector<1x16x128xf32>
    %410 = vector.shape_cast %409 : vector<1x16x128xf32> to vector<16x128xf32>
    %411 = arith.mulf %408, %410 : vector<16x128xf32>
    %cst_98 = arith.constant dense<0.000000e+00> : vector<128xf32>
    %412 = vector.multi_reduction <add>, %411, %cst_98 [0] : vector<16x128xf32> to vector<128xf32>
    %413 = vector.shape_cast %412 : vector<128xf32> to vector<1x128xf32>
    %c1_99 = arith.constant 1 : index
    %c0_100 = arith.constant 0 : index
    %414 = vector.load %arg9[%c1_99, %c0_100] : memref<8x128xf32, #tpu.memory_space<vmem>>, vector<1x128xf32>
    tpu.vector_store %arg9[%c1_99, %c0_100], %413 {strides = array<i32>} : memref<8x128xf32, #tpu.memory_space<vmem>>, vector<1x128xf32>,
    %415 = vector.extract_strided_slice %385 {offsets = [2, 0, 0], sizes = [1, 16, 128], strides = [1, 1, 1]} : vector<8x16x128xf32> to vector<1x16x128xf32>
    %416 = vector.shape_cast %415 : vector<1x16x128xf32> to vector<16x128xf32>
    %417 = arith.mulf %416, %408 : vector<16x128xf32>
    %418 = vector.extract_strided_slice %389 {offsets = [2, 0, 0], sizes = [1, 16, 128], strides = [1, 1, 1]} : vector<8x16x128xf32> to vector<1x16x128xf32>
    %419 = vector.shape_cast %418 : vector<1x16x128xf32> to vector<16x128xf32>
    %420 = arith.addf %417, %419 : vector<16x128xf32>
    %421 = vector.extract_strided_slice %379 {offsets = [2, 0, 0], sizes = [1, 16, 128], strides = [1, 1, 1]} : vector<8x16x128xf32> to vector<1x16x128xf32>
    %422 = vector.shape_cast %421 : vector<1x16x128xf32> to vector<16x128xf32>
    %423 = arith.mulf %420, %422 : vector<16x128xf32>
    %cst_101 = arith.constant dense<0.000000e+00> : vector<128xf32>
    %424 = vector.multi_reduction <add>, %423, %cst_101 [0] : vector<16x128xf32> to vector<128xf32>
    %425 = vector.shape_cast %424 : vector<128xf32> to vector<1x128xf32>
    %c2_102 = arith.constant 2 : index
    %c0_103 = arith.constant 0 : index
    %426 = vector.load %arg9[%c2_102, %c0_103] : memref<8x128xf32, #tpu.memory_space<vmem>>, vector<1x128xf32>
    tpu.vector_store %arg9[%c2_102, %c0_103], %425 {strides = array<i32>} : memref<8x128xf32, #tpu.memory_space<vmem>>, vector<1x128xf32>,
    %427 = vector.extract_strided_slice %385 {offsets = [3, 0, 0], sizes = [1, 16, 128], strides = [1, 1, 1]} : vector<8x16x128xf32> to vector<1x16x128xf32>
    %428 = vector.shape_cast %427 : vector<1x16x128xf32> to vector<16x128xf32>
    %429 = arith.mulf %428, %420 : vector<16x128xf32>
    %430 = vector.extract_strided_slice %389 {offsets = [3, 0, 0], sizes = [1, 16, 128], strides = [1, 1, 1]} : vector<8x16x128xf32> to vector<1x16x128xf32>
    %431 = vector.shape_cast %430 : vector<1x16x128xf32> to vector<16x128xf32>
    %432 = arith.addf %429, %431 : vector<16x128xf32>
    %433 = vector.extract_strided_slice %379 {offsets = [3, 0, 0], sizes = [1, 16, 128], strides = [1, 1, 1]} : vector<8x16x128xf32> to vector<1x16x128xf32>
    %434 = vector.shape_cast %433 : vector<1x16x128xf32> to vector<16x128xf32>
    %435 = arith.mulf %432, %434 : vector<16x128xf32>
    %cst_104 = arith.constant dense<0.000000e+00> : vector<128xf32>
    %436 = vector.multi_reduction <add>, %435, %cst_104 [0] : vector<16x128xf32> to vector<128xf32>
    %437 = vector.shape_cast %436 : vector<128xf32> to vector<1x128xf32>
    %c3_105 = arith.constant 3 : index
    %c0_106 = arith.constant 0 : index
    %438 = vector.load %arg9[%c3_105, %c0_106] : memref<8x128xf32, #tpu.memory_space<vmem>>, vector<1x128xf32>
    tpu.vector_store %arg9[%c3_105, %c0_106], %437 {strides = array<i32>} : memref<8x128xf32, #tpu.memory_space<vmem>>, vector<1x128xf32>,
    %439 = vector.extract_strided_slice %385 {offsets = [4, 0, 0], sizes = [1, 16, 128], strides = [1, 1, 1]} : vector<8x16x128xf32> to vector<1x16x128xf32>
    %440 = vector.shape_cast %439 : vector<1x16x128xf32> to vector<16x128xf32>
    %441 = arith.mulf %440, %432 : vector<16x128xf32>
    %442 = vector.extract_strided_slice %389 {offsets = [4, 0, 0], sizes = [1, 16, 128], strides = [1, 1, 1]} : vector<8x16x128xf32> to vector<1x16x128xf32>
    %443 = vector.shape_cast %442 : vector<1x16x128xf32> to vector<16x128xf32>
    %444 = arith.addf %441, %443 : vector<16x128xf32>
    %445 = vector.extract_strided_slice %379 {offsets = [4, 0, 0], sizes = [1, 16, 128], strides = [1, 1, 1]} : vector<8x16x128xf32> to vector<1x16x128xf32>
    %446 = vector.shape_cast %445 : vector<1x16x128xf32> to vector<16x128xf32>
    %447 = arith.mulf %444, %446 : vector<16x128xf32>
    %cst_107 = arith.constant dense<0.000000e+00> : vector<128xf32>
    %448 = vector.multi_reduction <add>, %447, %cst_107 [0] : vector<16x128xf32> to vector<128xf32>
    %449 = vector.shape_cast %448 : vector<128xf32> to vector<1x128xf32>
    %c4_108 = arith.constant 4 : index
    %c0_109 = arith.constant 0 : index
    %450 = vector.load %arg9[%c4_108, %c0_109] : memref<8x128xf32, #tpu.memory_space<vmem>>, vector<1x128xf32>
    tpu.vector_store %arg9[%c4_108, %c0_109], %449 {strides = array<i32>} : memref<8x128xf32, #tpu.memory_space<vmem>>, vector<1x128xf32>,
    %451 = vector.extract_strided_slice %385 {offsets = [5, 0, 0], sizes = [1, 16, 128], strides = [1, 1, 1]} : vector<8x16x128xf32> to vector<1x16x128xf32>
    %452 = vector.shape_cast %451 : vector<1x16x128xf32> to vector<16x128xf32>
    %453 = arith.mulf %452, %444 : vector<16x128xf32>
    %454 = vector.extract_strided_slice %389 {offsets = [5, 0, 0], sizes = [1, 16, 128], strides = [1, 1, 1]} : vector<8x16x128xf32> to vector<1x16x128xf32>
    %455 = vector.shape_cast %454 : vector<1x16x128xf32> to vector<16x128xf32>
    %456 = arith.addf %453, %455 : vector<16x128xf32>
    %457 = vector.extract_strided_slice %379 {offsets = [5, 0, 0], sizes = [1, 16, 128], strides = [1, 1, 1]} : vector<8x16x128xf32> to vector<1x16x128xf32>
    %458 = vector.shape_cast %457 : vector<1x16x128xf32> to vector<16x128xf32>
    %459 = arith.mulf %456, %458 : vector<16x128xf32>
    %cst_110 = arith.constant dense<0.000000e+00> : vector<128xf32>
    %460 = vector.multi_reduction <add>, %459, %cst_110 [0] : vector<16x128xf32> to vector<128xf32>
    %461 = vector.shape_cast %460 : vector<128xf32> to vector<1x128xf32>
    %c5_111 = arith.constant 5 : index
    %c0_112 = arith.constant 0 : index
    %462 = vector.load %arg9[%c5_111, %c0_112] : memref<8x128xf32, #tpu.memory_space<vmem>>, vector<1x128xf32>
    tpu.vector_store %arg9[%c5_111, %c0_112], %461 {strides = array<i32>} : memref<8x128xf32, #tpu.memory_space<vmem>>, vector<1x128xf32>,
    %463 = vector.extract_strided_slice %385 {offsets = [6, 0, 0], sizes = [1, 16, 128], strides = [1, 1, 1]} : vector<8x16x128xf32> to vector<1x16x128xf32>
    %464 = vector.shape_cast %463 : vector<1x16x128xf32> to vector<16x128xf32>
    %465 = arith.mulf %464, %456 : vector<16x128xf32>
    %466 = vector.extract_strided_slice %389 {offsets = [6, 0, 0], sizes = [1, 16, 128], strides = [1, 1, 1]} : vector<8x16x128xf32> to vector<1x16x128xf32>
    %467 = vector.shape_cast %466 : vector<1x16x128xf32> to vector<16x128xf32>
    %468 = arith.addf %465, %467 : vector<16x128xf32>
    %469 = vector.extract_strided_slice %379 {offsets = [6, 0, 0], sizes = [1, 16, 128], strides = [1, 1, 1]} : vector<8x16x128xf32> to vector<1x16x128xf32>
    %470 = vector.shape_cast %469 : vector<1x16x128xf32> to vector<16x128xf32>
    %471 = arith.mulf %468, %470 : vector<16x128xf32>
    %cst_113 = arith.constant dense<0.000000e+00> : vector<128xf32>
    %472 = vector.multi_reduction <add>, %471, %cst_113 [0] : vector<16x128xf32> to vector<128xf32>
    %473 = vector.shape_cast %472 : vector<128xf32> to vector<1x128xf32>
    %c6_114 = arith.constant 6 : index
    %c0_115 = arith.constant 0 : index
    %474 = vector.load %arg9[%c6_114, %c0_115] : memref<8x128xf32, #tpu.memory_space<vmem>>, vector<1x128xf32>
    tpu.vector_store %arg9[%c6_114, %c0_115], %473 {strides = array<i32>} : memref<8x128xf32, #tpu.memory_space<vmem>>, vector<1x128xf32>,
    %475 = vector.extract_strided_slice %385 {offsets = [7, 0, 0], sizes = [1, 16, 128], strides = [1, 1, 1]} : vector<8x16x128xf32> to vector<1x16x128xf32>
    %476 = vector.shape_cast %475 : vector<1x16x128xf32> to vector<16x128xf32>
    %477 = arith.mulf %476, %468 : vector<16x128xf32>
    %478 = vector.extract_strided_slice %389 {offsets = [7, 0, 0], sizes = [1, 16, 128], strides = [1, 1, 1]} : vector<8x16x128xf32> to vector<1x16x128xf32>
    %479 = vector.shape_cast %478 : vector<1x16x128xf32> to vector<16x128xf32>
    %480 = arith.addf %477, %479 : vector<16x128xf32>
    %481 = vector.extract_strided_slice %379 {offsets = [7, 0, 0], sizes = [1, 16, 128], strides = [1, 1, 1]} : vector<8x16x128xf32> to vector<1x16x128xf32>
    %482 = vector.shape_cast %481 : vector<1x16x128xf32> to vector<16x128xf32>
    %483 = arith.mulf %480, %482 : vector<16x128xf32>
    %cst_116 = arith.constant dense<0.000000e+00> : vector<128xf32>
    %484 = vector.multi_reduction <add>, %483, %cst_116 [0] : vector<16x128xf32> to vector<128xf32>
    %485 = vector.shape_cast %484 : vector<128xf32> to vector<1x128xf32>
    %c7_117 = arith.constant 7 : index
    %c0_118 = arith.constant 0 : index
    %486 = vector.load %arg9[%c7_117, %c0_118] : memref<8x128xf32, #tpu.memory_space<vmem>>, vector<1x128xf32>
    tpu.vector_store %arg9[%c7_117, %c0_118], %485 {strides = array<i32>} : memref<8x128xf32, #tpu.memory_space<vmem>>, vector<1x128xf32>,
    %c0_119 = arith.constant 0 : index
    %c0_120 = arith.constant 0 : index
    %487 = vector.load %arg9[%c0_119, %c0_120] : memref<8x128xf32, #tpu.memory_space<vmem>>, vector<8x128xf32>
    %488 = vector.broadcast %277 : vector<1x128xf32> to vector<8x128xf32>
    %489 = arith.mulf %488, %343 : vector<8x128xf32>
    %490 = arith.addf %487, %489 : vector<8x128xf32>
    %491 = vector.extract_strided_slice %304 {offsets = [0, 0], sizes = [8, 64], strides = [1, 1]} : vector<16x64xf32> to vector<8x64xf32>
    %492 = vector.extract_strided_slice %304 {offsets = [8, 0], sizes = [8, 64], strides = [1, 1]} : vector<16x64xf32> to vector<8x64xf32>
    %493 = tpu.concatenate %491, %492 in 1 : vector<8x64xf32>, vector<8x64xf32> -> vector<8x128xf32>
    %cst_121 = arith.constant 0.000000e+00 : f32
    %494 = vector.broadcast %cst_121 : f32 to vector<8x128xf32>
    %495 = arith.subf %494, %493 : vector<8x128xf32>
    %496 = math.exp %495 : vector<8x128xf32>
    %cst_122 = arith.constant 1.000000e+00 : f32
    %497 = vector.broadcast %cst_122 : f32 to vector<8x128xf32>
    %498 = arith.addf %497, %496 : vector<8x128xf32>
    %cst_123 = arith.constant 1.000000e+00 : f32
    %499 = vector.broadcast %cst_123 : f32 to vector<8x128xf32>
    %500 = arith.divf %499, %498 : vector<8x128xf32>
    %501 = arith.mulf %493, %500 : vector<8x128xf32>
    %502 = arith.mulf %490, %501 : vector<8x128xf32>
    %503 = vector.extract_strided_slice %502 {offsets = [0, 0], sizes = [8, 64], strides = [1, 1]} : vector<8x128xf32> to vector<8x64xf32>
    %504 = vector.extract_strided_slice %502 {offsets = [0, 64], sizes = [8, 64], strides = [1, 1]} : vector<8x128xf32> to vector<8x64xf32>
    %505 = tpu.concatenate %503, %504 in 0 : vector<8x64xf32>, vector<8x64xf32> -> vector<16x64xf32>
    %506 = arith.truncf %505 : vector<16x64xf32> to vector<16x64xbf16>
    %cst_124 = arith.constant dense<0.000000e+00> : vector<16x32xf32>
    %507 = tpu.matmul %506, %266, %cst_124 {dimension_numbers = #tpu.dot_dimension_numbers<[1], [0], [0], [1], [0, 0, 1, 1], [], []>} : vector<16x64xbf16>, vector<64x32xbf16>, vector<16x32xf32> -> vector<16x32xf32>
    %508 = arith.addf %507, %278 : vector<16x32xf32>
    %c0_125 = arith.constant 0 : index
    %c0_126 = arith.constant 0 : index
    %509 = vector.load %arg7[%c0_125, %c0_126] : memref<2x32xf32, #tpu.memory_space<vmem>>, vector<2x32xf32>
    %510 = vector.extract_strided_slice %509 {offsets = [0, 0], sizes = [1, 32], strides = [1, 1]} : vector<2x32xf32> to vector<1x32xf32>
    %511 = vector.extract_strided_slice %509 {offsets = [1, 0], sizes = [1, 32], strides = [1, 1]} : vector<2x32xf32> to vector<1x32xf32>
    %cst_127 = arith.constant dense<0.000000e+00> : vector<16xf32>
    %512 = vector.multi_reduction <add>, %508, %cst_127 [1] : vector<16x32xf32> to vector<16xf32>
    %513 = vector.shape_cast %512 : vector<16xf32> to vector<16x1xf32>
    %cst_128 = arith.constant 3.200000e+01 : f32
    %514 = vector.broadcast %cst_128 : f32 to vector<16x1xf32>
    %515 = arith.divf %513, %514 : vector<16x1xf32>
    %516 = vector.broadcast %515 : vector<16x1xf32> to vector<16x32xf32>
    %517 = arith.subf %508, %516 : vector<16x32xf32>
    %518 = arith.mulf %517, %517 : vector<16x32xf32>
    %cst_129 = arith.constant dense<0.000000e+00> : vector<16xf32>
    %519 = vector.multi_reduction <add>, %518, %cst_129 [1] : vector<16x32xf32> to vector<16xf32>
    %520 = vector.shape_cast %519 : vector<16xf32> to vector<16x1xf32>
    %cst_130 = arith.constant 3.200000e+01 : f32
    %521 = vector.broadcast %cst_130 : f32 to vector<16x1xf32>
    %522 = arith.divf %520, %521 : vector<16x1xf32>
    %523 = vector.broadcast %515 : vector<16x1xf32> to vector<16x32xf32>
    %524 = arith.subf %508, %523 : vector<16x32xf32>
    %cst_131 = arith.constant 9.99999974E-6 : f32
    %525 = vector.broadcast %cst_131 : f32 to vector<16x1xf32>
    %526 = arith.addf %522, %525 : vector<16x1xf32>
    %527 = math.rsqrt %526 : vector<16x1xf32>
    %528 = vector.broadcast %527 : vector<16x1xf32> to vector<16x32xf32>
    %529 = arith.mulf %524, %528 : vector<16x32xf32>
    %530 = vector.broadcast %510 : vector<1x32xf32> to vector<16x32xf32>
    %531 = arith.mulf %529, %530 : vector<16x32xf32>
    %532 = vector.broadcast %511 : vector<1x32xf32> to vector<16x32xf32>
    %533 = arith.addf %531, %532 : vector<16x32xf32>
    %c0_132 = arith.constant 0 : index
    %c0_133 = arith.constant 0 : index
    %534 = vector.load %arg8[%c0_132, %c0_133] : memref<16x32xf32, #tpu.memory_space<vmem>>, vector<16x32xf32>
    tpu.vector_store %arg8[%c0_132, %c0_133], %533 {strides = array<i32>} : memref<16x32xf32, #tpu.memory_space<vmem>>, vector<16x32xf32>,
    return
  }
}

</mosaic_0001>

<bundles_post_ra>
// kernel: mixer_model_forward.1
= control target key start
LH: loop header
LB: loop body
LE: loop exit
PB: predicated region body
PF: predicated region fallthrough
CT: control target
= control target key end

     0   :  { %13 = vsyncpa [#allocation4], 0  ;;  %s3736_s0 = inlined_call_operand.vmem [shape: f32[16,32], index: 0, kind: input, shape index: {}]   ;;  %s3737_s1 = inlined_call_operand.hbm [shape: f32[16,32], index: 1, kind: input, shape index: {}]   ;;  %s3738_s2 = inlined_call_operand.vmem [shape: bf16[2,32,128], index: 2, kind: input, shape index: {}]   ;;  %s3739_s3 = inlined_call_operand.vmem [shape: bf16[2,64,96], index: 3, kind: input, shape index: {}]   ;;  %s3740_s4 = inlined_call_operand.vmem [shape: bf16[2,64,32], index: 4, kind: input, shape index: {}]   ;;  %s3741_s5 = inlined_call_operand.hbm [shape: f32[2,16,128], index: 5, kind: input, shape index: {}]   ;;  %s3742_s6 = inlined_call_operand.vmem [shape: f32[2,9,64], index: 6, kind: input, shape index: {}]   ;;  %s3743_s7 = inlined_call_operand.vmem [shape: f32[2,32], index: 7, kind: input, shape index: {}]   ;;  %s3744_s8 = inlined_call_operand.hbm [shape: f32[16,32], index: 8, kind: output, shape index: {}]  }
   0x1   :  { %14 = vsyncpa [#allocation7], 0 }
   0x2   :  { %15 = vsyncpa [#allocation5], 0  ;;  %s22_s29 = sshll.u32 %s3737_s1, 4  ;;  %s2557_s30 = smov [#allocation3]   ;;  %s23_s29 = int_to_ptr.hbm [resolvable:$true] %s22_s29 }
   0x3   :  { %s24_s9 = sshll.u32 %s2557_s30, 4  ;;  %s41_s12 = sshll.u32 %s3741_s5, 4  ;;  %s25_s9 = int_to_ptr.vmem [resolvable:$true] %s24_s9  ;;  %s42_s12 = int_to_ptr.hbm [resolvable:$true] %s41_s12 }
   0x4   :  { %s2558_s13 = smov 128   ;;  %s2559_s14 = smov 8  }
   0x5   :  { %30 = dma.hbm_to_vmem [thread:$0]  %s23_s29, 256, %s25_s9, [#allocation4], %s2558_s13, %s2558_s13, %s2559_s14  }
   0x6   :  { %s2560_s15 = smov [#allocation6]  }
   0x7   :  { %s43_s16 = sshll.u32 %s2560_s15, 4  ;;  %s44_s16 = int_to_ptr.vmem [resolvable:$true] %s43_s16 }
   0x8   :  { %49 = dma.hbm_to_vmem [thread:$0]  %s42_s12, 512, %s44_s16, [#allocation7], %s2558_s13, %s2558_s13, %s2559_s14  }
   0x9   :  { %2551 = dma.done.wait [#allocation4], 256  }
   0xa   :  { %2552 = vsyncadd [#allocation4], 4294967040 }
   0xb   :  { %2553 = dma.done.wait [#allocation7], 512  }
   0xc   :  { %2554 = vsyncadd [#allocation7], 4294966784  ;;  %v63_v0 = vld [vmem:[%s3736_s0] sm:$0xff]  ;;  %v65_v1 = vld [vmem:[#allocation3] sm:$0xff]  ;;  %vm113_vm0 = vcmask 261120   ;;  %v2561_v8 = vmov 32.0   ;;  %v3748_v57 = vlaneseq }
   0xd   :  { %v2624_v2 = vadd.f32 %v65_v1, %v63_v0  ;;  %v64_v3 = vld [vmem:[%s3736_s0 + $0x8] sm:$0xff]  ;;  %v66_v4 = vld [vmem:[#allocation3 + $0x8] sm:$0xff]  ;;  %2369 = vrcp.f32 %v2561_v8  ;;  %v2249_v27 = vld [vmem:[%s3738_s2] sm:$0xff]  ;;  %s2562_s24 = smov 64   ;;  %s2127_s22 = sshll.u32 %s3744_s8, 4  ;;  %s2128_s22 = int_to_ptr.hbm [resolvable:$true] %s2127_s22 }
   0xe   :  { %v2631_v6 = vadd.f32 %v66_v4, %v64_v3  ;;  %v2250_v25 = vld [vmem:[%s3738_s2 + $0x8] sm:$0xff]  ;;  %v2654_v44 = vld [vmem:[%s3742_s6] sm:$0xff]  ;;  %v2662_v58 = vshrl.u32 %v3748_v57, 7  ;;  %v2254_v61 = vld [vmem:[%s3739_s3 + $0x18] sm:$0xff] }
   0xf   :  { %3767 = vst [vmem:[#allocation12_spill] sm:$0xff] %v2624_v2  ;;  %v114_v5 = vsel %vm113_vm0, %v2624_v2, 0.0  ;;  %193 = vmatpush.bf16.msra.mxu0 %v2250_v25  ;;  %v165_v47 = vperm.slane %v2654_v44, 0  ;;  %v168_v52 = vperm.slane %v2654_v44, 1  ;;  %106 = vrot.lane.b32.xlu2 %v2654_v44, %s2562_s24  ;;  %v2253_v62 = vld [vmem:[%s3739_s3 + $0x10] sm:$0xff]  ;;  %v2252_v63 = vld [vmem:[%s3739_s3 + $0x8] sm:$0xff] }
  0x10   :  { %115 = vadd.xlane.f32.xlu0 %v114_v5  ;;  %3768 = vst [vmem:[#allocation13_spill] sm:$0xff] %v2631_v6  ;;  %v117_v7 = vsel %vm113_vm0, %v2631_v6, 0.0  ;;  %v2665_v59 = vadd.s32 64, %v2662_v58  ;;  %v2668_v60 = vadd.s32 72, %v2662_v58  ;;  %315 = vmatpush.bf16.msra.mxu1 %v2254_v61  ;;  %v2251_v0 = vld [vmem:[%s3739_s3] sm:$0xff]  ;;  %v69_v1 = vadd.s32 8, %v2662_v58 }
  0x11   :  { %3770 = vst [vmem:[#allocation15_spill] sm:$0xff] %v2662_v58  ;;  %v2688_v4 = vand.u32 7, %v2662_v58  ;;  %v204_v8 = vperm.slane %v2654_v44, 2  ;;  %vm209_vm9 = vcmp.lt.s32.totalorder %v2662_v58, 1  ;;  %vm221_vm10 = vcmp.lt.s32.totalorder %v2662_v58, 2 }
  0x12   :  { %2277 = vset.pattern.permute.xlu2 %v2668_v60  ;;  %2278 = vset.pattern.permute.xlu0 %v2665_v59  ;;  %v2690_v5 = vand.u32 7, %v69_v1  ;;  %vm233_vm14 = vcmp.lt.s32.totalorder %v2662_v58, 3 }
  0x13   :  { %v2370_v9 = vpop.eup %2369  ;;  %194 = vmatpush.bf16.msra.mxu0 %v2249_v27  ;;  %2276 = vset.pattern.permute.xlu1 %v2665_v59  ;;  %3771 = vst [vmem:[#allocation16_spill] sm:$0xff] %v2688_v4  ;;  %vm72_vm8 = vcmp.ge.s32.totalorder %v2688_v4, 1  ;;  %vm74_vm15 = vcmp.ge.s32.totalorder %v2688_v4, 2 }
  0x14   :  { %v121_v10 = vmul.f32 32.0, %v2370_v9  ;;  %vm125_vm1 = vweird.f32 %v2370_v9  ;;  %316 = vmatpush.bf16.msra.mxu1 %v2253_v62  ;;  %3772 = vst [vmem:[#allocation17_spill] sm:$0xff] %v2690_v5  ;;  %vm73_vm11 = vcmp.ge.s32.totalorder %v2690_v5, 1  ;;  %vm3747_vm12 = vcmp.ge.s32.totalorder %v2690_v5, 2 }
  0x15   :  { %vm3745_vm13 = vcmp.ge.s32.totalorder %v2690_v5, 3  ;;  %v2920_v5 = vld [vmem:[#allocation6] sm:$0xff] }
  0x16   :  { %v122_v11 = vsub.f32 1.0, %v121_v10  ;;  %v214_v10 = vperm.slane %v2654_v44, 7 }
  0x18   :  { %118 = vadd.xlane.f32.xlu0 %v117_v7  ;;  %v123_v12 = vmul.f32 %v2370_v9, %v122_v11  ;;  %317 = vmatpush.bf16.msra.mxu1 %v2252_v63  ;;  %v2367_v7 = vld [vmem:[%s3742_s6 + $0x8] ss:$0 sm:$0xff] }
  0x1a   :  { %v124_v13 = vadd.f32 %v2370_v9, %v123_v12 }
  0x1c   :  { %v2635_v14 = vsel %vm125_vm1, %v2370_v9, %v124_v13  ;;  %318 = vmatpush.bf16.msra.mxu1 %v2251_v0  ;;  %vm3746_vm1 = vcmp.ge.s32.totalorder %v2688_v4, 3  ;;  %v2924_v4 = vld [vmem:[#allocation6 + $0x8] sm:$0xff] }
  0x1d   :  { %3769 = vst [vmem:[#allocation14_spill] sm:$0xff] %v2635_v14 }
  0x83   :  { %v116_v15 = vpop.xlane.xlu0 %115 }
  0x84   :  { %v127_v16 = vmul.f32 %v2635_v14, %v116_v15  ;;  %v226_v15 = vperm.slane %v2654_v44, 6 }
  0x86   :  { %v129_v17 = vsub.f32 %v2624_v2, %v127_v16 }
  0x88   :  { %v131_v18 = vmul.f32 %v129_v17, %v129_v17 }
  0x8a   :  { %v133_v19 = vsel %vm113_vm0, %v131_v18, 0.0 }
  0x8b   :  { %134 = vadd.xlane.f32.xlu1 %v133_v19  ;;  %v119_v20 = vpop.xlane.xlu0 %118 }
  0x8c   :  { %v128_v21 = vmul.f32 %v2635_v14, %v119_v20 }
  0x8e   :  { %v130_v22 = vsub.f32 %v2631_v6, %v128_v21  ;;  %v238_v21 = vperm.slane %v2654_v44, 5 }
  0x90   :  { %v132_v23 = vmul.f32 %v130_v22, %v130_v22 }
  0x92   :  { %v136_v24 = vsel %vm113_vm0, %v132_v23, 0.0 }
  0x93   :  { %137 = vadd.xlane.f32.xlu1 %v136_v24 }
  0xfe   :  { %v135_v26 = vpop.xlane.xlu1 %134 }
  0xff   :  { %v139_v28 = vmul.f32 %v135_v26, %v2635_v14 }
 0x101   :  { %v141_v29 = vadd.f32 1e-05, %v139_v28 }
 0x103   :  { %2371 = vrsqrt.f32 %v141_v29  ;;  %vm149_vm3 = vweird.f32 %v141_v29 }
 0x106   :  { %v138_v30 = vpop.xlane.xlu1 %137 }
 0x107   :  { %v140_v31 = vmul.f32 %v138_v30, %v2635_v14 }
 0x109   :  { %v2372_v32 = vpop.eup %2371  ;;  %v142_v33 = vadd.f32 1e-05, %v140_v31 }
 0x10a   :  { %v144_v34 = vmul.f32 %v2372_v32, %v141_v29  ;;  %vm150_vm2 = vweird.f32 %v2372_v32 }
 0x10b   :  { %2373 = vrsqrt.f32 %v142_v33  ;;  %vm151_vm4 = vmor %vm149_vm3, %vm150_vm2  ;;  %vm159_vm6 = vweird.f32 %v142_v33 }
 0x10c   :  { %v145_v35 = vmul.f32 %v2372_v32, %v144_v34 }
 0x10e   :  { %v146_v36 = vmul.f32 0.5, %v145_v35 }
 0x110   :  { %v147_v37 = vsub.f32 1.5, %v146_v36 }
 0x111   :  { %v2374_v38 = vpop.eup %2373 }
 0x112   :  { %v148_v39 = vmul.f32 %v2372_v32, %v147_v37  ;;  %v154_v40 = vmul.f32 %v2374_v38, %v142_v33  ;;  %vm160_vm5 = vweird.f32 %v2374_v38 }
 0x113   :  { %vm161_vm7 = vmor %vm159_vm6, %vm160_vm5 }
 0x114   :  { %v155_v41 = vmul.f32 %v2374_v38, %v154_v40  ;;  %v152_v42 = vsel %vm151_vm4, %v2372_v32, %v148_v39 }
 0x115   :  { %v163_v46 = vmul.f32 %v152_v42, %v129_v17 }
 0x116   :  { %v156_v43 = vmul.f32 0.5, %v155_v41 }
 0x117   :  { %v166_v51 = vmul.f32 %v165_v47, %v163_v46 }
 0x118   :  { %v157_v45 = vsub.f32 1.5, %v156_v43 }
 0x119   :  { %v169_v54 = vadd.f32 %v168_v52, %v166_v51 }
 0x11a   :  { %v158_v48 = vmul.f32 %v2374_v38, %v157_v45 }
 0x11c   :  { %v162_v49 = vsel %vm161_vm7, %v2374_v38, %v158_v48 }
 0x11d   :  { %v164_v50 = vmul.f32 %v162_v49, %v130_v22 }
 0x11f   :  { %v167_v53 = vmul.f32 %v165_v47, %v164_v50 }
 0x121   :  { %v170_v55 = vadd.f32 %v168_v52, %v167_v53 }
 0x123   :  { %v171_v56 = vpack.c.bf16 %v170_v55, %v169_v54 }
 0x125   :  { %2149 = vmatmul.msk.bf16.vlgmr.msra.gmra.mxu0 %vm113_vm0, %v171_v56 }
 0x1a2   :  { %v196_v3 = vpop.f32.mrf.mxu0 }
 0x1a3   :  { %1008 = vrot.lane.b32.xlu1 %v196_v3, %s2562_s24  ;;  %v202_v9 = vmul.f32 %v2367_v7, %v196_v3  ;;  %v207_v11 = vrot.slane %v196_v3, 7  ;;  %v219_v12 = vrot.slane %v196_v3, 6  ;;  %v231_v20 = vrot.slane %v196_v3, 5 }
 0x1a5   :  { %v205_v22 = vadd.f32 %v204_v8, %v202_v9 }
 0x1aa   :  { %v2703_v13 = vpop.f32.mrf.mxu0 }
 0x1ab   :  { %3773 = vst [vmem:[#allocation18_spill] sm:$0xff] %v2703_v13  ;;  %v203_v16 = vmul.f32 %v2367_v7, %v2703_v13  ;;  %v208_v17 = vrot.slane %v2703_v13, 7  ;;  %v220_v18 = vrot.slane %v2703_v13, 6  ;;  %v232_v19 = vrot.slane %v2703_v13, 5 }
 0x1ad   :  { %v210_v23 = vsel %vm209_vm9, %v207_v11, %v208_v17  ;;  %v211_v24 = vsel %vm209_vm9, %v208_v17, %v207_v11  ;;  %v223_v25 = vsel %vm221_vm10, %v220_v18, %v219_v12  ;;  %v222_v28 = vsel %vm221_vm10, %v219_v12, %v220_v18 }
 0x1ae   :  { %v212_v26 = vsel %vm72_vm8, %v211_v24, 0.0  ;;  %v213_v27 = vsel %vm73_vm11, %v210_v23, 0.0  ;;  %v234_v29 = vsel %vm233_vm14, %v231_v20, %v232_v19  ;;  %v206_v30 = vadd.f32 %v204_v8, %v203_v16 }
 0x1af   :  { %v216_v31 = vmul.f32 %v214_v10, %v213_v27  ;;  %v225_v32 = vsel %vm3747_vm12, %v222_v28, 0.0  ;;  %v215_v33 = vmul.f32 %v214_v10, %v212_v26  ;;  %v237_v35 = vsel %vm3745_vm13, %v234_v29, 0.0 }
 0x1b0   :  { %v228_v34 = vmul.f32 %v226_v15, %v225_v32  ;;  %v224_v36 = vsel %vm74_vm15, %v223_v25, 0.0  ;;  %v235_v37 = vsel %vm233_vm14, %v232_v19, %v231_v20  ;;  %v240_v43 = vmul.f32 %v238_v21, %v237_v35 }
 0x1b1   :  { %v218_v38 = vadd.f32 %v216_v31, %v206_v30  ;;  %v217_v39 = vadd.f32 %v215_v33, %v205_v22  ;;  %v227_v40 = vmul.f32 %v226_v15, %v224_v36  ;;  %v236_v41 = vsel %vm3746_vm1, %v235_v37, 0.0 }
 0x1b2   :  { %v239_v46 = vmul.f32 %v238_v21, %v236_v41  ;;  %vm109_vm12 = vcmask 523264   ;;  %v2766_v36 = vadd.s32 88, %v2662_v58  ;;  %v2787_v41 = vpop.permute.xlu2 %106 }
 0x1b3   :  { %v230_v42 = vadd.f32 %v228_v34, %v218_v38  ;;  %v229_v45 = vadd.f32 %v227_v40, %v217_v39  ;;  %v2759_v34 = vadd.s32 80, %v2662_v58 }
 0x1b5   :  { %v242_v47 = vadd.f32 %v240_v43, %v230_v42  ;;  %v241_v48 = vadd.f32 %v239_v46, %v229_v45 }
 0x1b7   :  { %v244_v49 = vsub.f32 0.0, %v242_v47  ;;  %v243_v50 = vsub.f32 0.0, %v241_v48 }
 0x1b9   :  { %v247_v51 = vmul.f32 1.442695, %v244_v49  ;;  %v245_v52 = vmul.f32 1.442695, %v243_v50 }
 0x1bb   :  { %2375 = vpow2.f32 %v247_v51 }
 0x1bc   :  { %2377 = vpow2.f32 %v245_v52 }
 0x1c1   :  { %v2376_v53 = vpop.eup %2375 }
 0x1c2   :  { %v2378_v54 = vpop.eup %2377  ;;  %v250_v55 = vadd.f32 1.0, %v2376_v53 }
 0x1c3   :  { %v249_v56 = vadd.f32 1.0, %v2378_v54 }
 0x1c4   :  { %2379 = vrcp.f32 %v250_v55  ;;  %v277_v3 = vand.u32 2147483648, %v250_v55  ;;  %v275_v9 = vand.u32 2147483647, %v250_v55  ;;  %vm271_vm4 = vweird.f32 %v250_v55 }
 0x1c5   :  { %2381 = vrcp.f32 %v249_v56  ;;  %v262_v10 = vand.u32 2147483648, %v249_v56  ;;  %v260_v12 = vand.u32 2147483647, %v249_v56  ;;  %vm256_vm6 = vweird.f32 %v249_v56 }
 0x1c6   :  { %v278_v16 = vor.u32 1.1754944e-38, %v277_v3  ;;  %vm276_vm7 = vcmp.eq.f32.partialorder %v275_v9, 8.507059e+37 }
 0x1c7   :  { %v263_v19 = vor.u32 1.1754944e-38, %v262_v10  ;;  %vm261_vm1 = vcmp.eq.f32.partialorder %v260_v12, 8.507059e+37 }
 0x1ca   :  { %v2380_v61 = vpop.eup %2379 }
 0x1cb   :  { %v2382_v62 = vpop.eup %2381  ;;  %v267_v63 = vmul.f32 %v2380_v61, %v250_v55  ;;  %vm272_vm2 = vweird.f32 %v2380_v61 }
 0x1cc   :  { %v252_v0 = vmul.f32 %v2382_v62, %v249_v56  ;;  %vm257_vm3 = vweird.f32 %v2382_v62  ;;  %vm273_vm5 = vmor %vm271_vm4, %vm272_vm2 }
 0x1cd   :  { %v268_v1 = vsub.f32 1.0, %v267_v63  ;;  %vm258_vm13 = vmor %vm256_vm6, %vm257_vm3 }
 0x1ce   :  { %v253_v7 = vsub.f32 1.0, %v252_v0 }
 0x1cf   :  { %v269_v8 = vmul.f32 %v2380_v61, %v268_v1 }
 0x1d0   :  { %v254_v11 = vmul.f32 %v2382_v62, %v253_v7 }
 0x1d1   :  { %v270_v15 = vadd.f32 %v2380_v61, %v269_v8 }
 0x1d2   :  { %v255_v17 = vadd.f32 %v2382_v62, %v254_v11 }
 0x1d3   :  { %v274_v18 = vsel %vm273_vm5, %v2380_v61, %v270_v15 }
 0x1d4   :  { %v279_v20 = vsel %vm276_vm7, %v278_v16, %v274_v18  ;;  %v259_v21 = vsel %vm258_vm13, %v2382_v62, %v255_v17 }
 0x1d5   :  { %v282_v22 = vmul.f32 %v279_v20, %v242_v47  ;;  %v264_v23 = vsel %vm261_vm1, %v263_v19, %v259_v21 }
 0x1d6   :  { %v2738_v24 = vmul.f32 %v264_v23, %v241_v48  ;;  %v2893_v23 = vsel %vm109_vm12, %v2654_v44, %v2787_v41 }
 0x1d7   :  { %326 = vrot.lane.b32.xlu0 %v282_v22, %s2562_s24  ;;  %3782 = vst [vmem:[#allocation27_spill] sm:$0xff] %v2893_v23 }
 0x1d8   :  { %v283_v25 = vpack.c.bf16 %v282_v22, %v2738_v24 }
 0x1da   :  { %2166 = vmatmul.msk.bf16.vlgmr.msra.gmra.mxu1 %vm109_vm12, %v283_v25  ;;  %v335_v25 = vperm.slane %v2893_v23, 3 }
 0x215   :  { %v2824_v53 = vpop.permute.xlu1 %1008 }
 0x216   :  { %3774 = vst [vmem:[#allocation19_spill] sm:$0xff] %v2824_v53 }
 0x249   :  { %v2853_v7 = vpop.permute.xlu0 %326 }
 0x257   :  { %v2743_v26 = vpop.f32.mrf.mxu1 }
 0x258   :  { %v359_v27 = vperm.slane %v2743_v26, 1  ;;  %v346_v28 = vperm.slane %v2743_v26, 0  ;;  %v372_v29 = vperm.slane %v2743_v26, 2  ;;  %v385_v30 = vperm.slane %v2743_v26, 3 }
 0x259   :  { %v424_v31 = vperm.slane %v2743_v26, 6  ;;  %v437_v32 = vperm.slane %v2743_v26, 7  ;;  %v398_v33 = vperm.slane %v2743_v26, 4  ;;  %v411_v35 = vperm.slane %v2743_v26, 5 }
 0x25a   :  { %364 = vperm.xlu0 %2278, %v359_v27   ;;  %357 = vperm.xlu2 %2277, %v346_v28  }
 0x25b   :  { %351 = vperm.xlu1 %2276, %v346_v28  }
 0x25f   :  { %v322_v37 = vpop.f32.mrf.mxu1 }
 0x260   :  { %v2775_v38 = vperm.slane %v322_v37, 3  ;;  %v2781_v39 = vperm.slane %v322_v37, 4  ;;  %v2784_v40 = vperm.slane %v322_v37, 7  ;;  %v463_v42 = vperm.slane %v322_v37, 1 }
 0x261   :  { %v2798_v46 = vperm.slane %v322_v37, 2  ;;  %v2809_v49 = vperm.slane %v322_v37, 6  ;;  %v2817_v51 = vperm.slane %v322_v37, 0  ;;  %v2826_v54 = vperm.slane %v322_v37, 5 }
 0x262   :  { %2279 = vset.pattern.permute.xlu0 %v2668_v60  ;;  %370 = vperm.xlu2 %2277, %v359_v27  }
 0x263   :  { %377 = vperm.xlu1 %2276, %v372_v29  }
 0x26a   :  { %383 = vperm.xlu0 %2279, %v372_v29   ;;  %2280 = vset.pattern.permute.xlu2 %v2665_v59 }
 0x26b   :  { %2281 = vset.pattern.permute.xlu1 %v2668_v60 }
 0x272   :  { %2286 = vset.pattern.permute.xlu0 %v2665_v59  ;;  %390 = vperm.xlu2 %2280, %v385_v30  }
 0x273   :  { %396 = vperm.xlu1 %2281, %v385_v30  }
 0x27a   :  { %429 = vperm.xlu0 %2286, %v424_v31   ;;  %2283 = vset.pattern.permute.xlu2 %v2668_v60 }
 0x27b   :  { %2282 = vset.pattern.permute.xlu1 %v2665_v59 }
 0x282   :  { %442 = vperm.xlu0 %2286, %v437_v32   ;;  %409 = vperm.xlu2 %2283, %v398_v33  }
 0x283   :  { %403 = vperm.xlu1 %2282, %v398_v33  }
 0x28a   :  { %2290 = vset.pattern.permute.xlu0 %v2759_v34  ;;  %2284 = vset.pattern.permute.xlu2 %v2665_v59 }
 0x28b   :  { %2285 = vset.pattern.permute.xlu1 %v2668_v60 }
 0x292   :  { %598 = vperm.xlu0 %2290, %v372_v29   ;;  %416 = vperm.xlu2 %2284, %v411_v35  }
 0x293   :  { %422 = vperm.xlu1 %2285, %v411_v35  }
 0x29a   :  { %2293 = vset.pattern.permute.xlu0 %v2766_v36  ;;  %2287 = vset.pattern.permute.xlu2 %v2668_v60 }
 0x29b   :  { %2289 = vset.pattern.permute.xlu1 %v2766_v36 }
 0x2a2   :  { %628 = vperm.xlu0 %2293, %v398_v33   ;;  %435 = vperm.xlu2 %2287, %v424_v31  }
 0x2a3   :  { %580 = vperm.xlu1 %2289, %v346_v28  }
 0x2aa   :  { %2296 = vset.pattern.permute.xlu0 %v2759_v34  ;;  %448 = vperm.xlu2 %2287, %v437_v32  }
 0x2ab   :  { %592 = vperm.xlu1 %2289, %v359_v27  }
 0x2b2   :  { %658 = vperm.xlu0 %2296, %v437_v32   ;;  %2288 = vset.pattern.permute.xlu2 %v2759_v34 }
 0x2b3   :  { %2292 = vset.pattern.permute.xlu1 %v2759_v34 }
 0x2b4   :  { %v2792_v43 = vpop.permute.xlu2 %357 }
 0x2ba   :  { %2303 = vset.pattern.permute.xlu0 %v2665_v59  ;;  %574 = vperm.xlu2 %2288, %v346_v28  }
 0x2bb   :  { %610 = vperm.xlu1 %2292, %v385_v30  }
 0x2bc   :  { %v2796_v45 = vpop.permute.xlu2 %370 }
 0x2c2   :  { %586 = vperm.xlu2 %2288, %v359_v27   ;;  %494 = vperm.xlu0 %2303, %v2775_v38  }
 0x2c3   :  { %622 = vperm.xlu1 %2292, %v398_v33  }
 0x2ca   :  { %2291 = vset.pattern.permute.xlu2 %v2766_v36  ;;  %2306 = vset.pattern.permute.xlu0 %v2668_v60 }
 0x2cb   :  { %2295 = vset.pattern.permute.xlu1 %v2766_v36 }
 0x2cc   :  { %v2803_v47 = vpop.permute.xlu2 %390  ;;  %v2861_v10 = vpop.permute.xlu0 %364 }
 0x2cd   :  { %v2830_v55 = vpop.permute.xlu1 %351 }
 0x2d2   :  { %604 = vperm.xlu2 %2291, %v372_v29   ;;  %513 = vperm.xlu0 %2306, %v2781_v39  }
 0x2d3   :  { %640 = vperm.xlu1 %2295, %v411_v35  }
 0x2d5   :  { %v2838_v62 = vpop.permute.xlu1 %377 }
 0x2da   :  { %616 = vperm.xlu2 %2291, %v385_v30   ;;  %552 = vperm.xlu0 %2306, %v2784_v40  }
 0x2db   :  { %652 = vperm.xlu1 %2295, %v424_v31  }
 0x2dc   :  { %v2807_v48 = vpop.permute.xlu2 %409  ;;  %v2868_v15 = vpop.permute.xlu0 %383 }
 0x2e2   :  { %2294 = vset.pattern.permute.xlu2 %v2759_v34  ;;  %2313 = vset.pattern.permute.xlu0 %v2766_v36 }
 0x2e3   :  { %2300 = vset.pattern.permute.xlu1 %v2665_v59 }
 0x2e5   :  { %v2841_v63 = vpop.permute.xlu1 %396 }
 0x2ea   :  { %634 = vperm.xlu2 %2294, %v411_v35   ;;  %688 = vperm.xlu0 %2313, %v463_v42  }
 0x2eb   :  { %468 = vperm.xlu1 %2300, %v463_v42  }
 0x2ec   :  { %v2815_v50 = vpop.permute.xlu2 %416  ;;  %v2876_v18 = vpop.permute.xlu0 %429 }
 0x2f2   :  { %646 = vperm.xlu2 %2294, %v424_v31   ;;  %2316 = vset.pattern.permute.xlu0 %v2759_v34 }
 0x2f3   :  { %2302 = vset.pattern.permute.xlu1 %v2668_v60 }
 0x2f4   :  { %v2884_v21 = vpop.permute.xlu0 %442 }
 0x2f5   :  { %v2847_v1 = vpop.permute.xlu1 %403 }
 0x2fa   :  { %2297 = vset.pattern.permute.xlu2 %v2766_v36  ;;  %718 = vperm.xlu0 %2316, %v2781_v39  }
 0x2fb   :  { %487 = vperm.xlu1 %2302, %v2798_v46  }
 0x2fc   :  { %v2822_v52 = vpop.permute.xlu2 %435 }
 0x302   :  { %664 = vperm.xlu2 %2297, %v437_v32   ;;  %2319 = vset.pattern.permute.xlu0 %v2766_v36 }
 0x303   :  { %2305 = vset.pattern.permute.xlu1 %v2665_v59 }
 0x304   :  { %v2832_v56 = vpop.permute.xlu2 %448  ;;  %v2898_v29 = vpop.permute.xlu0 %598 }
 0x305   :  { %v2855_v8 = vpop.permute.xlu1 %422  ;;  %3783 = vst [vmem:[#allocation28_spill] sm:$0xff] %v2898_v29 }
 0x30a   :  { %2298 = vset.pattern.permute.xlu2 %v2665_v59  ;;  %748 = vperm.xlu0 %2319, %v2809_v49  }
 0x30b   :  { %331 = vrot.lane.b32.xlu2 %v322_v37, %s2562_s24  ;;  %507 = vperm.xlu1 %2305, %v2781_v39  }
 0x312   :  { %2322 = vset.pattern.permute.xlu0 %v2665_v59 }
 0x313   :  { %2308 = vset.pattern.permute.xlu1 %v2668_v60  ;;  %455 = vperm.xlu2 %2298, %v2817_v51  }
 0x314   :  { %v2836_v61 = vpop.permute.xlu2 %574  ;;  %v2904_v44 = vpop.permute.xlu0 %628 }
 0x315   :  { %v2863_v11 = vpop.permute.xlu1 %580  ;;  %3785 = vst [vmem:[#allocation30_spill] sm:$0xff] %v2904_v44 }
 0x316   :  { %3777 = vst [vmem:[#allocation22_spill] sm:$0xff] %v2863_v11 }
 0x31b   :  { %526 = vperm.xlu1 %2308, %v2826_v54   ;;  %2299 = vset.pattern.permute.xlu2 %v2668_v60 }
 0x31c   :  { %v2843_v0 = vpop.permute.xlu2 %586 }
 0x31d   :  { %v2870_v16 = vpop.permute.xlu1 %592 }
 0x323   :  { %2309 = vset.pattern.permute.xlu1 %v2665_v59  ;;  %461 = vperm.xlu2 %2299, %v2817_v51  }
 0x32b   :  { %533 = vperm.xlu1 %2309, %v2809_v49   ;;  %474 = vperm.xlu2 %2299, %v463_v42  }
 0x32c   :  { %v2849_v3 = vpop.permute.xlu2 %604 }
 0x32d   :  { %3775 = vst [vmem:[#allocation20_spill] sm:$0xff] %v2849_v3  ;;  %v2878_v19 = vpop.permute.xlu1 %610 }
 0x32e   :  { %3780 = vst [vmem:[#allocation25_spill] sm:$0xff] %v2878_v19 }
 0x333   :  { %546 = vperm.xlu1 %2309, %v2784_v40   ;;  %2301 = vset.pattern.permute.xlu2 %v2665_v59 }
 0x334   :  { %v2857_v9 = vpop.permute.xlu2 %616 }
 0x335   :  { %3776 = vst [vmem:[#allocation21_spill] sm:$0xff] %v2857_v9  ;;  %v2886_v22 = vpop.permute.xlu1 %622 }
 0x33b   :  { %2311 = vset.pattern.permute.xlu1 %v2759_v34  ;;  %481 = vperm.xlu2 %2301, %v2798_v46  }
 0x343   :  { %670 = vperm.xlu1 %2311, %v2817_v51   ;;  %2304 = vset.pattern.permute.xlu2 %v2668_v60 }
 0x344   :  { %v2865_v12 = vpop.permute.xlu2 %634 }
 0x345   :  { %3778 = vst [vmem:[#allocation23_spill] sm:$0xff] %v2865_v12  ;;  %v2900_v32 = vpop.permute.xlu1 %640  ;;  %v3788_v12 = vlaneseq }
 0x346   :  { %3784 = vst [vmem:[#allocation29_spill] sm:$0xff] %v2900_v32 }
 0x34b   :  { %682 = vperm.xlu1 %2311, %v463_v42   ;;  %500 = vperm.xlu2 %2304, %v2775_v38   ;;  %v2910_v42 = vpop.permute.xlu0 %658 }
 0x34c   :  { %v2874_v17 = vpop.permute.xlu2 %646  ;;  %3786 = vst [vmem:[#allocation31_spill] sm:$0xff] %v2910_v42 }
 0x34d   :  { %3779 = vst [vmem:[#allocation24_spill] sm:$0xff] %v2874_v17  ;;  %v2908_v37 = vpop.permute.xlu1 %652 }
 0x353   :  { %2315 = vset.pattern.permute.xlu1 %v2766_v36  ;;  %2307 = vset.pattern.permute.xlu2 %v2665_v59 }
 0x35b   :  { %700 = vperm.xlu1 %2315, %v2798_v46   ;;  %520 = vperm.xlu2 %2307, %v2826_v54  }
 0x35c   :  { %v2882_v20 = vpop.permute.xlu2 %664 }
 0x35d   :  { %3781 = vst [vmem:[#allocation26_spill] sm:$0xff] %v2882_v20 }
 0x363   :  { %712 = vperm.xlu1 %2315, %v2775_v38   ;;  %2310 = vset.pattern.permute.xlu2 %v2668_v60 }
 0x365   :  { %v332_v27 = vpop.permute.xlu2 %331 }
 0x366   :  { %v334_v28 = vsel %vm109_vm12, %v2743_v26, %v332_v27  ;;  %v2914_v27 = vpop.permute.xlu1 %468 }
 0x367   :  { %v336_v30 = vadd.f32 %v335_v25, %v334_v28 }
 0x369   :  { %v338_v31 = vand.u32 2147483647, %v336_v30 }
 0x36b   :  { %v339_v33 = vsub.f32 0.0, %v338_v31  ;;  %2318 = vset.pattern.permute.xlu1 %v2759_v34  ;;  %539 = vperm.xlu2 %2310, %v2809_v49   ;;  %v2916_v31 = vpop.permute.xlu0 %494 }
 0x36d   :  { %v340_v35 = vmul.f32 1.442695, %v339_v33  ;;  %v456_v25 = vpop.permute.xlu2 %455  ;;  %v337_v33 = vmax.f32 %v336_v30, 0.0 }
 0x36e   :  { %v2929_v58 = vpop.permute.xlu1 %487 }
 0x36f   :  { %2383 = vpow2.f32 %v340_v35 }
 0x373   :  { %730 = vperm.xlu1 %2318, %v2826_v54   ;;  %2312 = vset.pattern.permute.xlu2 %v2766_v36  ;;  %v2938_v14 = vpop.permute.xlu0 %513 }
 0x375   :  { %v2384_v26 = vpop.eup %2383 }
 0x376   :  { %v342_v41 = vadd.f32 1.0, %v2384_v26 }
 0x378   :  { %2385 = vlog2.f32 %v342_v41 }
 0x37b   :  { %742 = vperm.xlu1 %2318, %v2809_v49   ;;  %676 = vperm.xlu2 %2312, %v2817_v51   ;;  %v553_v29 = vpop.permute.xlu0 %552 }
 0x37d   :  { %v462_v49 = vpop.permute.xlu2 %461 }
 0x37e   :  { %v2386_v28 = vpop.eup %2385 }
 0x37f   :  { %v344_v35 = vmul.f32 0.6931472, %v2386_v28 }
 0x381   :  { %v2918_v57 = vadd.f32 %v344_v35, %v337_v33  ;;  %v2935_v33 = vsel %vm109_vm12, %v2738_v24, %v2853_v7  ;;  %v2948_v24 = vand.u32 127, %v3788_v12  ;;  %v2957_v12 = vpop.permute.xlu1 %507 }
 0x382   :  { %3787 = vst [vmem:[#allocation32_spill] sm:$0xff] %v2935_v33 }
 0x383   :  { %v779_v26 = vrot.slane %v2918_v57, 1  ;;  %v786_v41 = vperm.slane %v2918_v57, 0  ;;  %2321 = vset.pattern.permute.xlu1 %v2766_v36  ;;  %2314 = vset.pattern.permute.xlu2 %v2759_v34  ;;  %v780_v51 = vrot.slane %v2918_v57, 2  ;;  %v2942_v6 = vmul.f32 %v2918_v57, %v2935_v33 }
 0x384   :  { %v781_v32 = vrot.slane %v2918_v57, 3  ;;  %vm80_vm13 = vcmp.ge.s32.totalorder %v2948_v24, 64  ;;  %v2265_v24 = vld [vmem:[%s3740_s4 + $0x20] sm:$0xff] }
 0x385   :  { %v787_v30 = vperm.slane %v779_v26, 0  ;;  %v802_v28 = vmul.f32 %v786_v41, %v2920_v5  ;;  %v803_v35 = vmul.f32 %v786_v41, %v2924_v4  ;;  %v788_v26 = vperm.slane %v780_v51, 0 }
 0x386   :  { %v859_v41 = vperm.slane %v2942_v6, 0  ;;  %v852_v51 = vrot.slane %v2942_v6, 1 }
 0x387   :  { %v804_v2 = vmul.f32 %v787_v30, %v2920_v5  ;;  %v818_v23 = vmul.f32 1.442695, %v802_v28  ;;  %v820_v42 = vmul.f32 1.442695, %v803_v35  ;;  %v805_v20 = vmul.f32 %v787_v30, %v2924_v4 }
 0x388   :  { %v782_v28 = vrot.slane %v2918_v57, 4  ;;  %v789_v30 = vperm.slane %v781_v32, 0  ;;  %v806_v33 = vmul.f32 %v788_v26, %v2920_v5  ;;  %v555_v32 = vsel %vm80_vm13, %v462_v49, %v2792_v43 }
 0x389   :  { %2387 = vpow2.f32 %v818_v23  ;;  %v822_v7 = vmul.f32 1.442695, %v804_v2  ;;  %v824_v35 = vmul.f32 1.442695, %v805_v20  ;;  %v475_v2 = vpop.permute.xlu2 %474  ;;  %v554_v23 = vsel %vm80_vm13, %v456_v25, %v2830_v55 }
 0x38a   :  { %2389 = vpow2.f32 %v820_v42  ;;  %v826_v42 = vmul.f32 1.442695, %v806_v33  ;;  %v853_v20 = vrot.slane %v2942_v6, 2  ;;  %v875_v53 = vmul.f32 %v859_v41, %v554_v23 }
 0x38b   :  { %760 = vperm.xlu1 %2321, %v2784_v40   ;;  %694 = vperm.xlu2 %2314, %v2798_v46   ;;  %2391 = vpow2.f32 %v822_v7  ;;  %v808_v46 = vmul.f32 %v789_v30, %v2920_v5  ;;  %v807_v7 = vmul.f32 %v788_v26, %v2924_v4  ;;  %v860_v17 = vperm.slane %v852_v51, 0 }
 0x38c   :  { %2393 = vpow2.f32 %v824_v35  ;;  %v790_v9 = vperm.slane %v782_v28, 0  ;;  %v876_v25 = vmul.f32 %v859_v41, %v555_v32  ;;  %v858_v23 = vrot.slane %v2942_v6, 7 }
 0x38d   :  { %2395 = vpow2.f32 %v826_v42  ;;  %v830_v33 = vmul.f32 1.442695, %v808_v46  ;;  %v556_v43 = vsel %vm80_vm13, %v2914_v27, %v2861_v10  ;;  %v861_v41 = vperm.slane %v853_v20, 0  ;;  %v2982_v28 = vpop.permute.xlu1 %526 }
 0x38e   :  { %v877_v26 = vmul.f32 %v860_v17, %v556_v43  ;;  %v866_v51 = vperm.slane %v858_v23, 0  ;;  %v557_v20 = vsel %vm80_vm13, %v475_v2, %v2796_v45  ;;  %v2999_v23 = vpop.permute.xlu0 %688  ;;  %v855_v43 = vrot.slane %v2942_v6, 4 }
 0x38f   :  { %v2388_v44 = vpop.eup %2387  ;;  %2397 = vpow2.f32 %v830_v33 }
 0x390   :  { %v2390_v13 = vpop.eup %2389  ;;  %v891_v19 = vmul.f32 0.0, %v2388_v44  ;;  %v828_v44 = vmul.f32 1.442695, %v807_v7 }
 0x391   :  { %v892_v55 = vmul.f32 0.0, %v2390_v13  ;;  %v2392_v11 = vpop.eup %2391 }
 0x392   :  { %v2968_v3 = vadd.f32 %v891_v19, %v875_v53  ;;  %v854_v53 = vrot.slane %v2942_v6, 3  ;;  %v810_v19 = vmul.f32 %v790_v9, %v2920_v5  ;;  %v2394_v10 = vpop.eup %2393  ;;  %2399 = vpow2.f32 %v828_v44 }
 0x393   :  { %v2975_v49 = vadd.f32 %v892_v55, %v876_v25  ;;  %706 = vperm.xlu2 %2314, %v2775_v38   ;;  %2324 = vset.pattern.permute.xlu1 %v2665_v59  ;;  %v2396_v46 = vpop.eup %2395  ;;  %v809_v25 = vmul.f32 %v789_v30, %v2924_v4  ;;  %v560_v30 = vsel %vm80_vm13, %v2916_v31, %v2803_v47 }
 0x394   :  { %v905_v13 = vmul.f32 %v2392_v11, %v2968_v3  ;;  %v783_v11 = vrot.slane %v2918_v57, 5  ;;  %v834_v7 = vmul.f32 1.442695, %v810_v19  ;;  %v862_v33 = vperm.slane %v854_v53, 0 }
 0x395   :  { %v482_v35 = vpop.permute.xlu2 %481  ;;  %v906_v42 = vmul.f32 %v2394_v10, %v2975_v49  ;;  %v2398_v44 = vpop.eup %2397  ;;  %v832_v19 = vmul.f32 1.442695, %v809_v25 }
 0x396   :  { %v2984_v27 = vadd.f32 %v905_v13, %v877_v26  ;;  %v558_v38 = vsel %vm80_vm13, %v482_v35, %v2838_v62  ;;  %v569_v62 = vsel %vm80_vm13, %v553_v29, %v2832_v56  ;;  %v878_v13 = vmul.f32 %v860_v17, %v557_v20 }
 0x397   :  { %v879_v32 = vmul.f32 %v861_v41, %v558_v38  ;;  %v785_v26 = vrot.slane %v2918_v57, 7  ;;  %2401 = vpow2.f32 %v834_v7  ;;  %v3005_v2 = vmul.f32 %v866_v51, %v569_v62  ;;  %v719_v62 = vpop.permute.xlu0 %718 }
 0x398   :  { %v919_v55 = vmul.f32 %v2396_v46, %v2984_v27  ;;  %v3011_v53 = vadd.f32 %v906_v42, %v878_v13  ;;  %v811_v56 = vmul.f32 %v790_v9, %v2924_v4  ;;  %v881_v35 = vmul.f32 %v862_v33, %v560_v30  ;;  %v2400_v31 = vpop.eup %2399 }
 0x399   :  { %v793_v17 = vperm.slane %v785_v26, 0  ;;  %v791_v10 = vperm.slane %v783_v11, 0  ;;  %v863_v38 = vperm.slane %v855_v43, 0  ;;  %v559_v9 = vsel %vm80_vm13, %v2929_v58, %v2868_v15 }
 0x39a   :  { %v3003_v45 = vadd.f32 %v919_v55, %v879_v32  ;;  %v920_v32 = vmul.f32 %v2400_v31, %v3011_v53  ;;  %v562_v11 = vsel %vm80_vm13, %v2957_v12, %v2847_v1  ;;  %2403 = vpow2.f32 %v832_v19 }
 0x39b   :  { %2317 = vset.pattern.permute.xlu2 %v2766_v36  ;;  %v3019_v20 = vmul.f32 %v793_v17, %v2924_v4  ;;  %v816_v47 = vmul.f32 %v793_v17, %v2920_v5  ;;  %v836_v55 = vmul.f32 1.442695, %v811_v56  ;;  %v813_v25 = vmul.f32 %v791_v10, %v2924_v4 }
 0x39c   :  { %v933_v29 = vmul.f32 %v2398_v44, %v3003_v45  ;;  %v880_v43 = vmul.f32 %v861_v41, %v559_v9  ;;  %v883_v13 = vmul.f32 %v863_v38, %v562_v11  ;;  %v770_v44 = vsel %vm80_vm13, %v719_v62, %v2886_v22 }
 0x39d   :  { %v3016_v46 = vpop.permute.xlu1 %533  ;;  %v2402_v7 = vpop.eup %2401  ;;  %2405 = vpow2.f32 %v836_v55  ;;  %v784_v1 = vrot.slane %v2918_v57, 6  ;;  %v840_v12 = vmul.f32 1.442695, %v813_v25  ;;  %v812_v57 = vmul.f32 %v791_v10, %v2920_v5 }
 0x39e   :  { %v3022_v42 = vadd.f32 %v933_v29, %v881_v35  ;;  %v3036_v58 = vadd.f32 %v920_v32, %v880_v43  ;;  %v856_v9 = vrot.slane %v2942_v6, 5 }
 0x39f   :  { %v792_v31 = vperm.slane %v784_v1, 0  ;;  %2407 = vpow2.f32 %v840_v12  ;;  %v566_v12 = vsel %vm80_vm13, %v3016_v46, %v2876_v18 }
 0x3a0   :  { %v947_v26 = vmul.f32 %v2402_v7, %v3022_v42  ;;  %v2404_v41 = vpop.eup %2403  ;;  %v864_v55 = vperm.slane %v856_v9, 0 }
 0x3a1   :  { %v934_v22 = vmul.f32 %v2404_v41, %v3036_v58  ;;  %v814_v10 = vmul.f32 %v792_v31, %v2920_v5 }
 0x3a2   :  { %v949_v15 = vadd.f32 %v947_v26, %v883_v13 }
 0x3a3   :  { %724 = vperm.xlu2 %2317, %v2781_v39   ;;  %v2406_v7 = vpop.eup %2405 }
 0x3a4   :  { %v3042_v17 = vmul.f32 %v949_v15, %v770_v44 }
 0x3a5   :  { %v547_v30 = vpop.permute.xlu1 %546  ;;  %v501_v56 = vpop.permute.xlu2 %500 }
 0x3a6   :  { %v568_v39 = vsel %vm80_vm13, %v547_v30, %v2884_v21  ;;  %v561_v29 = vsel %vm80_vm13, %v501_v56, %v2841_v63  ;;  %v563_v21 = vsel %vm80_vm13, %v2938_v14, %v2807_v48  ;;  %v2408_v62 = vpop.eup %2407  ;;  %v842_v48 = vmul.f32 1.442695, %v814_v10 }
 0x3a7   :  { %v889_v19 = vmul.f32 %v866_v51, %v568_v39  ;;  %v882_v35 = vmul.f32 %v862_v33, %v561_v29  ;;  %v884_v11 = vmul.f32 %v863_v38, %v563_v21  ;;  %v565_v51 = vsel %vm80_vm13, %v2982_v28, %v2855_v8 }
 0x3a8   :  { %v838_v33 = vmul.f32 1.442695, %v812_v57  ;;  %v886_v43 = vmul.f32 %v864_v55, %v565_v51  ;;  %v857_v8 = vrot.slane %v2942_v6, 6  ;;  %v815_v30 = vmul.f32 %v792_v31, %v2924_v4 }
 0x3a9   :  { %v3053_v32 = vadd.f32 %v934_v22, %v882_v35  ;;  %v765_v4 = vsel %vm80_vm13, %v2999_v23, %v2870_v16  ;;  %v848_v31 = vmul.f32 1.442695, %v3019_v20 }
 0x3aa   :  { %2409 = vpow2.f32 %v838_v33 }
 0x3ab   :  { %v948_v63 = vmul.f32 %v2406_v7, %v3053_v32  ;;  %736 = vperm.xlu2 %2317, %v2826_v54   ;;  %2411 = vpow2.f32 %v842_v48  ;;  %v846_v54 = vmul.f32 1.442695, %v816_v47  ;;  %v865_v47 = vperm.slane %v857_v8, 0  ;;  %v3789_v8 = vld [vmem:[#allocation22_spill] sm:$0xff] }
 0x3ad   :  { %v3066_v25 = vadd.f32 %v948_v63, %v884_v11  ;;  %2413 = vpow2.f32 %v846_v54  ;;  %v887_v41 = vmul.f32 %v865_v47, %v566_v12 }
 0x3af   :  { %v962_v14 = vmul.f32 %v2408_v62, %v3066_v25 }
 0x3b0   :  { %v2410_v5 = vpop.eup %2409 }
 0x3b1   :  { %v3069_v38 = vadd.f32 %v962_v14, %v886_v43  ;;  %v961_v1 = vmul.f32 %v2410_v5, %v949_v15  ;;  %v2412_v6 = vpop.eup %2411 }
 0x3b3   :  { %2320 = vset.pattern.permute.xlu2 %v2759_v34  ;;  %v2414_v22 = vpop.eup %2413 }
 0x3b5   :  { %v671_v28 = vpop.permute.xlu1 %670  ;;  %v521_v13 = vpop.permute.xlu2 %520 }
 0x3b6   :  { %v564_v26 = vsel %vm80_vm13, %v521_v13, %v2815_v50  ;;  %v844_v50 = vmul.f32 1.442695, %v815_v30  ;;  %v762_v48 = vsel %vm80_vm13, %v671_v28, %v2836_v61 }
 0x3b7   :  { %v885_v44 = vmul.f32 %v864_v55, %v564_v26 }
 0x3b8   :  { %2415 = vpow2.f32 %v844_v50  ;;  %v3791_v50 = vld [vmem:[#allocation28_spill] sm:$0xff] }
 0x3b9   :  { %v3081_v56 = vadd.f32 %v961_v1, %v885_v44  ;;  %2417 = vpow2.f32 %v848_v31 }
 0x3bb   :  { %754 = vperm.xlu2 %2320, %v2784_v40   ;;  %v975_v39 = vmul.f32 %v2412_v6, %v3081_v56  ;;  %v910_v40 = vmul.f32 %v3011_v53, %v765_v4  ;;  %v3790_v6 = vld [vmem:[#allocation20_spill] sm:$0xff] }
 0x3bd   :  { %v683_v29 = vpop.permute.xlu1 %682  ;;  %v3085_v15 = vadd.f32 %v975_v39, %v887_v41 }
 0x3be   :  { %v764_v18 = vsel %vm80_vm13, %v683_v29, %v2843_v0  ;;  %v2416_v21 = vpop.eup %2415 }
 0x3bf   :  { %v909_v46 = vmul.f32 %v2984_v27, %v764_v18  ;;  %v989_v35 = vmul.f32 %v2414_v22, %v3085_v15  ;;  %v749_v27 = vpop.permute.xlu0 %748  ;;  %v976_v11 = vmul.f32 %v2416_v21, %v3069_v38  ;;  %v3792_v18 = vld [vmem:[#allocation21_spill] sm:$0xff] }
 0x3c0   :  { %v775_v33 = vsel %vm80_vm13, %v749_v27, %v2908_v37  ;;  %v895_v37 = vmul.f32 %v2968_v3, %v762_v48  ;;  %v3796_v48 = vld [vmem:[#allocation19_spill] sm:$0xff] }
 0x3c1   :  { %v911_v57 = vadd.f32 %v910_v40, %v909_v46  ;;  %v3098_v9 = vadd.f32 %v989_v35, %v889_v19  ;;  %v2418_v19 = vpop.eup %2417 }
 0x3c3   :  { %v912_v7 = vrot.slane %v911_v57, 4  ;;  %2323 = vset.pattern.permute.xlu2 %v2668_v60 }
 0x3c5   :  { %v913_v16 = vadd.f32 %v912_v7, %v911_v57  ;;  %v540_v23 = vpop.permute.xlu2 %539  ;;  %v3793_v57 = vld [vmem:[#allocation24_spill] sm:$0xff] }
 0x3c6   :  { %v567_v0 = vsel %vm80_vm13, %v540_v23, %v2822_v52 }
 0x3c7   :  { %v914_v53 = vrot.slane %v913_v16, 2  ;;  %v888_v63 = vmul.f32 %v865_v47, %v567_v0 }
 0x3c9   :  { %v915_v20 = vadd.f32 %v914_v53, %v913_v16  ;;  %v978_v51 = vadd.f32 %v976_v11, %v888_v63  ;;  %v3794_v16 = vld [vmem:[#allocation25_spill] sm:$0xff] }
 0x3cb   :  { %v916_v10 = vrot.slane %v915_v20, 1  ;;  %v980_v55 = vmul.f32 %v978_v51, %v775_v33  ;;  %v990_v62 = vmul.f32 %v2418_v19, %v978_v51 }
 0x3cd   :  { %v917_v43 = vadd.f32 %v916_v10, %v915_v20  ;;  %v3109_v14 = vadd.f32 %v990_v62, %v3005_v2  ;;  %v701_v52 = vpop.permute.xlu1 %700 }
 0x3ce   :  { %v767_v61 = vsel %vm80_vm13, %v701_v52, %v3790_v6  ;;  %v3795_v52 = vld [vmem:[#allocation18_spill] sm:$0xff] }
 0x3cf   :  { %918 = vst [vmem:[#allocation2 + $0x1] sm:$0x1] %v917_v43 }
 0x3d5   :  { %v677_v54 = vpop.permute.xlu2 %676  ;;  %v713_v1 = vpop.permute.xlu1 %712 }
 0x3d6   :  { %v763_v13 = vsel %vm80_vm13, %v677_v54, %v3789_v8  ;;  %v769_v46 = vsel %vm80_vm13, %v713_v1, %v3792_v18 }
 0x3d7   :  { %v896_v5 = vmul.f32 %v2975_v49, %v763_v13  ;;  %v924_v49 = vmul.f32 %v3036_v58, %v767_v61  ;;  %v938_v23 = vmul.f32 %v3053_v32, %v769_v46  ;;  %v3142_v32 = vsel %vm109_vm12, %v3796_v48, %v3795_v52 }
 0x3d9   :  { %v897_v26 = vadd.f32 %v896_v5, %v895_v37 }
 0x3db   :  { %v898_v44 = vrot.slane %v897_v26, 4 }
 0x3dd   :  { %v899_v2 = vadd.f32 %v898_v44, %v897_v26  ;;  %v3797_v26 = vld [vmem:[#allocation30_spill] sm:$0xff] }
 0x3df   :  { %v900_v12 = vrot.slane %v899_v2, 2 }
 0x3e1   :  { %v901_v30 = vadd.f32 %v900_v12, %v899_v2 }
 0x3e3   :  { %v902_v47 = vrot.slane %v901_v30, 1 }
 0x3e5   :  { %v903_v28 = vadd.f32 %v902_v47, %v901_v30  ;;  %v731_v41 = vpop.permute.xlu1 %730  ;;  %v695_v39 = vpop.permute.xlu2 %694  ;;  %v3798_v47 = vld [vmem:[#allocation23_spill] sm:$0xff] }
 0x3e6   :  { %v766_v3 = vsel %vm80_vm13, %v695_v39, %v3791_v50  ;;  %v772_v6 = vsel %vm80_vm13, %v731_v41, %v3798_v47  ;;  %v3799_v39 = vld [vmem:[#allocation29_spill] sm:$0xff] }
 0x3e7   :  { %904 = vst [vmem:[#allocation2] sm:$0x1] %v903_v28  ;;  %v923_v29 = vmul.f32 %v3003_v45, %v766_v3  ;;  %v965_v3 = vmul.f32 %v3081_v56, %v772_v6  ;;  %v2258_v56 = vld [vmem:[%s3740_s4 + $0x18] sm:$0xff] }
 0x3e8   :  { %1103 = vmatpush.bf16.msra.mxu2 %v2258_v56  ;;  %v3205_v56 = vld [vmem:[%s3742_s6 + $0x10] sm:$0xff] }
 0x3e9   :  { %v925_v22 = vadd.f32 %v924_v49, %v923_v29 }
 0x3eb   :  { %v926_v4 = vrot.slane %v925_v22, 4 }
 0x3ed   :  { %v927_v40 = vadd.f32 %v926_v4, %v925_v22  ;;  %v743_v35 = vpop.permute.xlu1 %742  ;;  %v707_v31 = vpop.permute.xlu2 %706 }
 0x3ee   :  { %v774_v7 = vsel %vm80_vm13, %v743_v35, %v3793_v57  ;;  %v768_v58 = vsel %vm80_vm13, %v707_v31, %v3794_v16  ;;  %v3800_v16 = vld [vmem:[#allocation26_spill] sm:$0xff] }
 0x3ef   :  { %v928_v45 = vrot.slane %v927_v40, 2  ;;  %v979_v21 = vmul.f32 %v3085_v15, %v774_v7  ;;  %v937_v0 = vmul.f32 %v3022_v42, %v768_v58  ;;  %v1012_v42 = vsub.f32 0.0, %v3142_v32 }
 0x3f1   :  { %v929_v27 = vadd.f32 %v928_v45, %v927_v40  ;;  %v981_v53 = vadd.f32 %v980_v55, %v979_v21  ;;  %v939_v11 = vadd.f32 %v938_v23, %v937_v0  ;;  %v1013_v1 = vmul.f32 1.442695, %v1012_v42  ;;  %v2257_v45 = vld [vmem:[%s3740_s4 + $0x10] sm:$0xff]  ;;  %v3801_v0 = vld [vmem:[#allocation31_spill] sm:$0xff] }
 0x3f2   :  { %1104 = vmatpush.bf16.msra.mxu2 %v2257_v45 }
 0x3f3   :  { %v930_v63 = vrot.slane %v929_v27, 1  ;;  %v982_v20 = vrot.slane %v981_v53, 4  ;;  %v940_v51 = vrot.slane %v939_v11, 4  ;;  %2419 = vpow2.f32 %v1013_v1 }
 0x3f5   :  { %v931_v19 = vadd.f32 %v930_v63, %v929_v27  ;;  %v983_v33 = vadd.f32 %v982_v20, %v981_v53  ;;  %v941_v10 = vadd.f32 %v940_v51, %v939_v11  ;;  %v2256_v51 = vld [vmem:[%s3740_s4 + $0x8] sm:$0xff] }
 0x3f6   :  { %1105 = vmatpush.bf16.msra.mxu2 %v2256_v51 }
 0x3f7   :  { %932 = vst [vmem:[#allocation2 + $0x2] sm:$0x1] %v931_v19  ;;  %v984_v62 = vrot.slane %v983_v33, 2  ;;  %v942_v43 = vrot.slane %v941_v10, 2 }
 0x3f9   :  { %v985_v15 = vadd.f32 %v984_v62, %v983_v33  ;;  %v943_v54 = vadd.f32 %v942_v43, %v941_v10  ;;  %v2420_v29 = vpop.eup %2419  ;;  %v2255_v62 = vld [vmem:[%s3740_s4] sm:$0xff] }
 0x3fa   :  { %v1015_v46 = vadd.f32 1.0, %v2420_v29  ;;  %1106 = vmatpush.bf16.msra.mxu2 %v2255_v62 }
 0x3fb   :  { %v986_v55 = vrot.slane %v985_v15, 1  ;;  %v944_v8 = vrot.slane %v943_v54, 1 }
 0x3fc   :  { %2421 = vrcp.f32 %v1015_v46  ;;  %vm1021_vm2 = vweird.f32 %v1015_v46  ;;  %v1025_v42 = vand.u32 2147483647, %v1015_v46 }
 0x3fd   :  { %v987_v13 = vadd.f32 %v986_v55, %v985_v15  ;;  %v945_v37 = vadd.f32 %v944_v8, %v943_v54  ;;  %v725_v5 = vpop.permute.xlu2 %724  ;;  %v761_v31 = vpop.permute.xlu1 %760  ;;  %v1027_v54 = vand.u32 2147483648, %v1015_v46  ;;  %v3802_v8 = vld [vmem:[#allocation27_spill] sm:$0xff] }
 0x3fe   :  { %v771_v44 = vsel %vm80_vm13, %v725_v5, %v3797_v26  ;;  %vm1026_vm4 = vcmp.eq.f32.partialorder %v1025_v42, 8.507059e+37  ;;  %v3803_v26 = vld [vmem:[#allocation32_spill] sm:$0xff] }
 0x3ff   :  { %988 = vst [vmem:[#allocation2 + $0x6] sm:$0x1] %v987_v13  ;;  %v952_v2 = vmul.f32 %v3066_v25, %v771_v44  ;;  %v1004_v13 = vperm.slane %v3802_v8, 4 }
 0x400   :  { %946 = vst [vmem:[#allocation2 + $0x3] sm:$0x1] %v945_v37  ;;  %v1028_v37 = vor.u32 1.1754944e-38, %v1027_v54 }
 0x401   :  { %v953_v12 = vadd.f32 %v952_v2, %v3042_v17  ;;  %v1005_v44 = vmul.f32 %v1004_v13, %v3803_v26  ;;  %v2264_v26 = vld [vmem:[%s3739_s3 + $0x38] sm:$0xff] }
 0x402   :  { %v2422_v21 = vpop.eup %2421  ;;  %1304 = vmatpush.bf16.msrb.mxu0 %v2264_v26 }
 0x403   :  { %v954_v30 = vrot.slane %v953_v12, 4  ;;  %v1017_v63 = vmul.f32 %v2422_v21, %v1015_v46  ;;  %vm1022_vm1 = vweird.f32 %v2422_v21 }
 0x404   :  { %vm1023_vm3 = vmor %vm1021_vm2, %vm1022_vm1 }
 0x405   :  { %v955_v61 = vadd.f32 %v954_v30, %v953_v12  ;;  %v737_v28 = vpop.permute.xlu2 %736  ;;  %v1018_v33 = vsub.f32 1.0, %v1017_v63 }
 0x406   :  { %v773_v50 = vsel %vm80_vm13, %v737_v28, %v3799_v39  ;;  %v3804_v28 = vld [vmem:[#allocation12_spill] sm:$0xff] }
 0x407   :  { %v956_v49 = vrot.slane %v955_v61, 2  ;;  %v966_v25 = vmul.f32 %v3069_v38, %v773_v50  ;;  %v777_v38 = vsel %vm80_vm13, %v761_v31, %v3800_v16 }
 0x408   :  { %v994_v53 = vmul.f32 %v3109_v14, %v777_v38  ;;  %v1019_v14 = vmul.f32 %v2422_v21, %v1018_v33 }
 0x409   :  { %v957_v22 = vadd.f32 %v956_v49, %v955_v61  ;;  %v967_v17 = vadd.f32 %v966_v25, %v965_v3  ;;  %v3806_v49 = vld [vmem:[#allocation13_spill] sm:$0xff] }
 0x40a   :  { %v1020_v48 = vadd.f32 %v2422_v21, %v1019_v14 }
 0x40b   :  { %v958_v4 = vrot.slane %v957_v22, 1  ;;  %v968_v18 = vrot.slane %v967_v17, 4 }
 0x40c   :  { %v1024_v55 = vsel %vm1023_vm3, %v2422_v21, %v1020_v48 }
 0x40d   :  { %v959_v40 = vadd.f32 %v958_v4, %v957_v22  ;;  %v969_v35 = vadd.f32 %v968_v18, %v967_v17  ;;  %v1029_v5 = vsel %vm1026_vm4, %v1028_v37, %v1024_v55  ;;  %v3808_v22 = vld [vmem:[#allocation14_spill] sm:$0xff]  ;;  %v1160_v55 = vperm.slane %v3205_v56, 1 }
 0x40e   :  { %v1031_v2 = vmul.f32 %v1029_v5, %v3142_v32 }
 0x40f   :  { %960 = vst [vmem:[#allocation2 + $0x4] sm:$0x1] %v959_v40  ;;  %v970_v41 = vrot.slane %v969_v35, 2 }
 0x411   :  { %v971_v57 = vadd.f32 %v970_v41, %v969_v35 }
 0x413   :  { %v972_v7 = vrot.slane %v971_v57, 1 }
 0x415   :  { %v973_v58 = vadd.f32 %v972_v7, %v971_v57  ;;  %v755_v23 = vpop.permute.xlu2 %754  ;;  %v2260_v7 = vld [vmem:[%s3738_s2 + $0x18] sm:$0xff] }
 0x416   :  { %v776_v27 = vsel %vm80_vm13, %v755_v23, %v3801_v0  ;;  %1185 = vmatpush.bf16.msra.mxu3 %v2260_v7  ;;  %v3810_v7 = vld [vmem:[#allocation16_spill] sm:$0xff] }
 0x417   :  { %974 = vst [vmem:[#allocation2 + $0x5] sm:$0x1] %v973_v58  ;;  %v993_v11 = vmul.f32 %v3098_v9, %v776_v27  ;;  %v2259_v58 = vld [vmem:[%s3738_s2 + $0x10] sm:$0xff] }
 0x419   :  { %v995_v20 = vadd.f32 %v994_v53, %v993_v11 }
 0x41a   :  { %1186 = vmatpush.bf16.msra.mxu3 %v2259_v58 }
 0x41b   :  { %v996_v19 = vrot.slane %v995_v20, 4 }
 0x41d   :  { %v997_v10 = vadd.f32 %v996_v19, %v995_v20 }
 0x41f   :  { %v998_v43 = vrot.slane %v997_v10, 2 }
 0x421   :  { %v999_v52 = vadd.f32 %v998_v43, %v997_v10 }
 0x423   :  { %v1000_v9 = vrot.slane %v999_v52, 1 }
 0x425   :  { %v1001_v15 = vadd.f32 %v1000_v9, %v999_v52  ;;  %v1157_v9 = vperm.slane %v3205_v56, 0 }
 0x427   :  { %1002 = vst [vmem:[#allocation2 + $0x7] sm:$0x1] %v1001_v15 }
 0x42e   :  { %v1003_v1 = vld [vmem:[#allocation2] sm:$0xff] }
 0x42f   :  { %v1006_v12 = vadd.f32 %v1005_v44, %v1003_v1  ;;  %v2263_v44 = vld [vmem:[%s3739_s3 + $0x30] sm:$0xff]  ;;  %v2262_v1 = vld [vmem:[%s3739_s3 + $0x28] sm:$0xff] }
 0x430   :  { %1305 = vmatpush.bf16.msrb.mxu0 %v2263_v44 }
 0x431   :  { %v1032_v30 = vmul.f32 %v1031_v2, %v1006_v12  ;;  %v2261_v2 = vld [vmem:[%s3739_s3 + $0x20] sm:$0xff] }
 0x433   :  { %1034 = vrot.lane.b32.xlu2 %v1032_v30, %s2562_s24 }
 0x434   :  { %1306 = vmatpush.bf16.msrb.mxu0 %v2262_v1 }
 0x438   :  { %1307 = vmatpush.bf16.msrb.mxu0 %v2261_v2 }
 0x48d   :  { %v1035_v47 = vpop.permute.xlu2 %1034 }
 0x48e   :  { %v1037_v6 = vpack.c.bf16 %v1035_v47, %v1032_v30  ;;  %v2368_v30 = vld [vmem:[%s3742_s6 + $0x18] ss:$0 sm:$0xff] }
 0x490   :  { %2205 = vmatmul.msk.bf16.vlgmr.msra.gmra.mxu2 %vm109_vm12, %v1037_v6  ;;  %v1196_v6 = vperm.slane %v3205_v56, 2 }
 0x513   :  { %v1108_v61 = vpop.f32.mrf.mxu2 }
 0x514   :  { %v3184_v39 = vadd.f32 %v1108_v61, %v3804_v28 }
 0x516   :  { %3805 = vst [vmem:[#allocation22_spill] sm:$0xff] %v3184_v39  ;;  %v1113_v50 = vsel %vm113_vm0, %v3184_v39, 0.0 }
 0x517   :  { %1114 = vadd.xlane.f32.xlu1 %v1113_v50 }
 0x51b   :  { %v1110_v3 = vpop.f32.mrf.mxu2 }
 0x51c   :  { %v3189_v25 = vadd.f32 %v1110_v3, %v3806_v49  ;;  %v1205_v3 = vperm.slane %v3205_v56, 7 }
 0x51e   :  { %3807 = vst [vmem:[#allocation20_spill] sm:$0xff] %v3189_v25  ;;  %v1116_v32 = vsel %vm113_vm0, %v3189_v25, 0.0 }
 0x51f   :  { %1117 = vadd.xlane.f32.xlu0 %v1116_v32 }
 0x533   :  { %1068 = vrot.lane.b32.xlu0 %v3205_v56, %s2562_s24 }
 0x58a   :  { %v1115_v29 = vpop.xlane.xlu1 %1114 }
 0x58b   :  { %v1119_v17 = vmul.f32 %v1115_v29, %v3808_v22 }
 0x58d   :  { %v1121_v4 = vsub.f32 %v3184_v39, %v1119_v17 }
 0x58f   :  { %v1123_v18 = vmul.f32 %v1121_v4, %v1121_v4 }
 0x591   :  { %v1125_v46 = vsel %vm113_vm0, %v1123_v18, 0.0  ;;  %v1216_v18 = vperm.slane %v3205_v56, 6 }
 0x592   :  { %v1118_v40 = vpop.xlane.xlu0 %1117  ;;  %1126 = vadd.xlane.f32.xlu2 %v1125_v46  ;;  %v1227_v46 = vperm.slane %v3205_v56, 5 }
 0x593   :  { %v1120_v35 = vmul.f32 %v1118_v40, %v3808_v22 }
 0x595   :  { %v1122_v41 = vsub.f32 %v3189_v25, %v1120_v35 }
 0x597   :  { %v1124_v31 = vmul.f32 %v1122_v41, %v1122_v41 }
 0x599   :  { %v1128_v57 = vsel %vm113_vm0, %v1124_v31, 0.0 }
 0x59a   :  { %1129 = vadd.xlane.f32.xlu1 %v1128_v57 }
 0x605   :  { %v1127_v16 = vpop.xlane.xlu2 %1126 }
 0x606   :  { %v1131_v38 = vmul.f32 %v1127_v16, %v3808_v22 }
 0x608   :  { %v1133_v23 = vadd.f32 1e-05, %v1131_v38 }
 0x60a   :  { %2423 = vrsqrt.f32 %v1133_v23  ;;  %vm1141_vm6 = vweird.f32 %v1133_v23 }
 0x60d   :  { %v1130_v45 = vpop.xlane.xlu1 %1129 }
 0x60e   :  { %v1132_v21 = vmul.f32 %v1130_v45, %v3808_v22 }
 0x610   :  { %v2424_v0 = vpop.eup %2423  ;;  %v1134_v27 = vadd.f32 1e-05, %v1132_v21 }
 0x611   :  { %v1136_v53 = vmul.f32 %v2424_v0, %v1133_v23  ;;  %vm1142_vm5 = vweird.f32 %v2424_v0  ;;  %v3811_v23 = vld [vmem:[#allocation17_spill] sm:$0xff] }
 0x612   :  { %2425 = vrsqrt.f32 %v1134_v27  ;;  %vm1143_vm7 = vmor %vm1141_vm6, %vm1142_vm5  ;;  %vm1151_vm2 = vweird.f32 %v1134_v27 }
 0x613   :  { %v1137_v11 = vmul.f32 %v2424_v0, %v1136_v53 }
 0x615   :  { %v1138_v63 = vmul.f32 0.5, %v1137_v11 }
 0x617   :  { %v1139_v20 = vsub.f32 1.5, %v1138_v63 }
 0x618   :  { %v2426_v51 = vpop.eup %2425 }
 0x619   :  { %v1140_v19 = vmul.f32 %v2424_v0, %v1139_v20  ;;  %v1146_v33 = vmul.f32 %v2426_v51, %v1134_v27  ;;  %vm1152_vm1 = vweird.f32 %v2426_v51 }
 0x61a   :  { %vm1153_vm3 = vmor %vm1151_vm2, %vm1152_vm1 }
 0x61b   :  { %v1147_v10 = vmul.f32 %v2426_v51, %v1146_v33  ;;  %v1144_v62 = vsel %vm1143_vm7, %v2424_v0, %v1140_v19 }
 0x61c   :  { %v1155_v52 = vmul.f32 %v1144_v62, %v1121_v4 }
 0x61d   :  { %v1148_v43 = vmul.f32 0.5, %v1147_v10 }
 0x61e   :  { %v1158_v42 = vmul.f32 %v1157_v9, %v1155_v52 }
 0x61f   :  { %v1149_v14 = vsub.f32 1.5, %v1148_v43 }
 0x620   :  { %v1161_v13 = vadd.f32 %v1160_v55, %v1158_v42 }
 0x621   :  { %v1150_v48 = vmul.f32 %v2426_v51, %v1149_v14 }
 0x623   :  { %v1154_v15 = vsel %vm1153_vm3, %v2426_v51, %v1150_v48 }
 0x624   :  { %v1156_v54 = vmul.f32 %v1154_v15, %v1122_v41 }
 0x626   :  { %v1159_v8 = vmul.f32 %v1157_v9, %v1156_v54 }
 0x628   :  { %v1162_v37 = vadd.f32 %v1160_v55, %v1159_v8 }
 0x62a   :  { %v1163_v5 = vpack.c.bf16 %v1162_v37, %v1161_v13 }
 0x62c   :  { %2214 = vmatmul.msk.bf16.vlgmr.msra.gmra.mxu3 %vm113_vm0, %v1163_v5 }
 0x6af   :  { %v1188_v12 = vpop.f32.mrf.mxu3 }
 0x6b0   :  { %1997 = vrot.lane.b32.xlu1 %v1188_v12, %s2562_s24  ;;  %v1194_v47 = vmul.f32 %v2368_v30, %v1188_v12  ;;  %v1199_v61 = vrot.slane %v1188_v12, 7  ;;  %v1210_v28 = vrot.slane %v1188_v12, 6  ;;  %v1221_v4 = vrot.slane %v1188_v12, 5 }
 0x6b2   :  { %v1197_v40 = vadd.f32 %v1196_v6, %v1194_v47 }
 0x6b7   :  { %v3234_v50 = vpop.f32.mrf.mxu3 }
 0x6b8   :  { %v1195_v49 = vmul.f32 %v2368_v30, %v3234_v50  ;;  %v1200_v32 = vrot.slane %v3234_v50, 7  ;;  %v1211_v29 = vrot.slane %v3234_v50, 6  ;;  %v1222_v17 = vrot.slane %v3234_v50, 5 }
 0x6ba   :  { %v1201_v41 = vsel %vm209_vm9, %v1199_v61, %v1200_v32  ;;  %v1202_v31 = vsel %vm209_vm9, %v1200_v32, %v1199_v61  ;;  %v1213_v57 = vsel %vm221_vm10, %v1211_v29, %v1210_v28  ;;  %v1224_v58 = vsel %vm233_vm14, %v1222_v17, %v1221_v4 }
 0x6bb   :  { %v1203_v16 = vsel %vm72_vm8, %v1202_v31, 0.0  ;;  %v1214_v38 = vsel %vm74_vm15, %v1213_v57, 0.0  ;;  %v1204_v45 = vsel %vm73_vm11, %v1201_v41, 0.0  ;;  %v1198_v21 = vadd.f32 %v1196_v6, %v1195_v49 }
 0x6bc   :  { %v1206_v0 = vmul.f32 %v1205_v3, %v1203_v16  ;;  %v1207_v27 = vmul.f32 %v1205_v3, %v1204_v45  ;;  %v1212_v53 = vsel %vm221_vm10, %v1210_v28, %v1211_v29  ;;  %vm3812_vm9 = vcmp.ge.s32.totalorder %v3811_v23, 2 }
 0x6bd   :  { %v1215_v11 = vsel %vm3812_vm9, %v1212_v53, 0.0  ;;  %v1217_v63 = vmul.f32 %v1216_v18, %v1214_v38  ;;  %v1223_v20 = vsel %vm233_vm14, %v1221_v4, %v1222_v17  ;;  %vm3813_vm8 = vcmp.ge.s32.totalorder %v3810_v7, 3 }
 0x6be   :  { %v1225_v51 = vsel %vm3813_vm8, %v1224_v58, 0.0  ;;  %v1208_v19 = vadd.f32 %v1206_v0, %v1197_v40  ;;  %v1209_v33 = vadd.f32 %v1207_v27, %v1198_v21  ;;  %v1218_v10 = vmul.f32 %v1216_v18, %v1215_v11 }
 0x6bf   :  { %vm3814_vm11 = vcmp.ge.s32.totalorder %v3811_v23, 3  ;;  %v1228_v52 = vmul.f32 %v1227_v46, %v1225_v51 }
 0x6c0   :  { %v1226_v62 = vsel %vm3814_vm11, %v1223_v20, 0.0  ;;  %v1219_v43 = vadd.f32 %v1217_v63, %v1208_v19  ;;  %v1220_v14 = vadd.f32 %v1218_v10, %v1209_v33 }
 0x6c1   :  { %v1229_v9 = vmul.f32 %v1227_v46, %v1226_v62 }
 0x6c2   :  { %v1230_v48 = vadd.f32 %v1228_v52, %v1219_v43 }
 0x6c3   :  { %v1231_v15 = vadd.f32 %v1229_v9, %v1220_v14 }
 0x6c4   :  { %v1232_v54 = vsub.f32 0.0, %v1230_v48 }
 0x6c5   :  { %v1233_v42 = vsub.f32 0.0, %v1231_v15 }
 0x6c6   :  { %v1234_v55 = vmul.f32 1.442695, %v1232_v54 }
 0x6c7   :  { %v1236_v8 = vmul.f32 1.442695, %v1233_v42 }
 0x6c8   :  { %2427 = vpow2.f32 %v1234_v55 }
 0x6c9   :  { %2429 = vpow2.f32 %v1236_v8 }
 0x6ce   :  { %v2428_v13 = vpop.eup %2427 }
 0x6cf   :  { %v2430_v37 = vpop.eup %2429  ;;  %v1238_v5 = vadd.f32 1.0, %v2428_v13  ;;  %v1069_v13 = vpop.permute.xlu0 %1068 }
 0x6d0   :  { %v1239_v26 = vadd.f32 1.0, %v2430_v37 }
 0x6d1   :  { %2431 = vrcp.f32 %v1238_v5  ;;  %v1251_v47 = vand.u32 2147483648, %v1238_v5  ;;  %v1249_v28 = vand.u32 2147483647, %v1238_v5  ;;  %vm1245_vm15 = vweird.f32 %v1238_v5 }
 0x6d2   :  { %2433 = vrcp.f32 %v1239_v26  ;;  %v1266_v3 = vand.u32 2147483648, %v1239_v26  ;;  %v1264_v32 = vand.u32 2147483647, %v1239_v26  ;;  %vm1260_vm5 = vweird.f32 %v1239_v26 }
 0x6d3   :  { %v1252_v17 = vor.u32 1.1754944e-38, %v1251_v47  ;;  %vm1250_vm6 = vcmp.eq.f32.partialorder %v1249_v28, 8.507059e+37 }
 0x6d4   :  { %v1267_v46 = vor.u32 1.1754944e-38, %v1266_v3  ;;  %vm1265_vm1 = vcmp.eq.f32.partialorder %v1264_v32, 8.507059e+37 }
 0x6d7   :  { %v2432_v44 = vpop.eup %2431 }
 0x6d8   :  { %v2434_v1 = vpop.eup %2433  ;;  %v1241_v2 = vmul.f32 %v2432_v44, %v1238_v5  ;;  %vm1246_vm10 = vweird.f32 %v2432_v44 }
 0x6d9   :  { %v1256_v12 = vmul.f32 %v2434_v1, %v1239_v26  ;;  %vm1261_vm14 = vweird.f32 %v2434_v1  ;;  %vm1247_vm4 = vmor %vm1245_vm15, %vm1246_vm10 }
 0x6da   :  { %v1242_v30 = vsub.f32 1.0, %v1241_v2  ;;  %vm1262_vm7 = vmor %vm1260_vm5, %vm1261_vm14 }
 0x6db   :  { %v1257_v6 = vsub.f32 1.0, %v1256_v12 }
 0x6dc   :  { %v1243_v61 = vmul.f32 %v2432_v44, %v1242_v30 }
 0x6dd   :  { %v1258_v49 = vmul.f32 %v2434_v1, %v1257_v6 }
 0x6de   :  { %v1244_v29 = vadd.f32 %v2432_v44, %v1243_v61 }
 0x6df   :  { %v1259_v4 = vadd.f32 %v2434_v1, %v1258_v49 }
 0x6e0   :  { %v1248_v18 = vsel %vm1247_vm4, %v2432_v44, %v1244_v29 }
 0x6e1   :  { %v1253_v40 = vsel %vm1250_vm6, %v1252_v17, %v1248_v18  ;;  %v1263_v35 = vsel %vm1262_vm7, %v2434_v1, %v1259_v4 }
 0x6e2   :  { %v1268_v41 = vsel %vm1265_vm1, %v1267_v46, %v1263_v35  ;;  %v3267_v31 = vmul.f32 %v1253_v40, %v1230_v48  ;;  %v3427_v46 = vsel %vm109_vm12, %v3205_v56, %v1069_v13 }
 0x6e3   :  { %v1271_v57 = vmul.f32 %v1268_v41, %v1231_v15  ;;  %3819 = vst [vmem:[#allocation18_spill] sm:$0xff] %v3427_v46  ;;  %v1324_v40 = vperm.slane %v3427_v46, 3 }
 0x6e5   :  { %1315 = vrot.lane.b32.xlu1 %v1271_v57, %s2562_s24  ;;  %v1272_v7 = vpack.c.bf16 %v1271_v57, %v3267_v31 }
 0x6e7   :  { %2231 = vmatmul.msk.bf16.vlgmr.msrb.gmra.mxu0 %vm109_vm12, %v1272_v7 }
 0x722   :  { %v3343_v52 = vpop.permute.xlu1 %1997 }
 0x757   :  { %v3353_v15 = vpop.permute.xlu1 %1315 }
 0x764   :  { %v3272_v16 = vpop.f32.mrf.mxu0 }
 0x765   :  { %v1348_v38 = vperm.slane %v3272_v16, 1  ;;  %v1335_v58 = vperm.slane %v3272_v16, 0  ;;  %v1361_v23 = vperm.slane %v3272_v16, 2  ;;  %v1374_v45 = vperm.slane %v3272_v16, 3 }
 0x766   :  { %v1387_v21 = vperm.slane %v3272_v16, 4  ;;  %v1400_v0 = vperm.slane %v3272_v16, 5  ;;  %v1413_v27 = vperm.slane %v3272_v16, 6  ;;  %v1426_v53 = vperm.slane %v3272_v16, 7 }
 0x767   :  { %1353 = vperm.xlu1 %2324, %v1348_v38   ;;  %1346 = vperm.xlu2 %2323, %v1335_v58  }
 0x768   :  { %1340 = vperm.xlu0 %2322, %v1335_v58  }
 0x76c   :  { %v3295_v11 = vpop.f32.mrf.mxu0 }
 0x76d   :  { %v3298_v63 = vperm.slane %v3295_v11, 0  ;;  %v3305_v20 = vperm.slane %v3295_v11, 1  ;;  %v3311_v51 = vperm.slane %v3295_v11, 5  ;;  %v3317_v19 = vperm.slane %v3295_v11, 6 }
 0x76e   :  { %v3324_v10 = vperm.slane %v3295_v11, 7  ;;  %v3348_v48 = vperm.slane %v3295_v11, 3  ;;  %v3358_v42 = vperm.slane %v3295_v11, 2  ;;  %v3389_v30 = vperm.slane %v3295_v11, 4 }
 0x76f   :  { %1366 = vperm.xlu1 %2324, %v1361_v23   ;;  %1359 = vperm.xlu2 %2323, %v1348_v38  }
 0x770   :  { %1379 = vperm.xlu0 %2322, %v1374_v45  }
 0x777   :  { %2325 = vset.pattern.permute.xlu1 %v2668_v60  ;;  %1372 = vperm.xlu2 %2323, %v1361_v23  }
 0x778   :  { %2327 = vset.pattern.permute.xlu0 %v2668_v60 }
 0x77f   :  { %1385 = vperm.xlu1 %2325, %v1374_v45   ;;  %2326 = vset.pattern.permute.xlu2 %v2665_v59 }
 0x780   :  { %1398 = vperm.xlu0 %2327, %v1387_v21  }
 0x787   :  { %2328 = vset.pattern.permute.xlu1 %v2665_v59  ;;  %1392 = vperm.xlu2 %2326, %v1387_v21  }
 0x788   :  { %2334 = vset.pattern.permute.xlu0 %v2759_v34 }
 0x78f   :  { %1405 = vperm.xlu1 %2328, %v1400_v0   ;;  %2329 = vset.pattern.permute.xlu2 %v2668_v60 }
 0x790   :  { %1575 = vperm.xlu0 %2334, %v1348_v38  }
 0x797   :  { %2331 = vset.pattern.permute.xlu1 %v2668_v60  ;;  %1411 = vperm.xlu2 %2329, %v1400_v0  }
 0x798   :  { %2337 = vset.pattern.permute.xlu0 %v2766_v36 }
 0x79f   :  { %1424 = vperm.xlu1 %2331, %v1413_v27   ;;  %2330 = vset.pattern.permute.xlu2 %v2665_v59 }
 0x7a0   :  { %1605 = vperm.xlu0 %2337, %v1374_v45  }
 0x7a7   :  { %1437 = vperm.xlu1 %2331, %v1426_v53   ;;  %1418 = vperm.xlu2 %2330, %v1413_v27  }
 0x7a8   :  { %2340 = vset.pattern.permute.xlu0 %v2759_v34 }
 0x7af   :  { %2332 = vset.pattern.permute.xlu1 %v2759_v34  ;;  %1431 = vperm.xlu2 %2330, %v1426_v53  }
 0x7b0   :  { %1635 = vperm.xlu0 %2340, %v1413_v27  }
 0x7b7   :  { %1563 = vperm.xlu1 %2332, %v1335_v58   ;;  %2333 = vset.pattern.permute.xlu2 %v2766_v36 }
 0x7b8   :  { %2343 = vset.pattern.permute.xlu0 %v2665_v59 }
 0x7bf   :  { %2335 = vset.pattern.permute.xlu1 %v2766_v36  ;;  %1569 = vperm.xlu2 %2333, %v1335_v58  }
 0x7c0   :  { %1444 = vperm.xlu0 %2343, %v3298_v63  }
 0x7c1   :  { %v3319_v33 = vpop.permute.xlu2 %1346 }
 0x7c7   :  { %1581 = vperm.xlu1 %2335, %v1348_v38   ;;  %2336 = vset.pattern.permute.xlu2 %v2759_v34 }
 0x7c8   :  { %2346 = vset.pattern.permute.xlu0 %v2668_v60 }
 0x7c9   :  { %v3328_v62 = vpop.permute.xlu2 %1359 }
 0x7cf   :  { %1593 = vperm.xlu1 %2335, %v1361_v23   ;;  %1587 = vperm.xlu2 %2336, %v1361_v23  }
 0x7d0   :  { %1463 = vperm.xlu0 %2346, %v3305_v20  }
 0x7d1   :  { %v3331_v43 = vpop.permute.xlu2 %1372 }
 0x7d7   :  { %2338 = vset.pattern.permute.xlu1 %v2759_v34  ;;  %1599 = vperm.xlu2 %2336, %v1374_v45  }
 0x7d8   :  { %2353 = vset.pattern.permute.xlu0 %v2665_v59 }
 0x7d9   :  { %v3363_v55 = vpop.permute.xlu1 %1353 }
 0x7da   :  { %v3374_v26 = vpop.permute.xlu0 %1340 }
 0x7df   :  { %1611 = vperm.xlu1 %2338, %v1387_v21   ;;  %2339 = vset.pattern.permute.xlu2 %v2766_v36 }
 0x7e0   :  { %1509 = vperm.xlu0 %2353, %v3311_v51  }
 0x7e1   :  { %v3338_v14 = vpop.permute.xlu2 %1392  ;;  %v3370_v37 = vpop.permute.xlu1 %1366 }
 0x7e2   :  { %v3383_v2 = vpop.permute.xlu0 %1379 }
 0x7e7   :  { %1623 = vperm.xlu1 %2338, %v1400_v0   ;;  %1617 = vperm.xlu2 %2339, %v1387_v21  }
 0x7e8   :  { %2356 = vset.pattern.permute.xlu0 %v2668_v60 }
 0x7ef   :  { %2341 = vset.pattern.permute.xlu1 %v2766_v36  ;;  %1629 = vperm.xlu2 %2339, %v1400_v0  }
 0x7f0   :  { %1528 = vperm.xlu0 %2356, %v3317_v19  }
 0x7f1   :  { %v3345_v9 = vpop.permute.xlu2 %1411  ;;  %v3378_v44 = vpop.permute.xlu1 %1385 }
 0x7f2   :  { %v3394_v6 = vpop.permute.xlu0 %1398 }
 0x7f7   :  { %1641 = vperm.xlu1 %2341, %v1413_v27   ;;  %2342 = vset.pattern.permute.xlu2 %v2759_v34 }
 0x7f8   :  { %1541 = vperm.xlu0 %2356, %v3324_v10  }
 0x7ff   :  { %1653 = vperm.xlu1 %2341, %v1426_v53   ;;  %1647 = vperm.xlu2 %2342, %v1426_v53  }
 0x800   :  { %2358 = vset.pattern.permute.xlu0 %v2766_v36 }
 0x801   :  { %v3355_v54 = vpop.permute.xlu2 %1418  ;;  %v3386_v12 = vpop.permute.xlu1 %1405 }
 0x802   :  { %v3402_v3 = vpop.permute.xlu0 %1575 }
 0x807   :  { %2344 = vset.pattern.permute.xlu1 %v2668_v60  ;;  %2345 = vset.pattern.permute.xlu2 %v2665_v59 }
 0x808   :  { %1320 = vrot.lane.b32.xlu2 %v3295_v11, %s2562_s24  ;;  %1665 = vperm.xlu0 %2358, %v3298_v63  }
 0x809   :  { %v3365_v8 = vpop.permute.xlu2 %1431 }
 0x80f   :  { %1450 = vperm.xlu1 %2344, %v3298_v63  }
 0x810   :  { %1457 = vperm.xlu2 %2345, %v3305_v20   ;;  %2361 = vset.pattern.permute.xlu0 %v2759_v34 }
 0x811   :  { %v3397_v61 = vpop.permute.xlu1 %1424 }
 0x812   :  { %v3406_v32 = vpop.permute.xlu0 %1605 }
 0x817   :  { %2347 = vset.pattern.permute.xlu1 %v2665_v59 }
 0x818   :  { %2348 = vset.pattern.permute.xlu2 %v2668_v60  ;;  %1695 = vperm.xlu0 %2361, %v3348_v48  }
 0x819   :  { %v3372_v5 = vpop.permute.xlu2 %1569  ;;  %v1438_v49 = vpop.permute.xlu1 %1437 }
 0x81f   :  { %1470 = vperm.xlu1 %2347, %v3358_v42  }
 0x820   :  { %1476 = vperm.xlu2 %2348, %v3358_v42   ;;  %2364 = vset.pattern.permute.xlu0 %v2766_v36 }
 0x822   :  { %v3414_v4 = vpop.permute.xlu0 %1635 }
 0x823   :  { %3817 = vst [vmem:[#allocation24_spill] sm:$0xff] %v3414_v4 }
 0x827   :  { %2350 = vset.pattern.permute.xlu1 %v2668_v60 }
 0x828   :  { %2349 = vset.pattern.permute.xlu2 %v2665_v59  ;;  %1725 = vperm.xlu0 %2364, %v3311_v51  }
 0x829   :  { %v3380_v1 = vpop.permute.xlu2 %1587  ;;  %v3411_v17 = vpop.permute.xlu1 %1563 }
 0x82f   :  { %1489 = vperm.xlu1 %2350, %v3348_v48  }
 0x830   :  { %1483 = vperm.xlu2 %2349, %v3348_v48  }
 0x831   :  { %v3391_v47 = vpop.permute.xlu2 %1599 }
 0x832   :  { %v3422_v18 = vpop.permute.xlu0 %1444 }
 0x837   :  { %2351 = vset.pattern.permute.xlu1 %v2665_v59 }
 0x838   :  { %2352 = vset.pattern.permute.xlu2 %v2668_v60 }
 0x83f   :  { %1496 = vperm.xlu1 %2351, %v3389_v30  }
 0x840   :  { %1502 = vperm.xlu2 %2352, %v3389_v30  }
 0x841   :  { %v3399_v28 = vpop.permute.xlu2 %1617 }
 0x842   :  { %3815 = vst [vmem:[#allocation28_spill] sm:$0xff] %v3399_v28  ;;  %v3433_v38 = vpop.permute.xlu0 %1463 }
 0x847   :  { %2354 = vset.pattern.permute.xlu1 %v2668_v60 }
 0x848   :  { %2355 = vset.pattern.permute.xlu2 %v2665_v59  ;;  %v3419_v59 = vpop.permute.xlu1 %1581 }
 0x849   :  { %v3409_v29 = vpop.permute.xlu2 %1629 }
 0x84a   :  { %3816 = vst [vmem:[#allocation21_spill] sm:$0xff] %v3409_v29 }
 0x84f   :  { %1515 = vperm.xlu1 %2354, %v3311_v51  }
 0x850   :  { %1522 = vperm.xlu2 %2355, %v3317_v19   ;;  %v3436_v23 = vpop.permute.xlu1 %1593 }
 0x852   :  { %v3439_v56 = vpop.permute.xlu0 %1509 }
 0x857   :  { %2359 = vset.pattern.permute.xlu1 %v2759_v34 }
 0x858   :  { %1535 = vperm.xlu2 %2355, %v3324_v10  }
 0x859   :  { %v3417_v60 = vpop.permute.xlu2 %1647 }
 0x85a   :  { %3818 = vst [vmem:[#allocation25_spill] sm:$0xff] %v3417_v60 }
 0x85f   :  { %1671 = vperm.xlu1 %2359, %v3305_v20  }
 0x860   :  { %2357 = vset.pattern.permute.xlu2 %v2759_v34 }
 0x862   :  { %v1321_v35 = vpop.permute.xlu2 %1320  ;;  %v3445_v27 = vpop.permute.xlu0 %1528 }
 0x863   :  { %v1323_v41 = vsel %vm109_vm12, %v3272_v16, %v1321_v35  ;;  %v3442_v16 = vpop.permute.xlu1 %1611  ;;  %v3455_v35 = vsel %vm109_vm12, %v3267_v31, %v3353_v15 }
 0x864   :  { %v1325_v57 = vadd.f32 %v1324_v40, %v1323_v41  ;;  %3821 = vst [vmem:[#allocation30_spill] sm:$0xff] %v3455_v35 }
 0x866   :  { %v1327_v7 = vand.u32 2147483647, %v1325_v57 }
 0x867   :  { %1683 = vperm.xlu1 %2359, %v3358_v42  }
 0x868   :  { %v1328_v58 = vsub.f32 0.0, %v1327_v7  ;;  %1659 = vperm.xlu2 %2357, %v3298_v63   ;;  %v1326_v63 = vmax.f32 %v1325_v57, 0.0 }
 0x86a   :  { %v1329_v45 = vmul.f32 1.442695, %v1328_v58  ;;  %v1542_v41 = vpop.permute.xlu0 %1541 }
 0x86b   :  { %v3448_v11 = vpop.permute.xlu1 %1623  ;;  %v1558_v58 = vsel %vm80_vm13, %v1542_v41, %v1438_v49 }
 0x86c   :  { %2435 = vpow2.f32 %v1329_v45  ;;  %3820 = vst [vmem:[#allocation19_spill] sm:$0xff] %v3448_v11 }
 0x86f   :  { %2362 = vset.pattern.permute.xlu1 %v2766_v36 }
 0x870   :  { %2360 = vset.pattern.permute.xlu2 %v2766_v36 }
 0x872   :  { %v2436_v21 = vpop.eup %2435 }
 0x873   :  { %v1331_v0 = vadd.f32 1.0, %v2436_v21  ;;  %v3464_v57 = vpop.permute.xlu1 %1641  ;;  %v3475_v21 = vld [vmem:[#allocation6 + $0x10] sm:$0xff] }
 0x874   :  { %3822 = vst [vmem:[#allocation23_spill] sm:$0xff] %v3464_v57 }
 0x875   :  { %2437 = vlog2.f32 %v1331_v0 }
 0x877   :  { %1701 = vperm.xlu1 %2362, %v3348_v48  }
 0x878   :  { %1677 = vperm.xlu2 %2360, %v3305_v20  }
 0x87b   :  { %v2438_v53 = vpop.eup %2437  ;;  %v3484_v41 = vpop.permute.xlu1 %1653 }
 0x87c   :  { %v1333_v13 = vmul.f32 0.6931472, %v2438_v53  ;;  %3823 = vst [vmem:[#allocation29_spill] sm:$0xff] %v3484_v41 }
 0x87e   :  { %v3450_v40 = vadd.f32 %v1333_v13, %v1326_v63  ;;  %v1458_v63 = vpop.permute.xlu2 %1457 }
 0x87f   :  { %1713 = vperm.xlu1 %2362, %v3389_v30  }
 0x880   :  { %v3460_v48 = vmul.f32 %v3450_v40, %v3455_v35  ;;  %1689 = vperm.xlu2 %2360, %v3358_v42   ;;  %v1768_v31 = vrot.slane %v3450_v40, 1  ;;  %v1775_v15 = vperm.slane %v3450_v40, 0  ;;  %v3478_v42 = vld [vmem:[#allocation6 + $0x18] sm:$0xff] }
 0x882   :  { %v1847_v20 = vrot.slane %v3460_v48, 7  ;;  %v1776_v0 = vperm.slane %v1768_v31, 0  ;;  %v1791_v53 = vmul.f32 %v1775_v15, %v3475_v21  ;;  %v1792_v49 = vmul.f32 %v1775_v15, %v3478_v42 }
 0x883   :  { %v1848_v25 = vperm.slane %v3460_v48, 0 }
 0x884   :  { %v3466_v7 = vperm.slane %v1847_v20, 0  ;;  %v1807_v13 = vmul.f32 1.442695, %v1791_v53  ;;  %v1769_v20 = vrot.slane %v3450_v40, 2  ;;  %v1809_v22 = vmul.f32 1.442695, %v1792_v49 }
 0x885   :  { %v1543_v53 = vsel %vm80_vm13, %v3422_v18, %v3374_v26  ;;  %v1794_v41 = vmul.f32 %v1776_v0, %v3478_v42 }
 0x886   :  { %v3473_v45 = vmul.f32 %v3466_v7, %v1558_v58  ;;  %2439 = vpow2.f32 %v1807_v13  ;;  %v1793_v58 = vmul.f32 %v1776_v0, %v3475_v21  ;;  %v3490_v39 = vpop.permute.xlu2 %1476  ;;  %v1770_v13 = vrot.slane %v3450_v40, 3 }
 0x887   :  { %2365 = vset.pattern.permute.xlu1 %v2759_v34  ;;  %2441 = vpow2.f32 %v1809_v22  ;;  %v1864_v46 = vmul.f32 %v1848_v25, %v1543_v53  ;;  %v1813_v11 = vmul.f32 1.442695, %v1794_v41 }
 0x888   :  { %2363 = vset.pattern.permute.xlu2 %v2759_v34  ;;  %v1777_v34 = vperm.slane %v1769_v20, 0  ;;  %v1811_v31 = vmul.f32 1.442695, %v1793_v58  ;;  %v1841_v20 = vrot.slane %v3460_v48, 1  ;;  %v1451_v58 = vpop.permute.xlu1 %1450  ;;  %v1778_v22 = vperm.slane %v1770_v13, 0 }
 0x88a   :  { %2443 = vpow2.f32 %v1811_v31  ;;  %v1795_v35 = vmul.f32 %v1777_v34, %v3475_v21  ;;  %v1849_v4 = vperm.slane %v1841_v20, 0  ;;  %v1796_v28 = vmul.f32 %v1777_v34, %v3478_v42 }
 0x88c   :  { %v2440_v15 = vpop.eup %2439  ;;  %v1815_v26 = vmul.f32 1.442695, %v1795_v35  ;;  %v1771_v35 = vrot.slane %v3450_v40, 4  ;;  %v1817_v34 = vmul.f32 1.442695, %v1796_v28 }
 0x88d   :  { %v1880_v49 = vmul.f32 0.0, %v2440_v15  ;;  %v2442_v15 = vpop.eup %2441 }
 0x88e   :  { %v1484_v0 = vpop.permute.xlu2 %1483  ;;  %2445 = vpow2.f32 %v1815_v26  ;;  %v1881_v41 = vmul.f32 0.0, %v2442_v15  ;;  %v1772_v26 = vrot.slane %v3450_v40, 5 }
 0x88f   :  { %1731 = vperm.xlu1 %2365, %v3317_v19   ;;  %v3502_v57 = vadd.f32 %v1880_v49, %v1864_v46  ;;  %v1545_v46 = vsel %vm80_vm13, %v1458_v63, %v3363_v55  ;;  %2447 = vpow2.f32 %v1813_v11 }
 0x890   :  { %1707 = vperm.xlu2 %2363, %v3389_v30   ;;  %v1774_v30 = vrot.slane %v3450_v40, 7  ;;  %v2444_v53 = vpop.eup %2443  ;;  %v1866_v13 = vmul.f32 %v1849_v4, %v1545_v46 }
 0x891   :  { %v1894_v49 = vmul.f32 %v2444_v53, %v3502_v57  ;;  %v1471_v20 = vpop.permute.xlu1 %1470 }
 0x892   :  { %v1782_v60 = vperm.slane %v1774_v30, 0  ;;  %v1842_v30 = vrot.slane %v3460_v48, 2 }
 0x893   :  { %v3522_v63 = vadd.f32 %v1894_v49, %v1866_v13  ;;  %v1780_v13 = vperm.slane %v1772_v26, 0 }
 0x894   :  { %v3506_v18 = vmul.f32 %v1782_v60, %v3478_v42  ;;  %v3509_v31 = vmul.f32 %v1782_v60, %v3475_v21  ;;  %v1797_v60 = vmul.f32 %v1778_v22, %v3475_v21  ;;  %v1850_v46 = vperm.slane %v1842_v30, 0  ;;  %v2446_v15 = vpop.eup %2445 }
 0x895   :  { %v1908_v49 = vmul.f32 %v2446_v15, %v3522_v63  ;;  %v1798_v30 = vmul.f32 %v1778_v22, %v3478_v42 }
 0x896   :  { %v1819_v53 = vmul.f32 1.442695, %v1797_v60  ;;  %v1546_v60 = vsel %vm80_vm13, %v3433_v38, %v3328_v62  ;;  %v1549_v62 = vsel %vm80_vm13, %v1484_v0, %v3383_v2  ;;  %v1548_v2 = vsel %vm80_vm13, %v3490_v39, %v3331_v43 }
 0x897   :  { %1743 = vperm.xlu1 %2365, %v3324_v10   ;;  %v1867_v28 = vmul.f32 %v1849_v4, %v1546_v60  ;;  %v1821_v38 = vmul.f32 1.442695, %v1798_v30  ;;  %v1869_v60 = vmul.f32 %v1850_v46, %v1548_v2 }
 0x898   :  { %1719 = vperm.xlu2 %2363, %v3311_v51   ;;  %v1544_v51 = vsel %vm80_vm13, %v1451_v58, %v3319_v33  ;;  %v1547_v33 = vsel %vm80_vm13, %v1471_v20, %v3370_v37  ;;  %v1779_v58 = vperm.slane %v1771_v35, 0  ;;  %2449 = vpow2.f32 %v1819_v53 }
 0x899   :  { %v1865_v55 = vmul.f32 %v1848_v25, %v1544_v51  ;;  %v1868_v25 = vmul.f32 %v1850_v46, %v1547_v33  ;;  %v2448_v51 = vpop.eup %2447  ;;  %2451 = vpow2.f32 %v1817_v34 }
 0x89a   :  { %v3531_v11 = vpop.permute.xlu2 %1502  ;;  %v1799_v37 = vmul.f32 %v1779_v58, %v3475_v21  ;;  %v1800_v4 = vmul.f32 %v1779_v58, %v3478_v42  ;;  %v1845_v58 = vrot.slane %v3460_v48, 5 }
 0x89b   :  { %v3529_v29 = vadd.f32 %v1881_v41, %v1865_v55  ;;  %v1843_v41 = vrot.slane %v3460_v48, 3  ;;  %v3543_v20 = vadd.f32 %v1908_v49, %v1868_v25 }
 0x89c   :  { %v1823_v55 = vmul.f32 1.442695, %v1799_v37  ;;  %v1825_v0 = vmul.f32 1.442695, %v1800_v4 }
 0x89d   :  { %v1895_v35 = vmul.f32 %v2448_v51, %v3529_v29  ;;  %v1851_v34 = vperm.slane %v1843_v41, 0 }
 0x89e   :  { %v2450_v15 = vpop.eup %2449  ;;  %2453 = vpow2.f32 %v1823_v55 }
 0x89f   :  { %v3547_v26 = vadd.f32 %v1895_v35, %v1867_v28  ;;  %v1922_v25 = vmul.f32 %v2450_v15, %v3543_v20  ;;  %v1870_v37 = vmul.f32 %v1851_v34, %v1549_v62  ;;  %2455 = vpow2.f32 %v1821_v38 }
 0x8a0   :  { %2366 = vset.pattern.permute.xlu2 %v2766_v36  ;;  %v1773_v36 = vrot.slane %v3450_v40, 6  ;;  %v1801_v40 = vmul.f32 %v1780_v13, %v3475_v21  ;;  %v1853_v15 = vperm.slane %v1845_v58, 0 }
 0x8a1   :  { %v1490_v53 = vpop.permute.xlu1 %1489  ;;  %v3562_v30 = vadd.f32 %v1922_v25, %v1870_v37  ;;  %v1802_v25 = vmul.f32 %v1780_v13, %v3478_v42 }
 0x8a2   :  { %v1781_v33 = vperm.slane %v1773_v36, 0  ;;  %v1827_v49 = vmul.f32 1.442695, %v1801_v40  ;;  %v1844_v36 = vrot.slane %v3460_v48, 4 }
 0x8a4   :  { %v1803_v51 = vmul.f32 %v1781_v33, %v3475_v21  ;;  %v1550_v21 = vsel %vm80_vm13, %v1490_v53, %v3378_v44  ;;  %2457 = vpow2.f32 %v1827_v49  ;;  %v1852_v41 = vperm.slane %v1844_v36, 0 }
 0x8a5   :  { %2459 = vpow2.f32 %v1825_v0  ;;  %v1871_v62 = vmul.f32 %v1851_v34, %v1550_v21  ;;  %v1846_v49 = vrot.slane %v3460_v48, 6 }
 0x8a6   :  { %v1831_v28 = vmul.f32 1.442695, %v1803_v51 }
 0x8a7   :  { %v1854_v2 = vperm.slane %v1846_v49, 0 }
 0x8a8   :  { %1737 = vperm.xlu2 %2366, %v3317_v19   ;;  %v2452_v19 = vpop.eup %2451  ;;  %2461 = vpow2.f32 %v1831_v28 }
 0x8a9   :  { %v1909_v35 = vmul.f32 %v2452_v19, %v3547_v26  ;;  %v2454_v39 = vpop.eup %2453  ;;  %v1835_v19 = vmul.f32 1.442695, %v3509_v31  ;;  %v1829_v31 = vmul.f32 1.442695, %v1802_v25 }
 0x8aa   :  { %v1523_v22 = vpop.permute.xlu2 %1522  ;;  %v1936_v53 = vmul.f32 %v2454_v39, %v3562_v30  ;;  %v2456_v4 = vpop.eup %2455 }
 0x8ab   :  { %v3568_v55 = vadd.f32 %v1909_v35, %v1869_v60  ;;  %v2458_v51 = vpop.eup %2457  ;;  %v1555_v48 = vsel %vm80_vm13, %v1523_v22, %v3355_v54  ;;  %v1804_v35 = vmul.f32 %v1781_v33, %v3478_v42  ;;  %2463 = vpow2.f32 %v1835_v19  ;;  %v1666_v39 = vpop.permute.xlu0 %1665 }
 0x8ac   :  { %v2460_v36 = vpop.eup %2459  ;;  %v1876_v60 = vmul.f32 %v1854_v2, %v1555_v48  ;;  %2465 = vpow2.f32 %v1829_v31 }
 0x8ad   :  { %v1833_v54 = vmul.f32 1.442695, %v1804_v35 }
 0x8ae   :  { %v2462_v58 = vpop.eup %2461 }
 0x8af   :  { %2467 = vpow2.f32 %v1833_v54 }
 0x8b0   :  { %1749 = vperm.xlu2 %2366, %v3324_v10  }
 0x8b1   :  { %v1497_v40 = vpop.permute.xlu1 %1496  ;;  %v2464_v42 = vpop.eup %2463 }
 0x8b2   :  { %v1536_v43 = vpop.permute.xlu2 %1535  ;;  %v1551_v46 = vsel %vm80_vm13, %v1497_v40, %v3338_v14  ;;  %v1923_v14 = vmul.f32 %v2456_v4, %v3568_v55 }
 0x8b3   :  { %v1557_v44 = vsel %vm80_vm13, %v1536_v43, %v3365_v8  ;;  %v1872_v10 = vmul.f32 %v1852_v41, %v1551_v46  ;;  %v1553_v8 = vsel %vm80_vm13, %v3439_v56, %v3386_v12  ;;  %v1552_v12 = vsel %vm80_vm13, %v3531_v11, %v3394_v6  ;;  %v2466_v46 = vpop.eup %2465 }
 0x8b4   :  { %v1878_v38 = vmul.f32 %v3466_v7, %v1557_v44  ;;  %v3588_v37 = vadd.f32 %v1923_v14, %v1871_v62  ;;  %v1874_v7 = vmul.f32 %v1853_v15, %v1553_v8  ;;  %v1873_v22 = vmul.f32 %v1852_v41, %v1552_v12 }
 0x8b5   :  { %v3582_v34 = vadd.f32 %v1936_v53, %v1872_v10  ;;  %v1837_v43 = vmul.f32 1.442695, %v3506_v18  ;;  %v1752_v44 = vsel %vm80_vm13, %v1666_v39, %v3372_v5  ;;  %v2468_v19 = vpop.eup %2467 }
 0x8b6   :  { %v1937_v56 = vmul.f32 %v2460_v36, %v3588_v37 }
 0x8b7   :  { %v1950_v13 = vmul.f32 %v2458_v51, %v3582_v34  ;;  %2469 = vpow2.f32 %v1837_v43 }
 0x8b8   :  { %v3605_v33 = vadd.f32 %v1937_v56, %v1873_v22 }
 0x8b9   :  { %v3595_v0 = vadd.f32 %v1950_v13, %v1874_v7 }
 0x8ba   :  { %v1951_v18 = vmul.f32 %v2466_v46, %v3605_v33 }
 0x8bb   :  { %v1964_v21 = vmul.f32 %v2462_v58, %v3595_v0 }
 0x8bd   :  { %v3603_v28 = vadd.f32 %v1964_v21, %v1876_v60  ;;  %v2470_v51 = vpop.eup %2469 }
 0x8bf   :  { %v1978_v40 = vmul.f32 %v2464_v42, %v3603_v28 }
 0x8c1   :  { %v1516_v6 = vpop.permute.xlu1 %1515  ;;  %v3609_v11 = vadd.f32 %v1978_v40, %v1878_v38  ;;  %v1885_v38 = vmul.f32 %v3529_v29, %v1752_v44 }
 0x8c2   :  { %v1660_v62 = vpop.permute.xlu2 %1659  ;;  %v1554_v41 = vsel %vm80_vm13, %v1516_v6, %v3345_v9  ;;  %v1556_v9 = vsel %vm80_vm13, %v3445_v27, %v3397_v61 }
 0x8c3   :  { %v1751_v10 = vsel %vm80_vm13, %v1660_v62, %v3411_v17  ;;  %v1875_v53 = vmul.f32 %v1853_v15, %v1554_v41  ;;  %v1877_v49 = vmul.f32 %v1854_v2, %v1556_v9  ;;  %v1696_v41 = vpop.permute.xlu0 %1695 }
 0x8c4   :  { %v1884_v4 = vmul.f32 %v3502_v57, %v1751_v10 }
 0x8c5   :  { %v3623_v25 = vadd.f32 %v1951_v18, %v1875_v53 }
 0x8c6   :  { %v1886_v5 = vadd.f32 %v1885_v38, %v1884_v4  ;;  %v3663_v4 = vsel %vm109_vm12, %v3343_v52, %v3234_v50 }
 0x8c7   :  { %v1965_v17 = vmul.f32 %v2468_v19, %v3623_v25 }
 0x8c8   :  { %v1887_v15 = vrot.slane %v1886_v5, 4 }
 0x8c9   :  { %v3630_v14 = vadd.f32 %v1965_v17, %v1877_v49 }
 0x8ca   :  { %v1888_v57 = vadd.f32 %v1887_v15, %v1886_v5  ;;  %v3825_v15 = vld [vmem:[#allocation28_spill] sm:$0xff] }
 0x8cb   :  { %v1979_v29 = vmul.f32 %v2470_v51, %v3630_v14  ;;  %v1726_v19 = vpop.permute.xlu0 %1725 }
 0x8cc   :  { %v1889_v8 = vrot.slane %v1888_v57, 2 }
 0x8cd   :  { %v3634_v7 = vadd.f32 %v1979_v29, %v3473_v45 }
 0x8ce   :  { %v1890_v13 = vadd.f32 %v1889_v8, %v1888_v57  ;;  %v3826_v57 = vld [vmem:[#allocation19_spill] sm:$0xff] }
 0x8d0   :  { %v1891_v36 = vrot.slane %v1890_v13, 1 }
 0x8d1   :  { %v1672_v48 = vpop.permute.xlu1 %1671 }
 0x8d2   :  { %v1892_v31 = vadd.f32 %v1891_v36, %v1890_v13  ;;  %v1678_v61 = vpop.permute.xlu2 %1677  ;;  %v1753_v27 = vsel %vm80_vm13, %v1672_v48, %v3402_v3 }
 0x8d3   :  { %v1754_v35 = vsel %vm80_vm13, %v1678_v61, %v3419_v59  ;;  %v1898_v2 = vmul.f32 %v3522_v63, %v1753_v27 }
 0x8d4   :  { %1893 = vst [vmem:[#allocation2] sm:$0x1] %v1892_v31  ;;  %v1899_v58 = vmul.f32 %v3547_v26, %v1754_v35 }
 0x8d6   :  { %v1900_v45 = vadd.f32 %v1899_v58, %v1898_v2 }
 0x8d8   :  { %v1901_v12 = vrot.slane %v1900_v45, 4 }
 0x8d9   :  { %v1684_v56 = vpop.permute.xlu1 %1683 }
 0x8da   :  { %v1902_v60 = vadd.f32 %v1901_v12, %v1900_v45  ;;  %v1690_v21 = vpop.permute.xlu2 %1689  ;;  %v1755_v54 = vsel %vm80_vm13, %v1684_v56, %v3380_v1 }
 0x8db   :  { %v1756_v3 = vsel %vm80_vm13, %v1690_v21, %v3436_v23  ;;  %v1912_v59 = vmul.f32 %v3543_v20, %v1755_v54  ;;  %v1757_v23 = vsel %vm80_vm13, %v1696_v41, %v3391_v47  ;;  %v2001_v47 = vsub.f32 0.0, %v3663_v4  ;;  %v2268_v41 = vld [vmem:[%s3740_s4 + $0x38] sm:$0xff] }
 0x8dc   :  { %v1903_v22 = vrot.slane %v1902_v60, 2  ;;  %v1913_v63 = vmul.f32 %v3568_v55, %v1756_v3  ;;  %v1926_v53 = vmul.f32 %v3562_v30, %v1757_v23  ;;  %v3824_v30 = vld [vmem:[#allocation21_spill] sm:$0xff]  ;;  %2058 = vmatpush.bf16.msrb.mxu3 %v2268_v41 }
 0x8dd   :  { %v2002_v8 = vmul.f32 1.442695, %v2001_v47 }
 0x8de   :  { %v1904_v42 = vadd.f32 %v1903_v22, %v1902_v60  ;;  %v1914_v26 = vadd.f32 %v1913_v63, %v1912_v59 }
 0x8df   :  { %2471 = vpow2.f32 %v2002_v8 }
 0x8e0   :  { %v1905_v40 = vrot.slane %v1904_v42, 1  ;;  %v1915_v39 = vrot.slane %v1914_v26, 4 }
 0x8e2   :  { %v1906_v43 = vadd.f32 %v1905_v40, %v1904_v42  ;;  %v1916_v6 = vadd.f32 %v1915_v39, %v1914_v26  ;;  %v3827_v42 = vld [vmem:[#allocation24_spill] sm:$0xff]  ;;  %v3828_v40 = vld [vmem:[#allocation23_spill] sm:$0xff] }
 0x8e4   :  { %1907 = vst [vmem:[#allocation2 + $0x1] sm:$0x1] %v1906_v43  ;;  %v1917_v46 = vrot.slane %v1916_v6, 2 }
 0x8e6   :  { %v1918_v62 = vadd.f32 %v1917_v46, %v1916_v6 }
 0x8e8   :  { %v1919_v1 = vrot.slane %v1918_v62, 1 }
 0x8e9   :  { %v1702_v44 = vpop.permute.xlu1 %1701 }
 0x8ea   :  { %v1920_v20 = vadd.f32 %v1919_v1, %v1918_v62  ;;  %v1708_v10 = vpop.permute.xlu2 %1707  ;;  %v1758_v55 = vsel %vm80_vm13, %v1702_v44, %v3406_v32 }
 0x8eb   :  { %v1927_v18 = vmul.f32 %v3588_v37, %v1758_v55  ;;  %v1759_v5 = vsel %vm80_vm13, %v1708_v10, %v3442_v16  ;;  %v1762_v37 = vsel %vm80_vm13, %v1726_v19, %v3824_v30  ;;  %v3830_v55 = vld [vmem:[#allocation29_spill] sm:$0xff] }
 0x8ec   :  { %1921 = vst [vmem:[#allocation2 + $0x2] sm:$0x1] %v1920_v20  ;;  %v1940_v52 = vmul.f32 %v3582_v34, %v1759_v5  ;;  %v1955_v36 = vmul.f32 %v3623_v25, %v1762_v37  ;;  %v3829_v20 = vld [vmem:[#allocation25_spill] sm:$0xff] }
 0x8ed   :  { %v1928_v38 = vadd.f32 %v1927_v18, %v1926_v53 }
 0x8ef   :  { %v1929_v9 = vrot.slane %v1928_v38, 4 }
 0x8f1   :  { %v1930_v32 = vadd.f32 %v1929_v9, %v1928_v38  ;;  %v1714_v49 = vpop.permute.xlu1 %1713 }
 0x8f2   :  { %v1720_v17 = vpop.permute.xlu2 %1719  ;;  %v1760_v50 = vsel %vm80_vm13, %v1714_v49, %v3825_v15 }
 0x8f3   :  { %v1931_v51 = vrot.slane %v1930_v32, 2  ;;  %v1761_v29 = vsel %vm80_vm13, %v1720_v17, %v3826_v57  ;;  %v1941_v16 = vmul.f32 %v3605_v33, %v1760_v50  ;;  %v2472_v33 = vpop.eup %2471 }
 0x8f4   :  { %v1954_v13 = vmul.f32 %v3595_v0, %v1761_v29  ;;  %v2004_v3 = vadd.f32 1.0, %v2472_v33 }
 0x8f5   :  { %v1932_v48 = vadd.f32 %v1931_v51, %v1930_v32  ;;  %v1942_v31 = vadd.f32 %v1941_v16, %v1940_v52  ;;  %v2266_v32 = vld [vmem:[%s3740_s4 + $0x28] sm:$0xff] }
 0x8f6   :  { %v1956_v61 = vadd.f32 %v1955_v36, %v1954_v13  ;;  %2473 = vrcp.f32 %v2004_v3  ;;  %v2016_v29 = vand.u32 2147483648, %v2004_v3  ;;  %vm2010_vm2 = vweird.f32 %v2004_v3  ;;  %v3831_v13 = vld [vmem:[#allocation18_spill] sm:$0xff] }
 0x8f7   :  { %v1933_v27 = vrot.slane %v1932_v48, 1  ;;  %v1943_v35 = vrot.slane %v1942_v31, 4  ;;  %v2014_v16 = vand.u32 2147483647, %v2004_v3  ;;  %v1993_v36 = vperm.slane %v3831_v13, 4 }
 0x8f8   :  { %v1957_v2 = vrot.slane %v1956_v61, 4 }
 0x8f9   :  { %v1934_v34 = vadd.f32 %v1933_v27, %v1932_v48  ;;  %v1944_v58 = vadd.f32 %v1943_v35, %v1942_v31  ;;  %v2017_v48 = vor.u32 1.1754944e-38, %v2016_v29  ;;  %vm2015_vm9 = vcmp.eq.f32.partialorder %v2014_v16, 8.507059e+37 }
 0x8fa   :  { %v1958_v45 = vadd.f32 %v1957_v2, %v1956_v61  ;;  %v3832_v61 = vld [vmem:[#allocation30_spill] sm:$0xff] }
 0x8fb   :  { %1935 = vst [vmem:[#allocation2 + $0x3] sm:$0x1] %v1934_v34  ;;  %v1945_v12 = vrot.slane %v1944_v58, 2  ;;  %v1994_v27 = vmul.f32 %v1993_v36, %v3832_v61 }
 0x8fc   :  { %v1959_v56 = vrot.slane %v1958_v45, 2 }
 0x8fd   :  { %v1946_v60 = vadd.f32 %v1945_v12, %v1944_v58 }
 0x8fe   :  { %v1960_v21 = vadd.f32 %v1959_v56, %v1958_v45 }
 0x8ff   :  { %v1947_v54 = vrot.slane %v1946_v60, 1 }
 0x900   :  { %v1961_v0 = vrot.slane %v1960_v21, 1 }
 0x901   :  { %v1948_v25 = vadd.f32 %v1947_v54, %v1946_v60  ;;  %v1732_v59 = vpop.permute.xlu1 %1731  ;;  %v3833_v60 = vld [vmem:[#allocation22_spill] sm:$0xff] }
 0x902   :  { %v1962_v22 = vadd.f32 %v1961_v0, %v1960_v21  ;;  %v1738_v63 = vpop.permute.xlu2 %1737  ;;  %v1763_v26 = vsel %vm80_vm13, %v1732_v59, %v3827_v42  ;;  %v3834_v0 = vld [vmem:[#allocation20_spill] sm:$0xff]  ;;  %v3835_v59 = vld [vmem:[#allocation14_spill] sm:$0xff] }
 0x903   :  { %1949 = vst [vmem:[#allocation2 + $0x4] sm:$0x1] %v1948_v25  ;;  %v1764_v39 = vsel %vm80_vm13, %v1738_v63, %v3828_v40  ;;  %v1968_v43 = vmul.f32 %v3603_v28, %v1763_v26  ;;  %v2267_v28 = vld [vmem:[%s3740_s4 + $0x30] sm:$0xff] }
 0x904   :  { %1963 = vst [vmem:[#allocation2 + $0x5] sm:$0x1] %v1962_v22  ;;  %v1969_v6 = vmul.f32 %v3630_v14, %v1764_v39  ;;  %v2474_v14 = vpop.eup %2473  ;;  %2059 = vmatpush.bf16.msrb.mxu3 %v2267_v28 }
 0x905   :  { %v2006_v9 = vmul.f32 %v2474_v14, %v2004_v3 }
 0x906   :  { %v1970_v46 = vadd.f32 %v1969_v6, %v1968_v43 }
 0x907   :  { %v2007_v37 = vsub.f32 1.0, %v2006_v9 }
 0x908   :  { %v1971_v62 = vrot.slane %v1970_v46, 4  ;;  %2060 = vmatpush.bf16.msrb.mxu3 %v2266_v32 }
 0x909   :  { %v1744_v1 = vpop.permute.xlu1 %1743 }
 0x90a   :  { %v1972_v44 = vadd.f32 %v1971_v62, %v1970_v46  ;;  %v1750_v23 = vpop.permute.xlu2 %1749  ;;  %v1765_v10 = vsel %vm80_vm13, %v1744_v1, %v3829_v20 }
 0x90b   :  { %v1766_v53 = vsel %vm80_vm13, %v1750_v23, %v3830_v55  ;;  %v1982_v18 = vmul.f32 %v3609_v11, %v1765_v10  ;;  %vm2011_vm13 = vweird.f32 %v2474_v14 }
 0x90c   :  { %v1973_v38 = vrot.slane %v1972_v44, 2  ;;  %v1983_v19 = vmul.f32 %v3634_v7, %v1766_v53  ;;  %v2008_v7 = vmul.f32 %v2474_v14, %v2007_v37  ;;  %2061 = vmatpush.bf16.msrb.mxu3 %v2265_v24  ;;  %vm2012_vm3 = vmor %vm2010_vm2, %vm2011_vm13  ;;  %v2068_v53 = vld [vmem:[%s3743_s7] sm:$0x3]  ;;  %s2563_s7 = smov [#allocation8]  }
 0x90d   :  { %s2125_s19 = sshll.u32 %s2563_s7, 4  ;;  %s2126_s19 = int_to_ptr.vmem [resolvable:$true] %s2125_s19 }
 0x90e   :  { %v1974_v47 = vadd.f32 %v1973_v38, %v1972_v44  ;;  %v1984_v5 = vadd.f32 %v1983_v19, %v1982_v18  ;;  %v2009_v51 = vadd.f32 %v2474_v14, %v2008_v7 }
 0x910   :  { %v1975_v49 = vrot.slane %v1974_v47, 1  ;;  %v1985_v30 = vrot.slane %v1984_v5, 4  ;;  %v2013_v8 = vsel %vm2012_vm3, %v2474_v14, %v2009_v51 }
 0x911   :  { %v2018_v31 = vsel %vm2015_vm9, %v2017_v48, %v2013_v8 }
 0x912   :  { %v1976_v17 = vadd.f32 %v1975_v49, %v1974_v47  ;;  %v1986_v15 = vadd.f32 %v1985_v30, %v1984_v5  ;;  %v2020_v2 = vmul.f32 %v2018_v31, %v3663_v4  ;;  %v2113_v47 = vperm.slane %v2068_v53, 0 }
 0x913   :  { %v2116_v30 = vperm.slane %v2068_v53, 1 }
 0x914   :  { %1977 = vst [vmem:[#allocation2 + $0x6] sm:$0x1] %v1976_v17  ;;  %v1987_v11 = vrot.slane %v1986_v15, 2 }
 0x916   :  { %v1988_v50 = vadd.f32 %v1987_v11, %v1986_v15 }
 0x918   :  { %v1989_v52 = vrot.slane %v1988_v50, 1 }
 0x91a   :  { %v1990_v57 = vadd.f32 %v1989_v52, %v1988_v50 }
 0x91c   :  { %1991 = vst [vmem:[#allocation2 + $0x7] sm:$0x1] %v1990_v57 }
 0x923   :  { %v1992_v35 = vld [vmem:[#allocation2] sm:$0xff] }
 0x924   :  { %v1995_v34 = vadd.f32 %v1994_v27, %v1992_v35 }
 0x926   :  { %v2021_v58 = vmul.f32 %v2020_v2, %v1995_v34 }
 0x928   :  { %2023 = vrot.lane.b32.xlu0 %v2021_v58, %s2562_s24 }
 0x99a   :  { %v2024_v45 = vpop.permute.xlu0 %2023 }
 0x99b   :  { %v2026_v12 = vpack.c.bf16 %v2024_v45, %v2021_v58 }
 0x99d   :  { %2248 = vmatmul.msk.bf16.vlgmr.msrb.gmra.mxu3 %vm109_vm12, %v2026_v12 }
 0xa20   :  { %v2063_v56 = vpop.f32.mrf.mxu3 }
 0xa21   :  { %v2064_v33 = vadd.f32 %v2063_v56, %v3833_v60 }
 0xa23   :  { %v2069_v21 = vsel %vm113_vm0, %v2064_v33, 0.0 }
 0xa24   :  { %2070 = vadd.xlane.f32.xlu1 %v2069_v21 }
 0xa28   :  { %v2065_v54 = vpop.f32.mrf.mxu3 }
 0xa29   :  { %v2066_v3 = vadd.f32 %v2065_v54, %v3834_v0 }
 0xa2b   :  { %v2072_v25 = vsel %vm113_vm0, %v2066_v3, 0.0 }
 0xa2c   :  { %2073 = vadd.xlane.f32.xlu2 %v2072_v25 }
 0xa97   :  { %v2071_v4 = vpop.xlane.xlu1 %2070 }
 0xa98   :  { %v2075_v22 = vmul.f32 %v2071_v4, %v3835_v59 }
 0xa9a   :  { %v2077_v63 = vsub.f32 %v2064_v33, %v2075_v22 }
 0xa9c   :  { %v2079_v42 = vmul.f32 %v2077_v63, %v2077_v63 }
 0xa9e   :  { %v2081_v26 = vsel %vm113_vm0, %v2079_v42, 0.0 }
 0xa9f   :  { %v2074_v40 = vpop.xlane.xlu2 %2073  ;;  %2082 = vadd.xlane.f32.xlu0 %v2081_v26 }
 0xaa0   :  { %v2076_v39 = vmul.f32 %v2074_v40, %v3835_v59 }
 0xaa2   :  { %v2078_v43 = vsub.f32 %v2066_v3, %v2076_v39 }
 0xaa4   :  { %v2080_v6 = vmul.f32 %v2078_v43, %v2078_v43 }
 0xaa6   :  { %v2084_v46 = vsel %vm113_vm0, %v2080_v6, 0.0 }
 0xaa7   :  { %2085 = vadd.xlane.f32.xlu1 %v2084_v46 }
 0xb12   :  { %v2083_v62 = vpop.xlane.xlu0 %2082 }
 0xb13   :  { %v2087_v41 = vmul.f32 %v2083_v62, %v3835_v59 }
 0xb15   :  { %v2089_v1 = vadd.f32 1e-05, %v2087_v41 }
 0xb17   :  { %2475 = vrsqrt.f32 %v2089_v1  ;;  %vm2097_vm8 = vweird.f32 %v2089_v1 }
 0xb1a   :  { %v2086_v44 = vpop.xlane.xlu1 %2085 }
 0xb1b   :  { %v2088_v23 = vmul.f32 %v2086_v44, %v3835_v59 }
 0xb1d   :  { %v2476_v20 = vpop.eup %2475  ;;  %v2090_v10 = vadd.f32 1e-05, %v2088_v23 }
 0xb1e   :  { %v2092_v28 = vmul.f32 %v2476_v20, %v2089_v1  ;;  %vm2098_vm12 = vweird.f32 %v2476_v20 }
 0xb1f   :  { %2477 = vrsqrt.f32 %v2090_v10  ;;  %vm2099_vm11 = vmor %vm2097_vm8, %vm2098_vm12  ;;  %vm2107_vm14 = vweird.f32 %v2090_v10 }
 0xb20   :  { %v2093_v14 = vmul.f32 %v2476_v20, %v2092_v28 }
 0xb22   :  { %v2094_v55 = vmul.f32 0.5, %v2093_v14 }
 0xb24   :  { %v2095_v18 = vsub.f32 1.5, %v2094_v55 }
 0xb25   :  { %v2478_v38 = vpop.eup %2477 }
 0xb26   :  { %v2096_v19 = vmul.f32 %v2476_v20, %v2095_v18  ;;  %v2102_v9 = vmul.f32 %v2478_v38, %v2090_v10  ;;  %vm2108_vm10 = vweird.f32 %v2478_v38 }
 0xb27   :  { %vm2109_vm15 = vmor %vm2107_vm14, %vm2108_vm10 }
 0xb28   :  { %v2100_v5 = vsel %vm2099_vm11, %v2476_v20, %v2096_v19  ;;  %v2103_v32 = vmul.f32 %v2478_v38, %v2102_v9 }
 0xb29   :  { %v2111_v49 = vmul.f32 %v2100_v5, %v2077_v63 }
 0xb2a   :  { %v2104_v37 = vmul.f32 0.5, %v2103_v32 }
 0xb2b   :  { %v2114_v17 = vmul.f32 %v2113_v47, %v2111_v49 }
 0xb2c   :  { %v2105_v15 = vsub.f32 1.5, %v2104_v37 }
 0xb2d   :  { %v2117_v24 = vadd.f32 %v2116_v30, %v2114_v17 }
 0xb2e   :  { %v2106_v11 = vmul.f32 %v2478_v38, %v2105_v15 }
 0xb2f   :  { %2119 = vst.msk [vmem:[#allocation8] sm:$0xff] %vm113_vm0, %v2117_v24 }
 0xb30   :  { %v2110_v7 = vsel %vm2109_vm15, %v2478_v38, %v2106_v11 }
 0xb31   :  { %v2112_v50 = vmul.f32 %v2110_v7, %v2078_v43 }
 0xb33   :  { %v2115_v52 = vmul.f32 %v2113_v47, %v2112_v50 }
 0xb35   :  { %v2118_v51 = vadd.f32 %v2116_v30, %v2115_v52 }
 0xb37   :  { %2120 = vst.msk [vmem:[#allocation8 + $0x8] sm:$0xff] %vm113_vm0, %v2118_v51 }
 0xb38   :  { %2133 = dma.vmem_to_hbm [thread:$0]  %s2126_s19, 256, %s2128_s22, [#allocation5], %s2558_s13, %s2558_s13, %s2559_s14  }
 0xb39   :  { %2555 = dma.done.wait [#allocation5], 256  }
 0xb3a   :  { %2556 = vsyncadd [#allocation5], 4294967040 }
 0xb3b   :  { %2138 = vsyncpa [#allocation4], 1 }
 0xb3c   :  { %2139 = vsyncpa [#allocation7], 1 }
 0xb3d   :  { %2140 = vsyncpa [#allocation5], 1 }

</bundles_post_ra>
